<compile_context>
chip_gen: v7x
topology: tpu7x:2x2x1
jax: 0.10.0
libtpu: 0.0.40
codegen_flags: <defaults>
</compile_context>

<pallas_src>
import jax
import jax.numpy as jnp
from jax import lax
from jax.experimental import pallas as pl
from jax.experimental.pallas import tpu as pltpu

BIG = 1e30  # stand-in for +/- inf in the maxpool border handling (every 3x3
            # stride-1 pad-1 window contains >=1 real element, so it is exact).


def _make_inception_kernel(H, W, Cin, c1, c2_0, c2_1, c3_0, c3_1, c4):
    HW = H * W
    f32 = jnp.float32

    def kernel(x_ref,
               w1_ref, b1_ref,
               w21_ref, b21_ref, w22_ref, b22_ref,
               w31_ref, b31_ref, w32_ref, b32_ref,
               w4_ref, b4_ref,
               masks_ref, o_ref):
        x = x_ref[...]                       # (Cin, HW) channels-first, lane-dense

        # --- lane-rotation direction probe -----------------------------------
        # We only rely on "rotate by a static amount along lanes"; the probe
        # detects which direction pltpu.roll rotates so the tap shifts are
        # correct regardless of the convention (the blend weight is exactly
        # 0.0 / 1.0, so the result is bit-exact either way).
        probe = lax.broadcasted_iota(jnp.int32, (8, 128), 1)
        rp = pltpu.roll(probe, 1, axis=1)
        w_np = (rp[0:1, 1:2] == 0).astype(f32)   # (1, 1): 1.0 if np.roll semantics
        w_alt = 1.0 - w_np

        def shift(v, s):
            """Returns t with t[:, p] == v[:, p + s] for every position that the
            corresponding validity mask keeps (wrapped positions are masked)."""
            if s % HW == 0:
                return v
            r_np = pltpu.roll(v, (-s) % HW, axis=1)
            r_alt = pltpu.roll(v, s % HW, axis=1)
            return w_np * r_np + w_alt * r_alt

        def mask(ddy, ddx):
            idx = (ddy + 2) * 5 + (ddx + 2)
            return masks_ref[idx:idx + 1, :]     # (1, HW) of {0.0, 1.0}

        def conv1x1(w_ref_, b_ref_, inp):
            # (Cout, Cin) x (Cin, HW) -> (Cout, HW), spatial on the MXU N/lane dim
            return jnp.dot(w_ref_[...], inp, preferred_element_type=f32) + b_ref_[...]

        relu = lambda v: jnp.maximum(v, 0.0)

        # ---- branch 1: relu(1x1 conv) ----------------------------------------
        p1 = relu(conv1x1(w1_ref, b1_ref, x))
        o_ref[0:c1, :] = p1

        # ---- branch 2: relu(3x3 conv(pad=1) of relu(1x1 conv)) ---------------
        a = relu(conv1x1(w21_ref, b21_ref, x))           # (c2_0, HW)
        acc2 = jnp.zeros((c2_1, HW), f32)
        for dy in range(3):
            for dx in range(3):
                ddy, ddx = dy - 1, dx - 1
                tap = shift(a, ddy * W + ddx) * mask(ddy, ddx)
                acc2 = acc2 + jnp.dot(w22_ref[dy * 3 + dx], tap,
                                      preferred_element_type=f32)
        p2 = relu(acc2 + b22_ref[...])
        o_ref[c1:c1 + c2_1, :] = p2

        # ---- branch 3: relu(5x5 conv(pad=2) of relu(1x1 conv)) ---------------
        b = relu(conv1x1(w31_ref, b31_ref, x))           # (c3_0, HW)
        acc3 = jnp.zeros((c3_1, HW), f32)
        for dy in range(5):
            for dx in range(5):
                ddy, ddx = dy - 2, dx - 2
                tap = shift(b, ddy * W + ddx) * mask(ddy, ddx)
                acc3 = acc3 + jnp.dot(w32_ref[dy * 5 + dx], tap,
                                      preferred_element_type=f32)
        p3 = relu(acc3 + b32_ref[...])
        o_ref[c1 + c2_1:c1 + c2_1 + c3_1, :] = p3

        # ---- branch 4: relu(1x1 conv(3x3 maxpool, stride 1, pad 1)) ----------
        pooled = jnp.full((Cin, HW), -BIG, f32)
        for dy in range(3):
            for dx in range(3):
                ddy, ddx = dy - 1, dx - 1
                m = mask(ddy, ddx)
                cand = shift(x, ddy * W + ddx) * m + (m - 1.0) * BIG
                pooled = jnp.maximum(pooled, cand)
        p4 = relu(conv1x1(w4_ref, b4_ref, pooled))
        o_ref[c1 + c2_1 + c3_1:c1 + c2_1 + c3_1 + c4, :] = p4

    return kernel


def inception_pallas(x_nchw, params):
    """Inception forward. x_nchw: (N, Cin, H, W). Returns (N, Cout_total, H, W)."""
    (w1, b1, w21, b21, w22, b22, w31, b31, w32, b32, w4, b4) = params
    f32 = jnp.float32
    x_nchw = x_nchw.astype(f32)
    N, Cin, H, W = x_nchw.shape
    HW = H * W
    c1 = w1.shape[1]
    c2_0, c2_1 = w21.shape[1], w22.shape[3]
    c3_0, c3_1 = w31.shape[1], w32.shape[3]
    c4 = w4.shape[1]
    Ctot = c1 + c2_1 + c3_1 + c4

    x = x_nchw.reshape(N, Cin, HW)            # free reshape (stays NCHW-ordered)

    # channels-first weights / biases (tiny, reshaped once outside the kernel)
    w1_cf = jnp.asarray(w1, f32).T
    w21_cf = jnp.asarray(w21, f32).T
    w31_cf = jnp.asarray(w31, f32).T
    w4_cf = jnp.asarray(w4, f32).T
    w22_cf = jnp.transpose(jnp.asarray(w22, f32), (0, 1, 3, 2)).reshape(9, c2_1, c2_0)
    w32_cf = jnp.transpose(jnp.asarray(w32, f32), (0, 1, 3, 2)).reshape(25, c3_1, c3_0)
    b1_cf = jnp.asarray(b1, f32).reshape(-1, 1)
    b21_cf = jnp.asarray(b21, f32).reshape(-1, 1)
    b22_cf = jnp.asarray(b22, f32).reshape(-1, 1)
    b31_cf = jnp.asarray(b31, f32).reshape(-1, 1)
    b32_cf = jnp.asarray(b32, f32).reshape(-1, 1)
    b4_cf = jnp.asarray(b4, f32).reshape(-1, 1)

    # Validity masks for shifted whole-plane taps, one row per (ddy, ddx) with
    # ddy, ddx in [-2, 2]: 1.0 where the shifted source pixel exists, else 0.0.
    pos = jnp.arange(HW, dtype=jnp.int32)
    row = pos // W
    col = pos % W
    mask_rows = []
    for ddy in range(-2, 3):
        for ddx in range(-2, 3):
            valid = ((row + ddy >= 0) & (row + ddy < H) &
                     (col + ddx >= 0) & (col + ddx < W))
            mask_rows.append(valid.astype(f32))
    masks = jnp.stack(mask_rows, axis=0)      # (25, HW)

    kernel = _make_inception_kernel(H, W, Cin, c1, c2_0, c2_1, c3_0, c3_1, c4)

    param_list = [w1_cf, b1_cf, w21_cf, b21_cf, w22_cf, b22_cf,
                  w31_cf, b31_cf, w32_cf, b32_cf, w4_cf, b4_cf, masks]

    def full_spec(a):
        nd = a.ndim
        return pl.BlockSpec(a.shape, lambda n, _nd=nd: (0,) * _nd)

    in_specs = [pl.BlockSpec((None, Cin, HW), lambda n: (n, 0, 0))]
    in_specs += [full_spec(p) for p in param_list]

    out_shape = jax.ShapeDtypeStruct((N, Ctot, HW), jnp.float32)
    out_specs = pl.BlockSpec((None, Ctot, HW), lambda n: (n, 0, 0))

    grid_spec = pltpu.PrefetchScalarGridSpec(
        num_scalar_prefetch=0,
        grid=(N,),
        in_specs=in_specs,
        out_specs=out_specs)

    out = pl.pallas_call(
        kernel,
        out_shape=out_shape,
        grid_spec=grid_spec,
        compiler_params=pltpu.CompilerParams(
            dimension_semantics=("parallel",)),   # batch items are independent
    )(x, *param_list)

    return out.reshape(N, Ctot, H, W)             # free reshape to NCHW


def inception_ref(x_nchw, params):
    """Pure-JAX reference (matches the PyTorch forward exactly)."""
    (w1, b1, w21, b21, w22, b22, w31, b31, w32, b32, w4, b4) = params
    x = jnp.transpose(x_nchw, (0, 2, 3, 1)).astype(jnp.float32)
    dn = ('NHWC', 'HWIO', 'NHWC')

    def conv(inp, w_hwio, b, pad):
        y = lax.conv_general_dilated(inp, w_hwio, (1, 1),
                                     [(pad, pad), (pad, pad)],
                                     dimension_numbers=dn)
        return y + b.reshape(1, 1, 1, -1)

    relu = lambda v: jnp.maximum(v, 0.0)
    p1 = relu(conv(x, w1.reshape(1, 1, *w1.shape), b1, 0))
    a = relu(conv(x, w21.reshape(1, 1, *w21.shape), b21, 0))
    p2 = relu(conv(a, w22, b22, 1))
    bb = relu(conv(x, w31.reshape(1, 1, *w31.shape), b31, 0))
    p3 = relu(conv(bb, w32, b32, 2))
    mp = lax.reduce_window(x, -jnp.inf, lax.max, (1, 3, 3, 1), (1, 1, 1, 1),
                           [(0, 0), (1, 1), (1, 1), (0, 0)])
    p4 = relu(conv(mp, w4.reshape(1, 1, *w4.shape), b4, 0))
    out = jnp.concatenate([p1, p2, p3, p4], axis=-1)
    return jnp.transpose(out, (0, 3, 1, 2))


if __name__ == "__main__":
    # Inception(in_channels=4, c1=8, c2=(6, 8), c3=(4, 8), c4=8) at small shapes.
    in_channels, c1, c2, c3, c4 = 4, 8, (6, 8), (4, 8), 8
    N, H, W = 2, 16, 16

    key = jax.random.PRNGKey(0)
    keys = jax.random.split(key, 13)
    x = jax.random.normal(keys[0], (N, in_channels, H, W), jnp.float32)

    # Deterministic synthetic parameters.  1x1 conv weights are stored as
    # (Cin, Cout); KxK conv weights as (kh, kw, Cin, Cout) (i.e. PyTorch's
    # (Cout, Cin, kh, kw) transposed to HWIO) — semantics are identical.
    def w(k, shape):
        return 0.1 * jax.random.normal(k, shape, jnp.float32)

    params = (
        w(keys[1], (in_channels, c1)),        w(keys[2], (c1,)),        # p1_1
        w(keys[3], (in_channels, c2[0])),     w(keys[4], (c2[0],)),     # p2_1
        w(keys[5], (3, 3, c2[0], c2[1])),     w(keys[6], (c2[1],)),     # p2_2
        w(keys[7], (in_channels, c3[0])),     w(keys[8], (c3[0],)),     # p3_1
        w(keys[9], (5, 5, c3[0], c3[1])),     w(keys[10], (c3[1],)),    # p3_2
        w(keys[11], (in_channels, c4)),       w(keys[12], (c4,)),       # p4_2
    )

    out = jax.block_until_ready(inception_pallas(x, params))
    ref = jax.block_until_ready(inception_ref(x, params))

    assert out.shape == (N, c1 + c2[1] + c3[1] + c4, H, W), out.shape
    err = float(jnp.max(jnp.abs(out - ref)))
    assert jnp.allclose(out, ref, rtol=1e-4, atol=1e-4), f"max abs err {err}"
    print("KERNEL_OK")
</pallas_src>

<mosaic_0001>
module attributes {stable_mosaic.version = 11 : i64} {
  func.func @kernel(%arg0: i32, %arg1: memref<1x4x256xf32, #tpu.memory_space<vmem>>, %arg2: memref<8x4xf32, #tpu.memory_space<vmem>>, %arg3: memref<8x1xf32, #tpu.memory_space<vmem>>, %arg4: memref<6x4xf32, #tpu.memory_space<vmem>>, %arg5: memref<6x1xf32, #tpu.memory_space<vmem>>, %arg6: memref<9x8x6xf32, #tpu.memory_space<vmem>>, %arg7: memref<8x1xf32, #tpu.memory_space<vmem>>, %arg8: memref<4x4xf32, #tpu.memory_space<vmem>>, %arg9: memref<4x1xf32, #tpu.memory_space<vmem>>, %arg10: memref<25x8x4xf32, #tpu.memory_space<vmem>>, %arg11: memref<8x1xf32, #tpu.memory_space<vmem>>, %arg12: memref<8x4xf32, #tpu.memory_space<vmem>>, %arg13: memref<8x1xf32, #tpu.memory_space<vmem>>, %arg14: memref<25x256xf32, #tpu.memory_space<vmem>>, %arg15: memref<1x32x256xf32, #tpu.memory_space<vmem>>) attributes {dimension_semantics = [#tpu.dimension_semantics<parallel>], iteration_bounds = array<i64: 2>, scalar_prefetch = 0 : i64, scratch_operands = 0 : i64, tpu.core_type = #tpu.core_type<tc>, window_params = [{transform_indices = @transform_0, window_bounds = array<i64: 1, 4, 256>}, {pipeline_mode = #tpu.pipeline_mode<synchronous>, transform_indices = @transform_1, window_bounds = array<i64: 8, 4>}, {pipeline_mode = #tpu.pipeline_mode<synchronous>, transform_indices = @transform_2, window_bounds = array<i64: 8, 1>}, {pipeline_mode = #tpu.pipeline_mode<synchronous>, transform_indices = @transform_3, window_bounds = array<i64: 6, 4>}, {pipeline_mode = #tpu.pipeline_mode<synchronous>, transform_indices = @transform_4, window_bounds = array<i64: 6, 1>}, {pipeline_mode = #tpu.pipeline_mode<synchronous>, transform_indices = @transform_5, window_bounds = array<i64: 9, 8, 6>}, {pipeline_mode = #tpu.pipeline_mode<synchronous>, transform_indices = @transform_6, window_bounds = array<i64: 8, 1>}, {pipeline_mode = #tpu.pipeline_mode<synchronous>, transform_indices = @transform_7, window_bounds = array<i64: 4, 4>}, {pipeline_mode = #tpu.pipeline_mode<synchronous>, transform_indices = @transform_8, window_bounds = array<i64: 4, 1>}, {pipeline_mode = #tpu.pipeline_mode<synchronous>, transform_indices = @transform_9, window_bounds = array<i64: 25, 8, 4>}, {pipeline_mode = #tpu.pipeline_mode<synchronous>, transform_indices = @transform_10, window_bounds = array<i64: 8, 1>}, {pipeline_mode = #tpu.pipeline_mode<synchronous>, transform_indices = @transform_11, window_bounds = array<i64: 8, 4>}, {pipeline_mode = #tpu.pipeline_mode<synchronous>, transform_indices = @transform_12, window_bounds = array<i64: 8, 1>}, {pipeline_mode = #tpu.pipeline_mode<synchronous>, transform_indices = @transform_13, window_bounds = array<i64: 25, 256>}, {transform_indices = @transform_14, window_bounds = array<i64: 1, 32, 256>}]} {
    %c0 = arith.constant 0 : index
    %c0_0 = arith.constant 0 : index
    %c0_1 = arith.constant 0 : index
    %0 = vector.load %arg1[%c0, %c0_0, %c0_1] : memref<1x4x256xf32, #tpu.memory_space<vmem>>, vector<1x4x256xf32>
    %1 = vector.shape_cast %0 : vector<1x4x256xf32> to vector<4x256xf32>
    %2 = tpu.iota {dimensions = array<i32: 1>} : vector<8x128xi32>
    %c1_i32 = arith.constant 1 : i32
    %3 = tpu.dynamic_rotate %2 by %c1_i32 dim 1 : vector<8x128xi32>, i32 -> vector<8x128xi32>
    %4 = vector.extract_strided_slice %3 {offsets = [0, 1], sizes = [1, 1], strides = [1, 1]} : vector<8x128xi32> to vector<1x1xi32>
    %c0_i32 = arith.constant 0 : i32
    %5 = vector.broadcast %c0_i32 : i32 to vector<1x1xi32>
    %6 = arith.cmpi eq, %4, %5 : vector<1x1xi32>
    %7 = arith.extui %6 : vector<1x1xi1> to vector<1x1xi32>
    %8 = arith.sitofp %7 : vector<1x1xi32> to vector<1x1xf32>
    %cst = arith.constant 1.000000e+00 : f32
    %9 = vector.broadcast %cst : f32 to vector<1x1xf32>
    %10 = arith.subf %9, %8 : vector<1x1xf32>
    %c0_2 = arith.constant 0 : index
    %c0_3 = arith.constant 0 : index
    %11 = vector.load %arg2[%c0_2, %c0_3] : memref<8x4xf32, #tpu.memory_space<vmem>>, vector<8x4xf32>
    %cst_4 = arith.constant dense<0.000000e+00> : vector<8x256xf32>
    %12 = tpu.matmul %11, %1, %cst_4 {dimension_numbers = #tpu.dot_dimension_numbers<[1], [0], [0], [1], [0, 0, 1, 1], [], []>} : vector<8x4xf32>, vector<4x256xf32>, vector<8x256xf32> -> vector<8x256xf32>
    %c0_5 = arith.constant 0 : index
    %c0_6 = arith.constant 0 : index
    %13 = vector.load %arg3[%c0_5, %c0_6] : memref<8x1xf32, #tpu.memory_space<vmem>>, vector<8x1xf32>
    %14 = vector.broadcast %13 : vector<8x1xf32> to vector<8x256xf32>
    %15 = arith.addf %12, %14 : vector<8x256xf32>
    %cst_7 = arith.constant 0.000000e+00 : f32
    %16 = vector.broadcast %cst_7 : f32 to vector<8x256xf32>
    %17 = arith.maximumf %15, %16 : vector<8x256xf32>
    %c0_8 = arith.constant 0 : index
    %c0_9 = arith.constant 0 : index
    %c0_10 = arith.constant 0 : index
    %18 = vector.load %arg15[%c0_8, %c0_9, %c0_10] : memref<1x32x256xf32, #tpu.memory_space<vmem>>, vector<1x8x256xf32>
    %19 = vector.shape_cast %18 : vector<1x8x256xf32> to vector<8x256xf32>
    %20 = vector.shape_cast %17 : vector<8x256xf32> to vector<1x8x256xf32>
    tpu.vector_store %arg15[%c0_8, %c0_9, %c0_10], %20 {strides = array<i32>} : memref<1x32x256xf32, #tpu.memory_space<vmem>>, vector<1x8x256xf32>,
    %c0_11 = arith.constant 0 : index
    %c0_12 = arith.constant 0 : index
    %21 = vector.load %arg4[%c0_11, %c0_12] : memref<6x4xf32, #tpu.memory_space<vmem>>, vector<6x4xf32>
    %cst_13 = arith.constant dense<0.000000e+00> : vector<6x256xf32>
    %22 = tpu.matmul %21, %1, %cst_13 {dimension_numbers = #tpu.dot_dimension_numbers<[1], [0], [0], [1], [0, 0, 1, 1], [], []>} : vector<6x4xf32>, vector<4x256xf32>, vector<6x256xf32> -> vector<6x256xf32>
    %c0_14 = arith.constant 0 : index
    %c0_15 = arith.constant 0 : index
    %23 = vector.load %arg5[%c0_14, %c0_15] : memref<6x1xf32, #tpu.memory_space<vmem>>, vector<6x1xf32>
    %24 = vector.broadcast %23 : vector<6x1xf32> to vector<6x256xf32>
    %25 = arith.addf %22, %24 : vector<6x256xf32>
    %cst_16 = arith.constant 0.000000e+00 : f32
    %26 = vector.broadcast %cst_16 : f32 to vector<6x256xf32>
    %27 = arith.maximumf %25, %26 : vector<6x256xf32>
    %cst_17 = arith.constant 0.000000e+00 : f32
    %28 = vector.broadcast %cst_17 : f32 to vector<8x256xf32>
    %c17_i32 = arith.constant 17 : i32
    %29 = tpu.dynamic_rotate %27 by %c17_i32 dim 1 : vector<6x256xf32>, i32 -> vector<6x256xf32>
    %c239_i32 = arith.constant 239 : i32
    %30 = tpu.dynamic_rotate %27 by %c239_i32 dim 1 : vector<6x256xf32>, i32 -> vector<6x256xf32>
    %31 = vector.broadcast %8 : vector<1x1xf32> to vector<6x256xf32>
    %32 = arith.mulf %31, %29 : vector<6x256xf32>
    %33 = vector.broadcast %10 : vector<1x1xf32> to vector<6x256xf32>
    %34 = arith.mulf %33, %30 : vector<6x256xf32>
    %35 = arith.addf %32, %34 : vector<6x256xf32>
    %c6 = arith.constant 6 : index
    %c0_18 = arith.constant 0 : index
    %36 = vector.load %arg14[%c6, %c0_18] : memref<25x256xf32, #tpu.memory_space<vmem>>, vector<1x256xf32>
    %37 = vector.broadcast %36 : vector<1x256xf32> to vector<6x256xf32>
    %38 = arith.mulf %35, %37 : vector<6x256xf32>
    %c0_19 = arith.constant 0 : index
    %c0_20 = arith.constant 0 : index
    %c0_21 = arith.constant 0 : index
    %39 = vector.load %arg6[%c0_19, %c0_20, %c0_21] : memref<9x8x6xf32, #tpu.memory_space<vmem>>, vector<1x8x6xf32>
    %40 = vector.shape_cast %39 : vector<1x8x6xf32> to vector<8x6xf32>
    %cst_22 = arith.constant dense<0.000000e+00> : vector<8x256xf32>
    %41 = tpu.matmul %40, %38, %cst_22 {dimension_numbers = #tpu.dot_dimension_numbers<[1], [0], [0], [1], [0, 0, 1, 1], [], []>} : vector<8x6xf32>, vector<6x256xf32>, vector<8x256xf32> -> vector<8x256xf32>
    %42 = arith.addf %28, %41 : vector<8x256xf32>
    %c16_i32 = arith.constant 16 : i32
    %43 = tpu.dynamic_rotate %27 by %c16_i32 dim 1 : vector<6x256xf32>, i32 -> vector<6x256xf32>
    %c240_i32 = arith.constant 240 : i32
    %44 = tpu.dynamic_rotate %27 by %c240_i32 dim 1 : vector<6x256xf32>, i32 -> vector<6x256xf32>
    %45 = vector.broadcast %8 : vector<1x1xf32> to vector<6x256xf32>
    %46 = arith.mulf %45, %43 : vector<6x256xf32>
    %47 = vector.broadcast %10 : vector<1x1xf32> to vector<6x256xf32>
    %48 = arith.mulf %47, %44 : vector<6x256xf32>
    %49 = arith.addf %46, %48 : vector<6x256xf32>
    %c7 = arith.constant 7 : index
    %c0_23 = arith.constant 0 : index
    %50 = vector.load %arg14[%c7, %c0_23] : memref<25x256xf32, #tpu.memory_space<vmem>>, vector<1x256xf32>
    %51 = vector.broadcast %50 : vector<1x256xf32> to vector<6x256xf32>
    %52 = arith.mulf %49, %51 : vector<6x256xf32>
    %c1 = arith.constant 1 : index
    %c0_24 = arith.constant 0 : index
    %c0_25 = arith.constant 0 : index
    %53 = vector.load %arg6[%c1, %c0_24, %c0_25] : memref<9x8x6xf32, #tpu.memory_space<vmem>>, vector<1x8x6xf32>
    %54 = vector.shape_cast %53 : vector<1x8x6xf32> to vector<8x6xf32>
    %cst_26 = arith.constant dense<0.000000e+00> : vector<8x256xf32>
    %55 = tpu.matmul %54, %52, %cst_26 {dimension_numbers = #tpu.dot_dimension_numbers<[1], [0], [0], [1], [0, 0, 1, 1], [], []>} : vector<8x6xf32>, vector<6x256xf32>, vector<8x256xf32> -> vector<8x256xf32>
    %56 = arith.addf %42, %55 : vector<8x256xf32>
    %c15_i32 = arith.constant 15 : i32
    %57 = tpu.dynamic_rotate %27 by %c15_i32 dim 1 : vector<6x256xf32>, i32 -> vector<6x256xf32>
    %c241_i32 = arith.constant 241 : i32
    %58 = tpu.dynamic_rotate %27 by %c241_i32 dim 1 : vector<6x256xf32>, i32 -> vector<6x256xf32>
    %59 = vector.broadcast %8 : vector<1x1xf32> to vector<6x256xf32>
    %60 = arith.mulf %59, %57 : vector<6x256xf32>
    %61 = vector.broadcast %10 : vector<1x1xf32> to vector<6x256xf32>
    %62 = arith.mulf %61, %58 : vector<6x256xf32>
    %63 = arith.addf %60, %62 : vector<6x256xf32>
    %c8 = arith.constant 8 : index
    %c0_27 = arith.constant 0 : index
    %64 = vector.load %arg14[%c8, %c0_27] : memref<25x256xf32, #tpu.memory_space<vmem>>, vector<1x256xf32>
    %65 = vector.broadcast %64 : vector<1x256xf32> to vector<6x256xf32>
    %66 = arith.mulf %63, %65 : vector<6x256xf32>
    %c2 = arith.constant 2 : index
    %c0_28 = arith.constant 0 : index
    %c0_29 = arith.constant 0 : index
    %67 = vector.load %arg6[%c2, %c0_28, %c0_29] : memref<9x8x6xf32, #tpu.memory_space<vmem>>, vector<1x8x6xf32>
    %68 = vector.shape_cast %67 : vector<1x8x6xf32> to vector<8x6xf32>
    %cst_30 = arith.constant dense<0.000000e+00> : vector<8x256xf32>
    %69 = tpu.matmul %68, %66, %cst_30 {dimension_numbers = #tpu.dot_dimension_numbers<[1], [0], [0], [1], [0, 0, 1, 1], [], []>} : vector<8x6xf32>, vector<6x256xf32>, vector<8x256xf32> -> vector<8x256xf32>
    %70 = arith.addf %56, %69 : vector<8x256xf32>
    %c1_i32_31 = arith.constant 1 : i32
    %71 = tpu.dynamic_rotate %27 by %c1_i32_31 dim 1 : vector<6x256xf32>, i32 -> vector<6x256xf32>
    %c255_i32 = arith.constant 255 : i32
    %72 = tpu.dynamic_rotate %27 by %c255_i32 dim 1 : vector<6x256xf32>, i32 -> vector<6x256xf32>
    %73 = vector.broadcast %8 : vector<1x1xf32> to vector<6x256xf32>
    %74 = arith.mulf %73, %71 : vector<6x256xf32>
    %75 = vector.broadcast %10 : vector<1x1xf32> to vector<6x256xf32>
    %76 = arith.mulf %75, %72 : vector<6x256xf32>
    %77 = arith.addf %74, %76 : vector<6x256xf32>
    %c11 = arith.constant 11 : index
    %c0_32 = arith.constant 0 : index
    %78 = vector.load %arg14[%c11, %c0_32] : memref<25x256xf32, #tpu.memory_space<vmem>>, vector<1x256xf32>
    %79 = vector.broadcast %78 : vector<1x256xf32> to vector<6x256xf32>
    %80 = arith.mulf %77, %79 : vector<6x256xf32>
    %c3 = arith.constant 3 : index
    %c0_33 = arith.constant 0 : index
    %c0_34 = arith.constant 0 : index
    %81 = vector.load %arg6[%c3, %c0_33, %c0_34] : memref<9x8x6xf32, #tpu.memory_space<vmem>>, vector<1x8x6xf32>
    %82 = vector.shape_cast %81 : vector<1x8x6xf32> to vector<8x6xf32>
    %cst_35 = arith.constant dense<0.000000e+00> : vector<8x256xf32>
    %83 = tpu.matmul %82, %80, %cst_35 {dimension_numbers = #tpu.dot_dimension_numbers<[1], [0], [0], [1], [0, 0, 1, 1], [], []>} : vector<8x6xf32>, vector<6x256xf32>, vector<8x256xf32> -> vector<8x256xf32>
    %84 = arith.addf %70, %83 : vector<8x256xf32>
    %c12 = arith.constant 12 : index
    %c0_36 = arith.constant 0 : index
    %85 = vector.load %arg14[%c12, %c0_36] : memref<25x256xf32, #tpu.memory_space<vmem>>, vector<1x256xf32>
    %86 = vector.broadcast %85 : vector<1x256xf32> to vector<6x256xf32>
    %87 = arith.mulf %27, %86 : vector<6x256xf32>
    %c4 = arith.constant 4 : index
    %c0_37 = arith.constant 0 : index
    %c0_38 = arith.constant 0 : index
    %88 = vector.load %arg6[%c4, %c0_37, %c0_38] : memref<9x8x6xf32, #tpu.memory_space<vmem>>, vector<1x8x6xf32>
    %89 = vector.shape_cast %88 : vector<1x8x6xf32> to vector<8x6xf32>
    %cst_39 = arith.constant dense<0.000000e+00> : vector<8x256xf32>
    %90 = tpu.matmul %89, %87, %cst_39 {dimension_numbers = #tpu.dot_dimension_numbers<[1], [0], [0], [1], [0, 0, 1, 1], [], []>} : vector<8x6xf32>, vector<6x256xf32>, vector<8x256xf32> -> vector<8x256xf32>
    %91 = arith.addf %84, %90 : vector<8x256xf32>
    %c255_i32_40 = arith.constant 255 : i32
    %92 = tpu.dynamic_rotate %27 by %c255_i32_40 dim 1 : vector<6x256xf32>, i32 -> vector<6x256xf32>
    %c1_i32_41 = arith.constant 1 : i32
    %93 = tpu.dynamic_rotate %27 by %c1_i32_41 dim 1 : vector<6x256xf32>, i32 -> vector<6x256xf32>
    %94 = vector.broadcast %8 : vector<1x1xf32> to vector<6x256xf32>
    %95 = arith.mulf %94, %92 : vector<6x256xf32>
    %96 = vector.broadcast %10 : vector<1x1xf32> to vector<6x256xf32>
    %97 = arith.mulf %96, %93 : vector<6x256xf32>
    %98 = arith.addf %95, %97 : vector<6x256xf32>
    %c13 = arith.constant 13 : index
    %c0_42 = arith.constant 0 : index
    %99 = vector.load %arg14[%c13, %c0_42] : memref<25x256xf32, #tpu.memory_space<vmem>>, vector<1x256xf32>
    %100 = vector.broadcast %99 : vector<1x256xf32> to vector<6x256xf32>
    %101 = arith.mulf %98, %100 : vector<6x256xf32>
    %c5 = arith.constant 5 : index
    %c0_43 = arith.constant 0 : index
    %c0_44 = arith.constant 0 : index
    %102 = vector.load %arg6[%c5, %c0_43, %c0_44] : memref<9x8x6xf32, #tpu.memory_space<vmem>>, vector<1x8x6xf32>
    %103 = vector.shape_cast %102 : vector<1x8x6xf32> to vector<8x6xf32>
    %cst_45 = arith.constant dense<0.000000e+00> : vector<8x256xf32>
    %104 = tpu.matmul %103, %101, %cst_45 {dimension_numbers = #tpu.dot_dimension_numbers<[1], [0], [0], [1], [0, 0, 1, 1], [], []>} : vector<8x6xf32>, vector<6x256xf32>, vector<8x256xf32> -> vector<8x256xf32>
    %105 = arith.addf %91, %104 : vector<8x256xf32>
    %c241_i32_46 = arith.constant 241 : i32
    %106 = tpu.dynamic_rotate %27 by %c241_i32_46 dim 1 : vector<6x256xf32>, i32 -> vector<6x256xf32>
    %c15_i32_47 = arith.constant 15 : i32
    %107 = tpu.dynamic_rotate %27 by %c15_i32_47 dim 1 : vector<6x256xf32>, i32 -> vector<6x256xf32>
    %108 = vector.broadcast %8 : vector<1x1xf32> to vector<6x256xf32>
    %109 = arith.mulf %108, %106 : vector<6x256xf32>
    %110 = vector.broadcast %10 : vector<1x1xf32> to vector<6x256xf32>
    %111 = arith.mulf %110, %107 : vector<6x256xf32>
    %112 = arith.addf %109, %111 : vector<6x256xf32>
    %c16 = arith.constant 16 : index
    %c0_48 = arith.constant 0 : index
    %113 = vector.load %arg14[%c16, %c0_48] : memref<25x256xf32, #tpu.memory_space<vmem>>, vector<1x256xf32>
    %114 = vector.broadcast %113 : vector<1x256xf32> to vector<6x256xf32>
    %115 = arith.mulf %112, %114 : vector<6x256xf32>
    %c6_49 = arith.constant 6 : index
    %c0_50 = arith.constant 0 : index
    %c0_51 = arith.constant 0 : index
    %116 = vector.load %arg6[%c6_49, %c0_50, %c0_51] : memref<9x8x6xf32, #tpu.memory_space<vmem>>, vector<1x8x6xf32>
    %117 = vector.shape_cast %116 : vector<1x8x6xf32> to vector<8x6xf32>
    %cst_52 = arith.constant dense<0.000000e+00> : vector<8x256xf32>
    %118 = tpu.matmul %117, %115, %cst_52 {dimension_numbers = #tpu.dot_dimension_numbers<[1], [0], [0], [1], [0, 0, 1, 1], [], []>} : vector<8x6xf32>, vector<6x256xf32>, vector<8x256xf32> -> vector<8x256xf32>
    %119 = arith.addf %105, %118 : vector<8x256xf32>
    %c240_i32_53 = arith.constant 240 : i32
    %120 = tpu.dynamic_rotate %27 by %c240_i32_53 dim 1 : vector<6x256xf32>, i32 -> vector<6x256xf32>
    %c16_i32_54 = arith.constant 16 : i32
    %121 = tpu.dynamic_rotate %27 by %c16_i32_54 dim 1 : vector<6x256xf32>, i32 -> vector<6x256xf32>
    %122 = vector.broadcast %8 : vector<1x1xf32> to vector<6x256xf32>
    %123 = arith.mulf %122, %120 : vector<6x256xf32>
    %124 = vector.broadcast %10 : vector<1x1xf32> to vector<6x256xf32>
    %125 = arith.mulf %124, %121 : vector<6x256xf32>
    %126 = arith.addf %123, %125 : vector<6x256xf32>
    %c17 = arith.constant 17 : index
    %c0_55 = arith.constant 0 : index
    %127 = vector.load %arg14[%c17, %c0_55] : memref<25x256xf32, #tpu.memory_space<vmem>>, vector<1x256xf32>
    %128 = vector.broadcast %127 : vector<1x256xf32> to vector<6x256xf32>
    %129 = arith.mulf %126, %128 : vector<6x256xf32>
    %c7_56 = arith.constant 7 : index
    %c0_57 = arith.constant 0 : index
    %c0_58 = arith.constant 0 : index
    %130 = vector.load %arg6[%c7_56, %c0_57, %c0_58] : memref<9x8x6xf32, #tpu.memory_space<vmem>>, vector<1x8x6xf32>
    %131 = vector.shape_cast %130 : vector<1x8x6xf32> to vector<8x6xf32>
    %cst_59 = arith.constant dense<0.000000e+00> : vector<8x256xf32>
    %132 = tpu.matmul %131, %129, %cst_59 {dimension_numbers = #tpu.dot_dimension_numbers<[1], [0], [0], [1], [0, 0, 1, 1], [], []>} : vector<8x6xf32>, vector<6x256xf32>, vector<8x256xf32> -> vector<8x256xf32>
    %133 = arith.addf %119, %132 : vector<8x256xf32>
    %c239_i32_60 = arith.constant 239 : i32
    %134 = tpu.dynamic_rotate %27 by %c239_i32_60 dim 1 : vector<6x256xf32>, i32 -> vector<6x256xf32>
    %c17_i32_61 = arith.constant 17 : i32
    %135 = tpu.dynamic_rotate %27 by %c17_i32_61 dim 1 : vector<6x256xf32>, i32 -> vector<6x256xf32>
    %136 = vector.broadcast %8 : vector<1x1xf32> to vector<6x256xf32>
    %137 = arith.mulf %136, %134 : vector<6x256xf32>
    %138 = vector.broadcast %10 : vector<1x1xf32> to vector<6x256xf32>
    %139 = arith.mulf %138, %135 : vector<6x256xf32>
    %140 = arith.addf %137, %139 : vector<6x256xf32>
    %c18 = arith.constant 18 : index
    %c0_62 = arith.constant 0 : index
    %141 = vector.load %arg14[%c18, %c0_62] : memref<25x256xf32, #tpu.memory_space<vmem>>, vector<1x256xf32>
    %142 = vector.broadcast %141 : vector<1x256xf32> to vector<6x256xf32>
    %143 = arith.mulf %140, %142 : vector<6x256xf32>
    %c8_63 = arith.constant 8 : index
    %c0_64 = arith.constant 0 : index
    %c0_65 = arith.constant 0 : index
    %144 = vector.load %arg6[%c8_63, %c0_64, %c0_65] : memref<9x8x6xf32, #tpu.memory_space<vmem>>, vector<1x8x6xf32>
    %145 = vector.shape_cast %144 : vector<1x8x6xf32> to vector<8x6xf32>
    %cst_66 = arith.constant dense<0.000000e+00> : vector<8x256xf32>
    %146 = tpu.matmul %145, %143, %cst_66 {dimension_numbers = #tpu.dot_dimension_numbers<[1], [0], [0], [1], [0, 0, 1, 1], [], []>} : vector<8x6xf32>, vector<6x256xf32>, vector<8x256xf32> -> vector<8x256xf32>
    %147 = arith.addf %133, %146 : vector<8x256xf32>
    %c0_67 = arith.constant 0 : index
    %c0_68 = arith.constant 0 : index
    %148 = vector.load %arg7[%c0_67, %c0_68] : memref<8x1xf32, #tpu.memory_space<vmem>>, vector<8x1xf32>
    %149 = vector.broadcast %148 : vector<8x1xf32> to vector<8x256xf32>
    %150 = arith.addf %147, %149 : vector<8x256xf32>
    %cst_69 = arith.constant 0.000000e+00 : f32
    %151 = vector.broadcast %cst_69 : f32 to vector<8x256xf32>
    %152 = arith.maximumf %150, %151 : vector<8x256xf32>
    %c0_70 = arith.constant 0 : index
    %c8_71 = arith.constant 8 : index
    %c0_72 = arith.constant 0 : index
    %153 = vector.load %arg15[%c0_70, %c8_71, %c0_72] : memref<1x32x256xf32, #tpu.memory_space<vmem>>, vector<1x8x256xf32>
    %154 = vector.shape_cast %153 : vector<1x8x256xf32> to vector<8x256xf32>
    %155 = vector.shape_cast %152 : vector<8x256xf32> to vector<1x8x256xf32>
    tpu.vector_store %arg15[%c0_70, %c8_71, %c0_72], %155 {strides = array<i32>} : memref<1x32x256xf32, #tpu.memory_space<vmem>>, vector<1x8x256xf32>,
    %c0_73 = arith.constant 0 : index
    %c0_74 = arith.constant 0 : index
    %156 = vector.load %arg8[%c0_73, %c0_74] : memref<4x4xf32, #tpu.memory_space<vmem>>, vector<4x4xf32>
    %cst_75 = arith.constant dense<0.000000e+00> : vector<4x256xf32>
    %157 = tpu.matmul %156, %1, %cst_75 {dimension_numbers = #tpu.dot_dimension_numbers<[1], [0], [0], [1], [0, 0, 1, 1], [], []>} : vector<4x4xf32>, vector<4x256xf32>, vector<4x256xf32> -> vector<4x256xf32>
    %c0_76 = arith.constant 0 : index
    %c0_77 = arith.constant 0 : index
    %158 = vector.load %arg9[%c0_76, %c0_77] : memref<4x1xf32, #tpu.memory_space<vmem>>, vector<4x1xf32>
    %159 = vector.broadcast %158 : vector<4x1xf32> to vector<4x256xf32>
    %160 = arith.addf %157, %159 : vector<4x256xf32>
    %cst_78 = arith.constant 0.000000e+00 : f32
    %161 = vector.broadcast %cst_78 : f32 to vector<4x256xf32>
    %162 = arith.maximumf %160, %161 : vector<4x256xf32>
    %cst_79 = arith.constant 0.000000e+00 : f32
    %163 = vector.broadcast %cst_79 : f32 to vector<8x256xf32>
    %c34_i32 = arith.constant 34 : i32
    %164 = tpu.dynamic_rotate %162 by %c34_i32 dim 1 : vector<4x256xf32>, i32 -> vector<4x256xf32>
    %c222_i32 = arith.constant 222 : i32
    %165 = tpu.dynamic_rotate %162 by %c222_i32 dim 1 : vector<4x256xf32>, i32 -> vector<4x256xf32>
    %166 = vector.broadcast %8 : vector<1x1xf32> to vector<4x256xf32>
    %167 = arith.mulf %166, %164 : vector<4x256xf32>
    %168 = vector.broadcast %10 : vector<1x1xf32> to vector<4x256xf32>
    %169 = arith.mulf %168, %165 : vector<4x256xf32>
    %170 = arith.addf %167, %169 : vector<4x256xf32>
    %c0_80 = arith.constant 0 : index
    %c0_81 = arith.constant 0 : index
    %171 = vector.load %arg14[%c0_80, %c0_81] : memref<25x256xf32, #tpu.memory_space<vmem>>, vector<1x256xf32>
    %172 = vector.broadcast %171 : vector<1x256xf32> to vector<4x256xf32>
    %173 = arith.mulf %170, %172 : vector<4x256xf32>
    %c0_82 = arith.constant 0 : index
    %c0_83 = arith.constant 0 : index
    %c0_84 = arith.constant 0 : index
    %174 = vector.load %arg10[%c0_82, %c0_83, %c0_84] : memref<25x8x4xf32, #tpu.memory_space<vmem>>, vector<1x8x4xf32>
    %175 = vector.shape_cast %174 : vector<1x8x4xf32> to vector<8x4xf32>
    %cst_85 = arith.constant dense<0.000000e+00> : vector<8x256xf32>
    %176 = tpu.matmul %175, %173, %cst_85 {dimension_numbers = #tpu.dot_dimension_numbers<[1], [0], [0], [1], [0, 0, 1, 1], [], []>} : vector<8x4xf32>, vector<4x256xf32>, vector<8x256xf32> -> vector<8x256xf32>
    %177 = arith.addf %163, %176 : vector<8x256xf32>
    %c33_i32 = arith.constant 33 : i32
    %178 = tpu.dynamic_rotate %162 by %c33_i32 dim 1 : vector<4x256xf32>, i32 -> vector<4x256xf32>
    %c223_i32 = arith.constant 223 : i32
    %179 = tpu.dynamic_rotate %162 by %c223_i32 dim 1 : vector<4x256xf32>, i32 -> vector<4x256xf32>
    %180 = vector.broadcast %8 : vector<1x1xf32> to vector<4x256xf32>
    %181 = arith.mulf %180, %178 : vector<4x256xf32>
    %182 = vector.broadcast %10 : vector<1x1xf32> to vector<4x256xf32>
    %183 = arith.mulf %182, %179 : vector<4x256xf32>
    %184 = arith.addf %181, %183 : vector<4x256xf32>
    %c1_86 = arith.constant 1 : index
    %c0_87 = arith.constant 0 : index
    %185 = vector.load %arg14[%c1_86, %c0_87] : memref<25x256xf32, #tpu.memory_space<vmem>>, vector<1x256xf32>
    %186 = vector.broadcast %185 : vector<1x256xf32> to vector<4x256xf32>
    %187 = arith.mulf %184, %186 : vector<4x256xf32>
    %c1_88 = arith.constant 1 : index
    %c0_89 = arith.constant 0 : index
    %c0_90 = arith.constant 0 : index
    %188 = vector.load %arg10[%c1_88, %c0_89, %c0_90] : memref<25x8x4xf32, #tpu.memory_space<vmem>>, vector<1x8x4xf32>
    %189 = vector.shape_cast %188 : vector<1x8x4xf32> to vector<8x4xf32>
    %cst_91 = arith.constant dense<0.000000e+00> : vector<8x256xf32>
    %190 = tpu.matmul %189, %187, %cst_91 {dimension_numbers = #tpu.dot_dimension_numbers<[1], [0], [0], [1], [0, 0, 1, 1], [], []>} : vector<8x4xf32>, vector<4x256xf32>, vector<8x256xf32> -> vector<8x256xf32>
    %191 = arith.addf %177, %190 : vector<8x256xf32>
    %c32_i32 = arith.constant 32 : i32
    %192 = tpu.dynamic_rotate %162 by %c32_i32 dim 1 : vector<4x256xf32>, i32 -> vector<4x256xf32>
    %c224_i32 = arith.constant 224 : i32
    %193 = tpu.dynamic_rotate %162 by %c224_i32 dim 1 : vector<4x256xf32>, i32 -> vector<4x256xf32>
    %194 = vector.broadcast %8 : vector<1x1xf32> to vector<4x256xf32>
    %195 = arith.mulf %194, %192 : vector<4x256xf32>
    %196 = vector.broadcast %10 : vector<1x1xf32> to vector<4x256xf32>
    %197 = arith.mulf %196, %193 : vector<4x256xf32>
    %198 = arith.addf %195, %197 : vector<4x256xf32>
    %c2_92 = arith.constant 2 : index
    %c0_93 = arith.constant 0 : index
    %199 = vector.load %arg14[%c2_92, %c0_93] : memref<25x256xf32, #tpu.memory_space<vmem>>, vector<1x256xf32>
    %200 = vector.broadcast %199 : vector<1x256xf32> to vector<4x256xf32>
    %201 = arith.mulf %198, %200 : vector<4x256xf32>
    %c2_94 = arith.constant 2 : index
    %c0_95 = arith.constant 0 : index
    %c0_96 = arith.constant 0 : index
    %202 = vector.load %arg10[%c2_94, %c0_95, %c0_96] : memref<25x8x4xf32, #tpu.memory_space<vmem>>, vector<1x8x4xf32>
    %203 = vector.shape_cast %202 : vector<1x8x4xf32> to vector<8x4xf32>
    %cst_97 = arith.constant dense<0.000000e+00> : vector<8x256xf32>
    %204 = tpu.matmul %203, %201, %cst_97 {dimension_numbers = #tpu.dot_dimension_numbers<[1], [0], [0], [1], [0, 0, 1, 1], [], []>} : vector<8x4xf32>, vector<4x256xf32>, vector<8x256xf32> -> vector<8x256xf32>
    %205 = arith.addf %191, %204 : vector<8x256xf32>
    %c31_i32 = arith.constant 31 : i32
    %206 = tpu.dynamic_rotate %162 by %c31_i32 dim 1 : vector<4x256xf32>, i32 -> vector<4x256xf32>
    %c225_i32 = arith.constant 225 : i32
    %207 = tpu.dynamic_rotate %162 by %c225_i32 dim 1 : vector<4x256xf32>, i32 -> vector<4x256xf32>
    %208 = vector.broadcast %8 : vector<1x1xf32> to vector<4x256xf32>
    %209 = arith.mulf %208, %206 : vector<4x256xf32>
    %210 = vector.broadcast %10 : vector<1x1xf32> to vector<4x256xf32>
    %211 = arith.mulf %210, %207 : vector<4x256xf32>
    %212 = arith.addf %209, %211 : vector<4x256xf32>
    %c3_98 = arith.constant 3 : index
    %c0_99 = arith.constant 0 : index
    %213 = vector.load %arg14[%c3_98, %c0_99] : memref<25x256xf32, #tpu.memory_space<vmem>>, vector<1x256xf32>
    %214 = vector.broadcast %213 : vector<1x256xf32> to vector<4x256xf32>
    %215 = arith.mulf %212, %214 : vector<4x256xf32>
    %c3_100 = arith.constant 3 : index
    %c0_101 = arith.constant 0 : index
    %c0_102 = arith.constant 0 : index
    %216 = vector.load %arg10[%c3_100, %c0_101, %c0_102] : memref<25x8x4xf32, #tpu.memory_space<vmem>>, vector<1x8x4xf32>
    %217 = vector.shape_cast %216 : vector<1x8x4xf32> to vector<8x4xf32>
    %cst_103 = arith.constant dense<0.000000e+00> : vector<8x256xf32>
    %218 = tpu.matmul %217, %215, %cst_103 {dimension_numbers = #tpu.dot_dimension_numbers<[1], [0], [0], [1], [0, 0, 1, 1], [], []>} : vector<8x4xf32>, vector<4x256xf32>, vector<8x256xf32> -> vector<8x256xf32>
    %219 = arith.addf %205, %218 : vector<8x256xf32>
    %c30_i32 = arith.constant 30 : i32
    %220 = tpu.dynamic_rotate %162 by %c30_i32 dim 1 : vector<4x256xf32>, i32 -> vector<4x256xf32>
    %c226_i32 = arith.constant 226 : i32
    %221 = tpu.dynamic_rotate %162 by %c226_i32 dim 1 : vector<4x256xf32>, i32 -> vector<4x256xf32>
    %222 = vector.broadcast %8 : vector<1x1xf32> to vector<4x256xf32>
    %223 = arith.mulf %222, %220 : vector<4x256xf32>
    %224 = vector.broadcast %10 : vector<1x1xf32> to vector<4x256xf32>
    %225 = arith.mulf %224, %221 : vector<4x256xf32>
    %226 = arith.addf %223, %225 : vector<4x256xf32>
    %c4_104 = arith.constant 4 : index
    %c0_105 = arith.constant 0 : index
    %227 = vector.load %arg14[%c4_104, %c0_105] : memref<25x256xf32, #tpu.memory_space<vmem>>, vector<1x256xf32>
    %228 = vector.broadcast %227 : vector<1x256xf32> to vector<4x256xf32>
    %229 = arith.mulf %226, %228 : vector<4x256xf32>
    %c4_106 = arith.constant 4 : index
    %c0_107 = arith.constant 0 : index
    %c0_108 = arith.constant 0 : index
    %230 = vector.load %arg10[%c4_106, %c0_107, %c0_108] : memref<25x8x4xf32, #tpu.memory_space<vmem>>, vector<1x8x4xf32>
    %231 = vector.shape_cast %230 : vector<1x8x4xf32> to vector<8x4xf32>
    %cst_109 = arith.constant dense<0.000000e+00> : vector<8x256xf32>
    %232 = tpu.matmul %231, %229, %cst_109 {dimension_numbers = #tpu.dot_dimension_numbers<[1], [0], [0], [1], [0, 0, 1, 1], [], []>} : vector<8x4xf32>, vector<4x256xf32>, vector<8x256xf32> -> vector<8x256xf32>
    %233 = arith.addf %219, %232 : vector<8x256xf32>
    %c18_i32 = arith.constant 18 : i32
    %234 = tpu.dynamic_rotate %162 by %c18_i32 dim 1 : vector<4x256xf32>, i32 -> vector<4x256xf32>
    %c238_i32 = arith.constant 238 : i32
    %235 = tpu.dynamic_rotate %162 by %c238_i32 dim 1 : vector<4x256xf32>, i32 -> vector<4x256xf32>
    %236 = vector.broadcast %8 : vector<1x1xf32> to vector<4x256xf32>
    %237 = arith.mulf %236, %234 : vector<4x256xf32>
    %238 = vector.broadcast %10 : vector<1x1xf32> to vector<4x256xf32>
    %239 = arith.mulf %238, %235 : vector<4x256xf32>
    %240 = arith.addf %237, %239 : vector<4x256xf32>
    %c5_110 = arith.constant 5 : index
    %c0_111 = arith.constant 0 : index
    %241 = vector.load %arg14[%c5_110, %c0_111] : memref<25x256xf32, #tpu.memory_space<vmem>>, vector<1x256xf32>
    %242 = vector.broadcast %241 : vector<1x256xf32> to vector<4x256xf32>
    %243 = arith.mulf %240, %242 : vector<4x256xf32>
    %c5_112 = arith.constant 5 : index
    %c0_113 = arith.constant 0 : index
    %c0_114 = arith.constant 0 : index
    %244 = vector.load %arg10[%c5_112, %c0_113, %c0_114] : memref<25x8x4xf32, #tpu.memory_space<vmem>>, vector<1x8x4xf32>
    %245 = vector.shape_cast %244 : vector<1x8x4xf32> to vector<8x4xf32>
    %cst_115 = arith.constant dense<0.000000e+00> : vector<8x256xf32>
    %246 = tpu.matmul %245, %243, %cst_115 {dimension_numbers = #tpu.dot_dimension_numbers<[1], [0], [0], [1], [0, 0, 1, 1], [], []>} : vector<8x4xf32>, vector<4x256xf32>, vector<8x256xf32> -> vector<8x256xf32>
    %247 = arith.addf %233, %246 : vector<8x256xf32>
    %c17_i32_116 = arith.constant 17 : i32
    %248 = tpu.dynamic_rotate %162 by %c17_i32_116 dim 1 : vector<4x256xf32>, i32 -> vector<4x256xf32>
    %c239_i32_117 = arith.constant 239 : i32
    %249 = tpu.dynamic_rotate %162 by %c239_i32_117 dim 1 : vector<4x256xf32>, i32 -> vector<4x256xf32>
    %250 = vector.broadcast %8 : vector<1x1xf32> to vector<4x256xf32>
    %251 = arith.mulf %250, %248 : vector<4x256xf32>
    %252 = vector.broadcast %10 : vector<1x1xf32> to vector<4x256xf32>
    %253 = arith.mulf %252, %249 : vector<4x256xf32>
    %254 = arith.addf %251, %253 : vector<4x256xf32>
    %c6_118 = arith.constant 6 : index
    %c0_119 = arith.constant 0 : index
    %255 = vector.load %arg14[%c6_118, %c0_119] : memref<25x256xf32, #tpu.memory_space<vmem>>, vector<1x256xf32>
    %256 = vector.broadcast %255 : vector<1x256xf32> to vector<4x256xf32>
    %257 = arith.mulf %254, %256 : vector<4x256xf32>
    %c6_120 = arith.constant 6 : index
    %c0_121 = arith.constant 0 : index
    %c0_122 = arith.constant 0 : index
    %258 = vector.load %arg10[%c6_120, %c0_121, %c0_122] : memref<25x8x4xf32, #tpu.memory_space<vmem>>, vector<1x8x4xf32>
    %259 = vector.shape_cast %258 : vector<1x8x4xf32> to vector<8x4xf32>
    %cst_123 = arith.constant dense<0.000000e+00> : vector<8x256xf32>
    %260 = tpu.matmul %259, %257, %cst_123 {dimension_numbers = #tpu.dot_dimension_numbers<[1], [0], [0], [1], [0, 0, 1, 1], [], []>} : vector<8x4xf32>, vector<4x256xf32>, vector<8x256xf32> -> vector<8x256xf32>
    %261 = arith.addf %247, %260 : vector<8x256xf32>
    %c16_i32_124 = arith.constant 16 : i32
    %262 = tpu.dynamic_rotate %162 by %c16_i32_124 dim 1 : vector<4x256xf32>, i32 -> vector<4x256xf32>
    %c240_i32_125 = arith.constant 240 : i32
    %263 = tpu.dynamic_rotate %162 by %c240_i32_125 dim 1 : vector<4x256xf32>, i32 -> vector<4x256xf32>
    %264 = vector.broadcast %8 : vector<1x1xf32> to vector<4x256xf32>
    %265 = arith.mulf %264, %262 : vector<4x256xf32>
    %266 = vector.broadcast %10 : vector<1x1xf32> to vector<4x256xf32>
    %267 = arith.mulf %266, %263 : vector<4x256xf32>
    %268 = arith.addf %265, %267 : vector<4x256xf32>
    %c7_126 = arith.constant 7 : index
    %c0_127 = arith.constant 0 : index
    %269 = vector.load %arg14[%c7_126, %c0_127] : memref<25x256xf32, #tpu.memory_space<vmem>>, vector<1x256xf32>
    %270 = vector.broadcast %269 : vector<1x256xf32> to vector<4x256xf32>
    %271 = arith.mulf %268, %270 : vector<4x256xf32>
    %c7_128 = arith.constant 7 : index
    %c0_129 = arith.constant 0 : index
    %c0_130 = arith.constant 0 : index
    %272 = vector.load %arg10[%c7_128, %c0_129, %c0_130] : memref<25x8x4xf32, #tpu.memory_space<vmem>>, vector<1x8x4xf32>
    %273 = vector.shape_cast %272 : vector<1x8x4xf32> to vector<8x4xf32>
    %cst_131 = arith.constant dense<0.000000e+00> : vector<8x256xf32>
    %274 = tpu.matmul %273, %271, %cst_131 {dimension_numbers = #tpu.dot_dimension_numbers<[1], [0], [0], [1], [0, 0, 1, 1], [], []>} : vector<8x4xf32>, vector<4x256xf32>, vector<8x256xf32> -> vector<8x256xf32>
    %275 = arith.addf %261, %274 : vector<8x256xf32>
    %c15_i32_132 = arith.constant 15 : i32
    %276 = tpu.dynamic_rotate %162 by %c15_i32_132 dim 1 : vector<4x256xf32>, i32 -> vector<4x256xf32>
    %c241_i32_133 = arith.constant 241 : i32
    %277 = tpu.dynamic_rotate %162 by %c241_i32_133 dim 1 : vector<4x256xf32>, i32 -> vector<4x256xf32>
    %278 = vector.broadcast %8 : vector<1x1xf32> to vector<4x256xf32>
    %279 = arith.mulf %278, %276 : vector<4x256xf32>
    %280 = vector.broadcast %10 : vector<1x1xf32> to vector<4x256xf32>
    %281 = arith.mulf %280, %277 : vector<4x256xf32>
    %282 = arith.addf %279, %281 : vector<4x256xf32>
    %c8_134 = arith.constant 8 : index
    %c0_135 = arith.constant 0 : index
    %283 = vector.load %arg14[%c8_134, %c0_135] : memref<25x256xf32, #tpu.memory_space<vmem>>, vector<1x256xf32>
    %284 = vector.broadcast %283 : vector<1x256xf32> to vector<4x256xf32>
    %285 = arith.mulf %282, %284 : vector<4x256xf32>
    %c8_136 = arith.constant 8 : index
    %c0_137 = arith.constant 0 : index
    %c0_138 = arith.constant 0 : index
    %286 = vector.load %arg10[%c8_136, %c0_137, %c0_138] : memref<25x8x4xf32, #tpu.memory_space<vmem>>, vector<1x8x4xf32>
    %287 = vector.shape_cast %286 : vector<1x8x4xf32> to vector<8x4xf32>
    %cst_139 = arith.constant dense<0.000000e+00> : vector<8x256xf32>
    %288 = tpu.matmul %287, %285, %cst_139 {dimension_numbers = #tpu.dot_dimension_numbers<[1], [0], [0], [1], [0, 0, 1, 1], [], []>} : vector<8x4xf32>, vector<4x256xf32>, vector<8x256xf32> -> vector<8x256xf32>
    %289 = arith.addf %275, %288 : vector<8x256xf32>
    %c14_i32 = arith.constant 14 : i32
    %290 = tpu.dynamic_rotate %162 by %c14_i32 dim 1 : vector<4x256xf32>, i32 -> vector<4x256xf32>
    %c242_i32 = arith.constant 242 : i32
    %291 = tpu.dynamic_rotate %162 by %c242_i32 dim 1 : vector<4x256xf32>, i32 -> vector<4x256xf32>
    %292 = vector.broadcast %8 : vector<1x1xf32> to vector<4x256xf32>
    %293 = arith.mulf %292, %290 : vector<4x256xf32>
    %294 = vector.broadcast %10 : vector<1x1xf32> to vector<4x256xf32>
    %295 = arith.mulf %294, %291 : vector<4x256xf32>
    %296 = arith.addf %293, %295 : vector<4x256xf32>
    %c9 = arith.constant 9 : index
    %c0_140 = arith.constant 0 : index
    %297 = vector.load %arg14[%c9, %c0_140] : memref<25x256xf32, #tpu.memory_space<vmem>>, vector<1x256xf32>
    %298 = vector.broadcast %297 : vector<1x256xf32> to vector<4x256xf32>
    %299 = arith.mulf %296, %298 : vector<4x256xf32>
    %c9_141 = arith.constant 9 : index
    %c0_142 = arith.constant 0 : index
    %c0_143 = arith.constant 0 : index
    %300 = vector.load %arg10[%c9_141, %c0_142, %c0_143] : memref<25x8x4xf32, #tpu.memory_space<vmem>>, vector<1x8x4xf32>
    %301 = vector.shape_cast %300 : vector<1x8x4xf32> to vector<8x4xf32>
    %cst_144 = arith.constant dense<0.000000e+00> : vector<8x256xf32>
    %302 = tpu.matmul %301, %299, %cst_144 {dimension_numbers = #tpu.dot_dimension_numbers<[1], [0], [0], [1], [0, 0, 1, 1], [], []>} : vector<8x4xf32>, vector<4x256xf32>, vector<8x256xf32> -> vector<8x256xf32>
    %303 = arith.addf %289, %302 : vector<8x256xf32>
    %c2_i32 = arith.constant 2 : i32
    %304 = tpu.dynamic_rotate %162 by %c2_i32 dim 1 : vector<4x256xf32>, i32 -> vector<4x256xf32>
    %c254_i32 = arith.constant 254 : i32
    %305 = tpu.dynamic_rotate %162 by %c254_i32 dim 1 : vector<4x256xf32>, i32 -> vector<4x256xf32>
    %306 = vector.broadcast %8 : vector<1x1xf32> to vector<4x256xf32>
    %307 = arith.mulf %306, %304 : vector<4x256xf32>
    %308 = vector.broadcast %10 : vector<1x1xf32> to vector<4x256xf32>
    %309 = arith.mulf %308, %305 : vector<4x256xf32>
    %310 = arith.addf %307, %309 : vector<4x256xf32>
    %c10 = arith.constant 10 : index
    %c0_145 = arith.constant 0 : index
    %311 = vector.load %arg14[%c10, %c0_145] : memref<25x256xf32, #tpu.memory_space<vmem>>, vector<1x256xf32>
    %312 = vector.broadcast %311 : vector<1x256xf32> to vector<4x256xf32>
    %313 = arith.mulf %310, %312 : vector<4x256xf32>
    %c10_146 = arith.constant 10 : index
    %c0_147 = arith.constant 0 : index
    %c0_148 = arith.constant 0 : index
    %314 = vector.load %arg10[%c10_146, %c0_147, %c0_148] : memref<25x8x4xf32, #tpu.memory_space<vmem>>, vector<1x8x4xf32>
    %315 = vector.shape_cast %314 : vector<1x8x4xf32> to vector<8x4xf32>
    %cst_149 = arith.constant dense<0.000000e+00> : vector<8x256xf32>
    %316 = tpu.matmul %315, %313, %cst_149 {dimension_numbers = #tpu.dot_dimension_numbers<[1], [0], [0], [1], [0, 0, 1, 1], [], []>} : vector<8x4xf32>, vector<4x256xf32>, vector<8x256xf32> -> vector<8x256xf32>
    %317 = arith.addf %303, %316 : vector<8x256xf32>
    %c1_i32_150 = arith.constant 1 : i32
    %318 = tpu.dynamic_rotate %162 by %c1_i32_150 dim 1 : vector<4x256xf32>, i32 -> vector<4x256xf32>
    %c255_i32_151 = arith.constant 255 : i32
    %319 = tpu.dynamic_rotate %162 by %c255_i32_151 dim 1 : vector<4x256xf32>, i32 -> vector<4x256xf32>
    %320 = vector.broadcast %8 : vector<1x1xf32> to vector<4x256xf32>
    %321 = arith.mulf %320, %318 : vector<4x256xf32>
    %322 = vector.broadcast %10 : vector<1x1xf32> to vector<4x256xf32>
    %323 = arith.mulf %322, %319 : vector<4x256xf32>
    %324 = arith.addf %321, %323 : vector<4x256xf32>
    %c11_152 = arith.constant 11 : index
    %c0_153 = arith.constant 0 : index
    %325 = vector.load %arg14[%c11_152, %c0_153] : memref<25x256xf32, #tpu.memory_space<vmem>>, vector<1x256xf32>
    %326 = vector.broadcast %325 : vector<1x256xf32> to vector<4x256xf32>
    %327 = arith.mulf %324, %326 : vector<4x256xf32>
    %c11_154 = arith.constant 11 : index
    %c0_155 = arith.constant 0 : index
    %c0_156 = arith.constant 0 : index
    %328 = vector.load %arg10[%c11_154, %c0_155, %c0_156] : memref<25x8x4xf32, #tpu.memory_space<vmem>>, vector<1x8x4xf32>
    %329 = vector.shape_cast %328 : vector<1x8x4xf32> to vector<8x4xf32>
    %cst_157 = arith.constant dense<0.000000e+00> : vector<8x256xf32>
    %330 = tpu.matmul %329, %327, %cst_157 {dimension_numbers = #tpu.dot_dimension_numbers<[1], [0], [0], [1], [0, 0, 1, 1], [], []>} : vector<8x4xf32>, vector<4x256xf32>, vector<8x256xf32> -> vector<8x256xf32>
    %331 = arith.addf %317, %330 : vector<8x256xf32>
    %c12_158 = arith.constant 12 : index
    %c0_159 = arith.constant 0 : index
    %332 = vector.load %arg14[%c12_158, %c0_159] : memref<25x256xf32, #tpu.memory_space<vmem>>, vector<1x256xf32>
    %333 = vector.broadcast %332 : vector<1x256xf32> to vector<4x256xf32>
    %334 = arith.mulf %162, %333 : vector<4x256xf32>
    %c12_160 = arith.constant 12 : index
    %c0_161 = arith.constant 0 : index
    %c0_162 = arith.constant 0 : index
    %335 = vector.load %arg10[%c12_160, %c0_161, %c0_162] : memref<25x8x4xf32, #tpu.memory_space<vmem>>, vector<1x8x4xf32>
    %336 = vector.shape_cast %335 : vector<1x8x4xf32> to vector<8x4xf32>
    %cst_163 = arith.constant dense<0.000000e+00> : vector<8x256xf32>
    %337 = tpu.matmul %336, %334, %cst_163 {dimension_numbers = #tpu.dot_dimension_numbers<[1], [0], [0], [1], [0, 0, 1, 1], [], []>} : vector<8x4xf32>, vector<4x256xf32>, vector<8x256xf32> -> vector<8x256xf32>
    %338 = arith.addf %331, %337 : vector<8x256xf32>
    %c255_i32_164 = arith.constant 255 : i32
    %339 = tpu.dynamic_rotate %162 by %c255_i32_164 dim 1 : vector<4x256xf32>, i32 -> vector<4x256xf32>
    %c1_i32_165 = arith.constant 1 : i32
    %340 = tpu.dynamic_rotate %162 by %c1_i32_165 dim 1 : vector<4x256xf32>, i32 -> vector<4x256xf32>
    %341 = vector.broadcast %8 : vector<1x1xf32> to vector<4x256xf32>
    %342 = arith.mulf %341, %339 : vector<4x256xf32>
    %343 = vector.broadcast %10 : vector<1x1xf32> to vector<4x256xf32>
    %344 = arith.mulf %343, %340 : vector<4x256xf32>
    %345 = arith.addf %342, %344 : vector<4x256xf32>
    %c13_166 = arith.constant 13 : index
    %c0_167 = arith.constant 0 : index
    %346 = vector.load %arg14[%c13_166, %c0_167] : memref<25x256xf32, #tpu.memory_space<vmem>>, vector<1x256xf32>
    %347 = vector.broadcast %346 : vector<1x256xf32> to vector<4x256xf32>
    %348 = arith.mulf %345, %347 : vector<4x256xf32>
    %c13_168 = arith.constant 13 : index
    %c0_169 = arith.constant 0 : index
    %c0_170 = arith.constant 0 : index
    %349 = vector.load %arg10[%c13_168, %c0_169, %c0_170] : memref<25x8x4xf32, #tpu.memory_space<vmem>>, vector<1x8x4xf32>
    %350 = vector.shape_cast %349 : vector<1x8x4xf32> to vector<8x4xf32>
    %cst_171 = arith.constant dense<0.000000e+00> : vector<8x256xf32>
    %351 = tpu.matmul %350, %348, %cst_171 {dimension_numbers = #tpu.dot_dimension_numbers<[1], [0], [0], [1], [0, 0, 1, 1], [], []>} : vector<8x4xf32>, vector<4x256xf32>, vector<8x256xf32> -> vector<8x256xf32>
    %352 = arith.addf %338, %351 : vector<8x256xf32>
    %c254_i32_172 = arith.constant 254 : i32
    %353 = tpu.dynamic_rotate %162 by %c254_i32_172 dim 1 : vector<4x256xf32>, i32 -> vector<4x256xf32>
    %c2_i32_173 = arith.constant 2 : i32
    %354 = tpu.dynamic_rotate %162 by %c2_i32_173 dim 1 : vector<4x256xf32>, i32 -> vector<4x256xf32>
    %355 = vector.broadcast %8 : vector<1x1xf32> to vector<4x256xf32>
    %356 = arith.mulf %355, %353 : vector<4x256xf32>
    %357 = vector.broadcast %10 : vector<1x1xf32> to vector<4x256xf32>
    %358 = arith.mulf %357, %354 : vector<4x256xf32>
    %359 = arith.addf %356, %358 : vector<4x256xf32>
    %c14 = arith.constant 14 : index
    %c0_174 = arith.constant 0 : index
    %360 = vector.load %arg14[%c14, %c0_174] : memref<25x256xf32, #tpu.memory_space<vmem>>, vector<1x256xf32>
    %361 = vector.broadcast %360 : vector<1x256xf32> to vector<4x256xf32>
    %362 = arith.mulf %359, %361 : vector<4x256xf32>
    %c14_175 = arith.constant 14 : index
    %c0_176 = arith.constant 0 : index
    %c0_177 = arith.constant 0 : index
    %363 = vector.load %arg10[%c14_175, %c0_176, %c0_177] : memref<25x8x4xf32, #tpu.memory_space<vmem>>, vector<1x8x4xf32>
    %364 = vector.shape_cast %363 : vector<1x8x4xf32> to vector<8x4xf32>
    %cst_178 = arith.constant dense<0.000000e+00> : vector<8x256xf32>
    %365 = tpu.matmul %364, %362, %cst_178 {dimension_numbers = #tpu.dot_dimension_numbers<[1], [0], [0], [1], [0, 0, 1, 1], [], []>} : vector<8x4xf32>, vector<4x256xf32>, vector<8x256xf32> -> vector<8x256xf32>
    %366 = arith.addf %352, %365 : vector<8x256xf32>
    %c242_i32_179 = arith.constant 242 : i32
    %367 = tpu.dynamic_rotate %162 by %c242_i32_179 dim 1 : vector<4x256xf32>, i32 -> vector<4x256xf32>
    %c14_i32_180 = arith.constant 14 : i32
    %368 = tpu.dynamic_rotate %162 by %c14_i32_180 dim 1 : vector<4x256xf32>, i32 -> vector<4x256xf32>
    %369 = vector.broadcast %8 : vector<1x1xf32> to vector<4x256xf32>
    %370 = arith.mulf %369, %367 : vector<4x256xf32>
    %371 = vector.broadcast %10 : vector<1x1xf32> to vector<4x256xf32>
    %372 = arith.mulf %371, %368 : vector<4x256xf32>
    %373 = arith.addf %370, %372 : vector<4x256xf32>
    %c15 = arith.constant 15 : index
    %c0_181 = arith.constant 0 : index
    %374 = vector.load %arg14[%c15, %c0_181] : memref<25x256xf32, #tpu.memory_space<vmem>>, vector<1x256xf32>
    %375 = vector.broadcast %374 : vector<1x256xf32> to vector<4x256xf32>
    %376 = arith.mulf %373, %375 : vector<4x256xf32>
    %c15_182 = arith.constant 15 : index
    %c0_183 = arith.constant 0 : index
    %c0_184 = arith.constant 0 : index
    %377 = vector.load %arg10[%c15_182, %c0_183, %c0_184] : memref<25x8x4xf32, #tpu.memory_space<vmem>>, vector<1x8x4xf32>
    %378 = vector.shape_cast %377 : vector<1x8x4xf32> to vector<8x4xf32>
    %cst_185 = arith.constant dense<0.000000e+00> : vector<8x256xf32>
    %379 = tpu.matmul %378, %376, %cst_185 {dimension_numbers = #tpu.dot_dimension_numbers<[1], [0], [0], [1], [0, 0, 1, 1], [], []>} : vector<8x4xf32>, vector<4x256xf32>, vector<8x256xf32> -> vector<8x256xf32>
    %380 = arith.addf %366, %379 : vector<8x256xf32>
    %c241_i32_186 = arith.constant 241 : i32
    %381 = tpu.dynamic_rotate %162 by %c241_i32_186 dim 1 : vector<4x256xf32>, i32 -> vector<4x256xf32>
    %c15_i32_187 = arith.constant 15 : i32
    %382 = tpu.dynamic_rotate %162 by %c15_i32_187 dim 1 : vector<4x256xf32>, i32 -> vector<4x256xf32>
    %383 = vector.broadcast %8 : vector<1x1xf32> to vector<4x256xf32>
    %384 = arith.mulf %383, %381 : vector<4x256xf32>
    %385 = vector.broadcast %10 : vector<1x1xf32> to vector<4x256xf32>
    %386 = arith.mulf %385, %382 : vector<4x256xf32>
    %387 = arith.addf %384, %386 : vector<4x256xf32>
    %c16_188 = arith.constant 16 : index
    %c0_189 = arith.constant 0 : index
    %388 = vector.load %arg14[%c16_188, %c0_189] : memref<25x256xf32, #tpu.memory_space<vmem>>, vector<1x256xf32>
    %389 = vector.broadcast %388 : vector<1x256xf32> to vector<4x256xf32>
    %390 = arith.mulf %387, %389 : vector<4x256xf32>
    %c16_190 = arith.constant 16 : index
    %c0_191 = arith.constant 0 : index
    %c0_192 = arith.constant 0 : index
    %391 = vector.load %arg10[%c16_190, %c0_191, %c0_192] : memref<25x8x4xf32, #tpu.memory_space<vmem>>, vector<1x8x4xf32>
    %392 = vector.shape_cast %391 : vector<1x8x4xf32> to vector<8x4xf32>
    %cst_193 = arith.constant dense<0.000000e+00> : vector<8x256xf32>
    %393 = tpu.matmul %392, %390, %cst_193 {dimension_numbers = #tpu.dot_dimension_numbers<[1], [0], [0], [1], [0, 0, 1, 1], [], []>} : vector<8x4xf32>, vector<4x256xf32>, vector<8x256xf32> -> vector<8x256xf32>
    %394 = arith.addf %380, %393 : vector<8x256xf32>
    %c240_i32_194 = arith.constant 240 : i32
    %395 = tpu.dynamic_rotate %162 by %c240_i32_194 dim 1 : vector<4x256xf32>, i32 -> vector<4x256xf32>
    %c16_i32_195 = arith.constant 16 : i32
    %396 = tpu.dynamic_rotate %162 by %c16_i32_195 dim 1 : vector<4x256xf32>, i32 -> vector<4x256xf32>
    %397 = vector.broadcast %8 : vector<1x1xf32> to vector<4x256xf32>
    %398 = arith.mulf %397, %395 : vector<4x256xf32>
    %399 = vector.broadcast %10 : vector<1x1xf32> to vector<4x256xf32>
    %400 = arith.mulf %399, %396 : vector<4x256xf32>
    %401 = arith.addf %398, %400 : vector<4x256xf32>
    %c17_196 = arith.constant 17 : index
    %c0_197 = arith.constant 0 : index
    %402 = vector.load %arg14[%c17_196, %c0_197] : memref<25x256xf32, #tpu.memory_space<vmem>>, vector<1x256xf32>
    %403 = vector.broadcast %402 : vector<1x256xf32> to vector<4x256xf32>
    %404 = arith.mulf %401, %403 : vector<4x256xf32>
    %c17_198 = arith.constant 17 : index
    %c0_199 = arith.constant 0 : index
    %c0_200 = arith.constant 0 : index
    %405 = vector.load %arg10[%c17_198, %c0_199, %c0_200] : memref<25x8x4xf32, #tpu.memory_space<vmem>>, vector<1x8x4xf32>
    %406 = vector.shape_cast %405 : vector<1x8x4xf32> to vector<8x4xf32>
    %cst_201 = arith.constant dense<0.000000e+00> : vector<8x256xf32>
    %407 = tpu.matmul %406, %404, %cst_201 {dimension_numbers = #tpu.dot_dimension_numbers<[1], [0], [0], [1], [0, 0, 1, 1], [], []>} : vector<8x4xf32>, vector<4x256xf32>, vector<8x256xf32> -> vector<8x256xf32>
    %408 = arith.addf %394, %407 : vector<8x256xf32>
    %c239_i32_202 = arith.constant 239 : i32
    %409 = tpu.dynamic_rotate %162 by %c239_i32_202 dim 1 : vector<4x256xf32>, i32 -> vector<4x256xf32>
    %c17_i32_203 = arith.constant 17 : i32
    %410 = tpu.dynamic_rotate %162 by %c17_i32_203 dim 1 : vector<4x256xf32>, i32 -> vector<4x256xf32>
    %411 = vector.broadcast %8 : vector<1x1xf32> to vector<4x256xf32>
    %412 = arith.mulf %411, %409 : vector<4x256xf32>
    %413 = vector.broadcast %10 : vector<1x1xf32> to vector<4x256xf32>
    %414 = arith.mulf %413, %410 : vector<4x256xf32>
    %415 = arith.addf %412, %414 : vector<4x256xf32>
    %c18_204 = arith.constant 18 : index
    %c0_205 = arith.constant 0 : index
    %416 = vector.load %arg14[%c18_204, %c0_205] : memref<25x256xf32, #tpu.memory_space<vmem>>, vector<1x256xf32>
    %417 = vector.broadcast %416 : vector<1x256xf32> to vector<4x256xf32>
    %418 = arith.mulf %415, %417 : vector<4x256xf32>
    %c18_206 = arith.constant 18 : index
    %c0_207 = arith.constant 0 : index
    %c0_208 = arith.constant 0 : index
    %419 = vector.load %arg10[%c18_206, %c0_207, %c0_208] : memref<25x8x4xf32, #tpu.memory_space<vmem>>, vector<1x8x4xf32>
    %420 = vector.shape_cast %419 : vector<1x8x4xf32> to vector<8x4xf32>
    %cst_209 = arith.constant dense<0.000000e+00> : vector<8x256xf32>
    %421 = tpu.matmul %420, %418, %cst_209 {dimension_numbers = #tpu.dot_dimension_numbers<[1], [0], [0], [1], [0, 0, 1, 1], [], []>} : vector<8x4xf32>, vector<4x256xf32>, vector<8x256xf32> -> vector<8x256xf32>
    %422 = arith.addf %408, %421 : vector<8x256xf32>
    %c238_i32_210 = arith.constant 238 : i32
    %423 = tpu.dynamic_rotate %162 by %c238_i32_210 dim 1 : vector<4x256xf32>, i32 -> vector<4x256xf32>
    %c18_i32_211 = arith.constant 18 : i32
    %424 = tpu.dynamic_rotate %162 by %c18_i32_211 dim 1 : vector<4x256xf32>, i32 -> vector<4x256xf32>
    %425 = vector.broadcast %8 : vector<1x1xf32> to vector<4x256xf32>
    %426 = arith.mulf %425, %423 : vector<4x256xf32>
    %427 = vector.broadcast %10 : vector<1x1xf32> to vector<4x256xf32>
    %428 = arith.mulf %427, %424 : vector<4x256xf32>
    %429 = arith.addf %426, %428 : vector<4x256xf32>
    %c19 = arith.constant 19 : index
    %c0_212 = arith.constant 0 : index
    %430 = vector.load %arg14[%c19, %c0_212] : memref<25x256xf32, #tpu.memory_space<vmem>>, vector<1x256xf32>
    %431 = vector.broadcast %430 : vector<1x256xf32> to vector<4x256xf32>
    %432 = arith.mulf %429, %431 : vector<4x256xf32>
    %c19_213 = arith.constant 19 : index
    %c0_214 = arith.constant 0 : index
    %c0_215 = arith.constant 0 : index
    %433 = vector.load %arg10[%c19_213, %c0_214, %c0_215] : memref<25x8x4xf32, #tpu.memory_space<vmem>>, vector<1x8x4xf32>
    %434 = vector.shape_cast %433 : vector<1x8x4xf32> to vector<8x4xf32>
    %cst_216 = arith.constant dense<0.000000e+00> : vector<8x256xf32>
    %435 = tpu.matmul %434, %432, %cst_216 {dimension_numbers = #tpu.dot_dimension_numbers<[1], [0], [0], [1], [0, 0, 1, 1], [], []>} : vector<8x4xf32>, vector<4x256xf32>, vector<8x256xf32> -> vector<8x256xf32>
    %436 = arith.addf %422, %435 : vector<8x256xf32>
    %c226_i32_217 = arith.constant 226 : i32
    %437 = tpu.dynamic_rotate %162 by %c226_i32_217 dim 1 : vector<4x256xf32>, i32 -> vector<4x256xf32>
    %c30_i32_218 = arith.constant 30 : i32
    %438 = tpu.dynamic_rotate %162 by %c30_i32_218 dim 1 : vector<4x256xf32>, i32 -> vector<4x256xf32>
    %439 = vector.broadcast %8 : vector<1x1xf32> to vector<4x256xf32>
    %440 = arith.mulf %439, %437 : vector<4x256xf32>
    %441 = vector.broadcast %10 : vector<1x1xf32> to vector<4x256xf32>
    %442 = arith.mulf %441, %438 : vector<4x256xf32>
    %443 = arith.addf %440, %442 : vector<4x256xf32>
    %c20 = arith.constant 20 : index
    %c0_219 = arith.constant 0 : index
    %444 = vector.load %arg14[%c20, %c0_219] : memref<25x256xf32, #tpu.memory_space<vmem>>, vector<1x256xf32>
    %445 = vector.broadcast %444 : vector<1x256xf32> to vector<4x256xf32>
    %446 = arith.mulf %443, %445 : vector<4x256xf32>
    %c20_220 = arith.constant 20 : index
    %c0_221 = arith.constant 0 : index
    %c0_222 = arith.constant 0 : index
    %447 = vector.load %arg10[%c20_220, %c0_221, %c0_222] : memref<25x8x4xf32, #tpu.memory_space<vmem>>, vector<1x8x4xf32>
    %448 = vector.shape_cast %447 : vector<1x8x4xf32> to vector<8x4xf32>
    %cst_223 = arith.constant dense<0.000000e+00> : vector<8x256xf32>
    %449 = tpu.matmul %448, %446, %cst_223 {dimension_numbers = #tpu.dot_dimension_numbers<[1], [0], [0], [1], [0, 0, 1, 1], [], []>} : vector<8x4xf32>, vector<4x256xf32>, vector<8x256xf32> -> vector<8x256xf32>
    %450 = arith.addf %436, %449 : vector<8x256xf32>
    %c225_i32_224 = arith.constant 225 : i32
    %451 = tpu.dynamic_rotate %162 by %c225_i32_224 dim 1 : vector<4x256xf32>, i32 -> vector<4x256xf32>
    %c31_i32_225 = arith.constant 31 : i32
    %452 = tpu.dynamic_rotate %162 by %c31_i32_225 dim 1 : vector<4x256xf32>, i32 -> vector<4x256xf32>
    %453 = vector.broadcast %8 : vector<1x1xf32> to vector<4x256xf32>
    %454 = arith.mulf %453, %451 : vector<4x256xf32>
    %455 = vector.broadcast %10 : vector<1x1xf32> to vector<4x256xf32>
    %456 = arith.mulf %455, %452 : vector<4x256xf32>
    %457 = arith.addf %454, %456 : vector<4x256xf32>
    %c21 = arith.constant 21 : index
    %c0_226 = arith.constant 0 : index
    %458 = vector.load %arg14[%c21, %c0_226] : memref<25x256xf32, #tpu.memory_space<vmem>>, vector<1x256xf32>
    %459 = vector.broadcast %458 : vector<1x256xf32> to vector<4x256xf32>
    %460 = arith.mulf %457, %459 : vector<4x256xf32>
    %c21_227 = arith.constant 21 : index
    %c0_228 = arith.constant 0 : index
    %c0_229 = arith.constant 0 : index
    %461 = vector.load %arg10[%c21_227, %c0_228, %c0_229] : memref<25x8x4xf32, #tpu.memory_space<vmem>>, vector<1x8x4xf32>
    %462 = vector.shape_cast %461 : vector<1x8x4xf32> to vector<8x4xf32>
    %cst_230 = arith.constant dense<0.000000e+00> : vector<8x256xf32>
    %463 = tpu.matmul %462, %460, %cst_230 {dimension_numbers = #tpu.dot_dimension_numbers<[1], [0], [0], [1], [0, 0, 1, 1], [], []>} : vector<8x4xf32>, vector<4x256xf32>, vector<8x256xf32> -> vector<8x256xf32>
    %464 = arith.addf %450, %463 : vector<8x256xf32>
    %c224_i32_231 = arith.constant 224 : i32
    %465 = tpu.dynamic_rotate %162 by %c224_i32_231 dim 1 : vector<4x256xf32>, i32 -> vector<4x256xf32>
    %c32_i32_232 = arith.constant 32 : i32
    %466 = tpu.dynamic_rotate %162 by %c32_i32_232 dim 1 : vector<4x256xf32>, i32 -> vector<4x256xf32>
    %467 = vector.broadcast %8 : vector<1x1xf32> to vector<4x256xf32>
    %468 = arith.mulf %467, %465 : vector<4x256xf32>
    %469 = vector.broadcast %10 : vector<1x1xf32> to vector<4x256xf32>
    %470 = arith.mulf %469, %466 : vector<4x256xf32>
    %471 = arith.addf %468, %470 : vector<4x256xf32>
    %c22 = arith.constant 22 : index
    %c0_233 = arith.constant 0 : index
    %472 = vector.load %arg14[%c22, %c0_233] : memref<25x256xf32, #tpu.memory_space<vmem>>, vector<1x256xf32>
    %473 = vector.broadcast %472 : vector<1x256xf32> to vector<4x256xf32>
    %474 = arith.mulf %471, %473 : vector<4x256xf32>
    %c22_234 = arith.constant 22 : index
    %c0_235 = arith.constant 0 : index
    %c0_236 = arith.constant 0 : index
    %475 = vector.load %arg10[%c22_234, %c0_235, %c0_236] : memref<25x8x4xf32, #tpu.memory_space<vmem>>, vector<1x8x4xf32>
    %476 = vector.shape_cast %475 : vector<1x8x4xf32> to vector<8x4xf32>
    %cst_237 = arith.constant dense<0.000000e+00> : vector<8x256xf32>
    %477 = tpu.matmul %476, %474, %cst_237 {dimension_numbers = #tpu.dot_dimension_numbers<[1], [0], [0], [1], [0, 0, 1, 1], [], []>} : vector<8x4xf32>, vector<4x256xf32>, vector<8x256xf32> -> vector<8x256xf32>
    %478 = arith.addf %464, %477 : vector<8x256xf32>
    %c223_i32_238 = arith.constant 223 : i32
    %479 = tpu.dynamic_rotate %162 by %c223_i32_238 dim 1 : vector<4x256xf32>, i32 -> vector<4x256xf32>
    %c33_i32_239 = arith.constant 33 : i32
    %480 = tpu.dynamic_rotate %162 by %c33_i32_239 dim 1 : vector<4x256xf32>, i32 -> vector<4x256xf32>
    %481 = vector.broadcast %8 : vector<1x1xf32> to vector<4x256xf32>
    %482 = arith.mulf %481, %479 : vector<4x256xf32>
    %483 = vector.broadcast %10 : vector<1x1xf32> to vector<4x256xf32>
    %484 = arith.mulf %483, %480 : vector<4x256xf32>
    %485 = arith.addf %482, %484 : vector<4x256xf32>
    %c23 = arith.constant 23 : index
    %c0_240 = arith.constant 0 : index
    %486 = vector.load %arg14[%c23, %c0_240] : memref<25x256xf32, #tpu.memory_space<vmem>>, vector<1x256xf32>
    %487 = vector.broadcast %486 : vector<1x256xf32> to vector<4x256xf32>
    %488 = arith.mulf %485, %487 : vector<4x256xf32>
    %c23_241 = arith.constant 23 : index
    %c0_242 = arith.constant 0 : index
    %c0_243 = arith.constant 0 : index
    %489 = vector.load %arg10[%c23_241, %c0_242, %c0_243] : memref<25x8x4xf32, #tpu.memory_space<vmem>>, vector<1x8x4xf32>
    %490 = vector.shape_cast %489 : vector<1x8x4xf32> to vector<8x4xf32>
    %cst_244 = arith.constant dense<0.000000e+00> : vector<8x256xf32>
    %491 = tpu.matmul %490, %488, %cst_244 {dimension_numbers = #tpu.dot_dimension_numbers<[1], [0], [0], [1], [0, 0, 1, 1], [], []>} : vector<8x4xf32>, vector<4x256xf32>, vector<8x256xf32> -> vector<8x256xf32>
    %492 = arith.addf %478, %491 : vector<8x256xf32>
    %c222_i32_245 = arith.constant 222 : i32
    %493 = tpu.dynamic_rotate %162 by %c222_i32_245 dim 1 : vector<4x256xf32>, i32 -> vector<4x256xf32>
    %c34_i32_246 = arith.constant 34 : i32
    %494 = tpu.dynamic_rotate %162 by %c34_i32_246 dim 1 : vector<4x256xf32>, i32 -> vector<4x256xf32>
    %495 = vector.broadcast %8 : vector<1x1xf32> to vector<4x256xf32>
    %496 = arith.mulf %495, %493 : vector<4x256xf32>
    %497 = vector.broadcast %10 : vector<1x1xf32> to vector<4x256xf32>
    %498 = arith.mulf %497, %494 : vector<4x256xf32>
    %499 = arith.addf %496, %498 : vector<4x256xf32>
    %c24 = arith.constant 24 : index
    %c0_247 = arith.constant 0 : index
    %500 = vector.load %arg14[%c24, %c0_247] : memref<25x256xf32, #tpu.memory_space<vmem>>, vector<1x256xf32>
    %501 = vector.broadcast %500 : vector<1x256xf32> to vector<4x256xf32>
    %502 = arith.mulf %499, %501 : vector<4x256xf32>
    %c24_248 = arith.constant 24 : index
    %c0_249 = arith.constant 0 : index
    %c0_250 = arith.constant 0 : index
    %503 = vector.load %arg10[%c24_248, %c0_249, %c0_250] : memref<25x8x4xf32, #tpu.memory_space<vmem>>, vector<1x8x4xf32>
    %504 = vector.shape_cast %503 : vector<1x8x4xf32> to vector<8x4xf32>
    %cst_251 = arith.constant dense<0.000000e+00> : vector<8x256xf32>
    %505 = tpu.matmul %504, %502, %cst_251 {dimension_numbers = #tpu.dot_dimension_numbers<[1], [0], [0], [1], [0, 0, 1, 1], [], []>} : vector<8x4xf32>, vector<4x256xf32>, vector<8x256xf32> -> vector<8x256xf32>
    %506 = arith.addf %492, %505 : vector<8x256xf32>
    %c0_252 = arith.constant 0 : index
    %c0_253 = arith.constant 0 : index
    %507 = vector.load %arg11[%c0_252, %c0_253] : memref<8x1xf32, #tpu.memory_space<vmem>>, vector<8x1xf32>
    %508 = vector.broadcast %507 : vector<8x1xf32> to vector<8x256xf32>
    %509 = arith.addf %506, %508 : vector<8x256xf32>
    %cst_254 = arith.constant 0.000000e+00 : f32
    %510 = vector.broadcast %cst_254 : f32 to vector<8x256xf32>
    %511 = arith.maximumf %509, %510 : vector<8x256xf32>
    %c0_255 = arith.constant 0 : index
    %c16_256 = arith.constant 16 : index
    %c0_257 = arith.constant 0 : index
    %512 = vector.load %arg15[%c0_255, %c16_256, %c0_257] : memref<1x32x256xf32, #tpu.memory_space<vmem>>, vector<1x8x256xf32>
    %513 = vector.shape_cast %512 : vector<1x8x256xf32> to vector<8x256xf32>
    %514 = vector.shape_cast %511 : vector<8x256xf32> to vector<1x8x256xf32>
    tpu.vector_store %arg15[%c0_255, %c16_256, %c0_257], %514 {strides = array<i32>} : memref<1x32x256xf32, #tpu.memory_space<vmem>>, vector<1x8x256xf32>,
    %cst_258 = arith.constant -1.000000e+30 : f32
    %515 = vector.broadcast %cst_258 : f32 to vector<4x256xf32>
    %c6_259 = arith.constant 6 : index
    %c0_260 = arith.constant 0 : index
    %516 = vector.load %arg14[%c6_259, %c0_260] : memref<25x256xf32, #tpu.memory_space<vmem>>, vector<1x256xf32>
    %c17_i32_261 = arith.constant 17 : i32
    %517 = tpu.dynamic_rotate %1 by %c17_i32_261 dim 1 : vector<4x256xf32>, i32 -> vector<4x256xf32>
    %c239_i32_262 = arith.constant 239 : i32
    %518 = tpu.dynamic_rotate %1 by %c239_i32_262 dim 1 : vector<4x256xf32>, i32 -> vector<4x256xf32>
    %519 = vector.broadcast %8 : vector<1x1xf32> to vector<4x256xf32>
    %520 = arith.mulf %519, %517 : vector<4x256xf32>
    %521 = vector.broadcast %10 : vector<1x1xf32> to vector<4x256xf32>
    %522 = arith.mulf %521, %518 : vector<4x256xf32>
    %523 = arith.addf %520, %522 : vector<4x256xf32>
    %524 = vector.broadcast %516 : vector<1x256xf32> to vector<4x256xf32>
    %525 = arith.mulf %523, %524 : vector<4x256xf32>
    %cst_263 = arith.constant 1.000000e+00 : f32
    %526 = vector.broadcast %cst_263 : f32 to vector<1x256xf32>
    %527 = arith.subf %516, %526 : vector<1x256xf32>
    %cst_264 = arith.constant 1.000000e+30 : f32
    %528 = vector.broadcast %cst_264 : f32 to vector<1x256xf32>
    %529 = arith.mulf %527, %528 : vector<1x256xf32>
    %530 = vector.broadcast %529 : vector<1x256xf32> to vector<4x256xf32>
    %531 = arith.addf %525, %530 : vector<4x256xf32>
    %532 = arith.maximumf %515, %531 : vector<4x256xf32>
    %c7_265 = arith.constant 7 : index
    %c0_266 = arith.constant 0 : index
    %533 = vector.load %arg14[%c7_265, %c0_266] : memref<25x256xf32, #tpu.memory_space<vmem>>, vector<1x256xf32>
    %c16_i32_267 = arith.constant 16 : i32
    %534 = tpu.dynamic_rotate %1 by %c16_i32_267 dim 1 : vector<4x256xf32>, i32 -> vector<4x256xf32>
    %c240_i32_268 = arith.constant 240 : i32
    %535 = tpu.dynamic_rotate %1 by %c240_i32_268 dim 1 : vector<4x256xf32>, i32 -> vector<4x256xf32>
    %536 = vector.broadcast %8 : vector<1x1xf32> to vector<4x256xf32>
    %537 = arith.mulf %536, %534 : vector<4x256xf32>
    %538 = vector.broadcast %10 : vector<1x1xf32> to vector<4x256xf32>
    %539 = arith.mulf %538, %535 : vector<4x256xf32>
    %540 = arith.addf %537, %539 : vector<4x256xf32>
    %541 = vector.broadcast %533 : vector<1x256xf32> to vector<4x256xf32>
    %542 = arith.mulf %540, %541 : vector<4x256xf32>
    %cst_269 = arith.constant 1.000000e+00 : f32
    %543 = vector.broadcast %cst_269 : f32 to vector<1x256xf32>
    %544 = arith.subf %533, %543 : vector<1x256xf32>
    %cst_270 = arith.constant 1.000000e+30 : f32
    %545 = vector.broadcast %cst_270 : f32 to vector<1x256xf32>
    %546 = arith.mulf %544, %545 : vector<1x256xf32>
    %547 = vector.broadcast %546 : vector<1x256xf32> to vector<4x256xf32>
    %548 = arith.addf %542, %547 : vector<4x256xf32>
    %549 = arith.maximumf %532, %548 : vector<4x256xf32>
    %c8_271 = arith.constant 8 : index
    %c0_272 = arith.constant 0 : index
    %550 = vector.load %arg14[%c8_271, %c0_272] : memref<25x256xf32, #tpu.memory_space<vmem>>, vector<1x256xf32>
    %c15_i32_273 = arith.constant 15 : i32
    %551 = tpu.dynamic_rotate %1 by %c15_i32_273 dim 1 : vector<4x256xf32>, i32 -> vector<4x256xf32>
    %c241_i32_274 = arith.constant 241 : i32
    %552 = tpu.dynamic_rotate %1 by %c241_i32_274 dim 1 : vector<4x256xf32>, i32 -> vector<4x256xf32>
    %553 = vector.broadcast %8 : vector<1x1xf32> to vector<4x256xf32>
    %554 = arith.mulf %553, %551 : vector<4x256xf32>
    %555 = vector.broadcast %10 : vector<1x1xf32> to vector<4x256xf32>
    %556 = arith.mulf %555, %552 : vector<4x256xf32>
    %557 = arith.addf %554, %556 : vector<4x256xf32>
    %558 = vector.broadcast %550 : vector<1x256xf32> to vector<4x256xf32>
    %559 = arith.mulf %557, %558 : vector<4x256xf32>
    %cst_275 = arith.constant 1.000000e+00 : f32
    %560 = vector.broadcast %cst_275 : f32 to vector<1x256xf32>
    %561 = arith.subf %550, %560 : vector<1x256xf32>
    %cst_276 = arith.constant 1.000000e+30 : f32
    %562 = vector.broadcast %cst_276 : f32 to vector<1x256xf32>
    %563 = arith.mulf %561, %562 : vector<1x256xf32>
    %564 = vector.broadcast %563 : vector<1x256xf32> to vector<4x256xf32>
    %565 = arith.addf %559, %564 : vector<4x256xf32>
    %566 = arith.maximumf %549, %565 : vector<4x256xf32>
    %c11_277 = arith.constant 11 : index
    %c0_278 = arith.constant 0 : index
    %567 = vector.load %arg14[%c11_277, %c0_278] : memref<25x256xf32, #tpu.memory_space<vmem>>, vector<1x256xf32>
    %c1_i32_279 = arith.constant 1 : i32
    %568 = tpu.dynamic_rotate %1 by %c1_i32_279 dim 1 : vector<4x256xf32>, i32 -> vector<4x256xf32>
    %c255_i32_280 = arith.constant 255 : i32
    %569 = tpu.dynamic_rotate %1 by %c255_i32_280 dim 1 : vector<4x256xf32>, i32 -> vector<4x256xf32>
    %570 = vector.broadcast %8 : vector<1x1xf32> to vector<4x256xf32>
    %571 = arith.mulf %570, %568 : vector<4x256xf32>
    %572 = vector.broadcast %10 : vector<1x1xf32> to vector<4x256xf32>
    %573 = arith.mulf %572, %569 : vector<4x256xf32>
    %574 = arith.addf %571, %573 : vector<4x256xf32>
    %575 = vector.broadcast %567 : vector<1x256xf32> to vector<4x256xf32>
    %576 = arith.mulf %574, %575 : vector<4x256xf32>
    %cst_281 = arith.constant 1.000000e+00 : f32
    %577 = vector.broadcast %cst_281 : f32 to vector<1x256xf32>
    %578 = arith.subf %567, %577 : vector<1x256xf32>
    %cst_282 = arith.constant 1.000000e+30 : f32
    %579 = vector.broadcast %cst_282 : f32 to vector<1x256xf32>
    %580 = arith.mulf %578, %579 : vector<1x256xf32>
    %581 = vector.broadcast %580 : vector<1x256xf32> to vector<4x256xf32>
    %582 = arith.addf %576, %581 : vector<4x256xf32>
    %583 = arith.maximumf %566, %582 : vector<4x256xf32>
    %c12_283 = arith.constant 12 : index
    %c0_284 = arith.constant 0 : index
    %584 = vector.load %arg14[%c12_283, %c0_284] : memref<25x256xf32, #tpu.memory_space<vmem>>, vector<1x256xf32>
    %585 = vector.broadcast %584 : vector<1x256xf32> to vector<4x256xf32>
    %586 = arith.mulf %1, %585 : vector<4x256xf32>
    %cst_285 = arith.constant 1.000000e+00 : f32
    %587 = vector.broadcast %cst_285 : f32 to vector<1x256xf32>
    %588 = arith.subf %584, %587 : vector<1x256xf32>
    %cst_286 = arith.constant 1.000000e+30 : f32
    %589 = vector.broadcast %cst_286 : f32 to vector<1x256xf32>
    %590 = arith.mulf %588, %589 : vector<1x256xf32>
    %591 = vector.broadcast %590 : vector<1x256xf32> to vector<4x256xf32>
    %592 = arith.addf %586, %591 : vector<4x256xf32>
    %593 = arith.maximumf %583, %592 : vector<4x256xf32>
    %c13_287 = arith.constant 13 : index
    %c0_288 = arith.constant 0 : index
    %594 = vector.load %arg14[%c13_287, %c0_288] : memref<25x256xf32, #tpu.memory_space<vmem>>, vector<1x256xf32>
    %c255_i32_289 = arith.constant 255 : i32
    %595 = tpu.dynamic_rotate %1 by %c255_i32_289 dim 1 : vector<4x256xf32>, i32 -> vector<4x256xf32>
    %c1_i32_290 = arith.constant 1 : i32
    %596 = tpu.dynamic_rotate %1 by %c1_i32_290 dim 1 : vector<4x256xf32>, i32 -> vector<4x256xf32>
    %597 = vector.broadcast %8 : vector<1x1xf32> to vector<4x256xf32>
    %598 = arith.mulf %597, %595 : vector<4x256xf32>
    %599 = vector.broadcast %10 : vector<1x1xf32> to vector<4x256xf32>
    %600 = arith.mulf %599, %596 : vector<4x256xf32>
    %601 = arith.addf %598, %600 : vector<4x256xf32>
    %602 = vector.broadcast %594 : vector<1x256xf32> to vector<4x256xf32>
    %603 = arith.mulf %601, %602 : vector<4x256xf32>
    %cst_291 = arith.constant 1.000000e+00 : f32
    %604 = vector.broadcast %cst_291 : f32 to vector<1x256xf32>
    %605 = arith.subf %594, %604 : vector<1x256xf32>
    %cst_292 = arith.constant 1.000000e+30 : f32
    %606 = vector.broadcast %cst_292 : f32 to vector<1x256xf32>
    %607 = arith.mulf %605, %606 : vector<1x256xf32>
    %608 = vector.broadcast %607 : vector<1x256xf32> to vector<4x256xf32>
    %609 = arith.addf %603, %608 : vector<4x256xf32>
    %610 = arith.maximumf %593, %609 : vector<4x256xf32>
    %c16_293 = arith.constant 16 : index
    %c0_294 = arith.constant 0 : index
    %611 = vector.load %arg14[%c16_293, %c0_294] : memref<25x256xf32, #tpu.memory_space<vmem>>, vector<1x256xf32>
    %c241_i32_295 = arith.constant 241 : i32
    %612 = tpu.dynamic_rotate %1 by %c241_i32_295 dim 1 : vector<4x256xf32>, i32 -> vector<4x256xf32>
    %c15_i32_296 = arith.constant 15 : i32
    %613 = tpu.dynamic_rotate %1 by %c15_i32_296 dim 1 : vector<4x256xf32>, i32 -> vector<4x256xf32>
    %614 = vector.broadcast %8 : vector<1x1xf32> to vector<4x256xf32>
    %615 = arith.mulf %614, %612 : vector<4x256xf32>
    %616 = vector.broadcast %10 : vector<1x1xf32> to vector<4x256xf32>
    %617 = arith.mulf %616, %613 : vector<4x256xf32>
    %618 = arith.addf %615, %617 : vector<4x256xf32>
    %619 = vector.broadcast %611 : vector<1x256xf32> to vector<4x256xf32>
    %620 = arith.mulf %618, %619 : vector<4x256xf32>
    %cst_297 = arith.constant 1.000000e+00 : f32
    %621 = vector.broadcast %cst_297 : f32 to vector<1x256xf32>
    %622 = arith.subf %611, %621 : vector<1x256xf32>
    %cst_298 = arith.constant 1.000000e+30 : f32
    %623 = vector.broadcast %cst_298 : f32 to vector<1x256xf32>
    %624 = arith.mulf %622, %623 : vector<1x256xf32>
    %625 = vector.broadcast %624 : vector<1x256xf32> to vector<4x256xf32>
    %626 = arith.addf %620, %625 : vector<4x256xf32>
    %627 = arith.maximumf %610, %626 : vector<4x256xf32>
    %c17_299 = arith.constant 17 : index
    %c0_300 = arith.constant 0 : index
    %628 = vector.load %arg14[%c17_299, %c0_300] : memref<25x256xf32, #tpu.memory_space<vmem>>, vector<1x256xf32>
    %c240_i32_301 = arith.constant 240 : i32
    %629 = tpu.dynamic_rotate %1 by %c240_i32_301 dim 1 : vector<4x256xf32>, i32 -> vector<4x256xf32>
    %c16_i32_302 = arith.constant 16 : i32
    %630 = tpu.dynamic_rotate %1 by %c16_i32_302 dim 1 : vector<4x256xf32>, i32 -> vector<4x256xf32>
    %631 = vector.broadcast %8 : vector<1x1xf32> to vector<4x256xf32>
    %632 = arith.mulf %631, %629 : vector<4x256xf32>
    %633 = vector.broadcast %10 : vector<1x1xf32> to vector<4x256xf32>
    %634 = arith.mulf %633, %630 : vector<4x256xf32>
    %635 = arith.addf %632, %634 : vector<4x256xf32>
    %636 = vector.broadcast %628 : vector<1x256xf32> to vector<4x256xf32>
    %637 = arith.mulf %635, %636 : vector<4x256xf32>
    %cst_303 = arith.constant 1.000000e+00 : f32
    %638 = vector.broadcast %cst_303 : f32 to vector<1x256xf32>
    %639 = arith.subf %628, %638 : vector<1x256xf32>
    %cst_304 = arith.constant 1.000000e+30 : f32
    %640 = vector.broadcast %cst_304 : f32 to vector<1x256xf32>
    %641 = arith.mulf %639, %640 : vector<1x256xf32>
    %642 = vector.broadcast %641 : vector<1x256xf32> to vector<4x256xf32>
    %643 = arith.addf %637, %642 : vector<4x256xf32>
    %644 = arith.maximumf %627, %643 : vector<4x256xf32>
    %c18_305 = arith.constant 18 : index
    %c0_306 = arith.constant 0 : index
    %645 = vector.load %arg14[%c18_305, %c0_306] : memref<25x256xf32, #tpu.memory_space<vmem>>, vector<1x256xf32>
    %c239_i32_307 = arith.constant 239 : i32
    %646 = tpu.dynamic_rotate %1 by %c239_i32_307 dim 1 : vector<4x256xf32>, i32 -> vector<4x256xf32>
    %c17_i32_308 = arith.constant 17 : i32
    %647 = tpu.dynamic_rotate %1 by %c17_i32_308 dim 1 : vector<4x256xf32>, i32 -> vector<4x256xf32>
    %648 = vector.broadcast %8 : vector<1x1xf32> to vector<4x256xf32>
    %649 = arith.mulf %648, %646 : vector<4x256xf32>
    %650 = vector.broadcast %10 : vector<1x1xf32> to vector<4x256xf32>
    %651 = arith.mulf %650, %647 : vector<4x256xf32>
    %652 = arith.addf %649, %651 : vector<4x256xf32>
    %653 = vector.broadcast %645 : vector<1x256xf32> to vector<4x256xf32>
    %654 = arith.mulf %652, %653 : vector<4x256xf32>
    %cst_309 = arith.constant 1.000000e+00 : f32
    %655 = vector.broadcast %cst_309 : f32 to vector<1x256xf32>
    %656 = arith.subf %645, %655 : vector<1x256xf32>
    %cst_310 = arith.constant 1.000000e+30 : f32
    %657 = vector.broadcast %cst_310 : f32 to vector<1x256xf32>
    %658 = arith.mulf %656, %657 : vector<1x256xf32>
    %659 = vector.broadcast %658 : vector<1x256xf32> to vector<4x256xf32>
    %660 = arith.addf %654, %659 : vector<4x256xf32>
    %661 = arith.maximumf %644, %660 : vector<4x256xf32>
    %c0_311 = arith.constant 0 : index
    %c0_312 = arith.constant 0 : index
    %662 = vector.load %arg12[%c0_311, %c0_312] : memref<8x4xf32, #tpu.memory_space<vmem>>, vector<8x4xf32>
    %cst_313 = arith.constant dense<0.000000e+00> : vector<8x256xf32>
    %663 = tpu.matmul %662, %661, %cst_313 {dimension_numbers = #tpu.dot_dimension_numbers<[1], [0], [0], [1], [0, 0, 1, 1], [], []>} : vector<8x4xf32>, vector<4x256xf32>, vector<8x256xf32> -> vector<8x256xf32>
    %c0_314 = arith.constant 0 : index
    %c0_315 = arith.constant 0 : index
    %664 = vector.load %arg13[%c0_314, %c0_315] : memref<8x1xf32, #tpu.memory_space<vmem>>, vector<8x1xf32>
    %665 = vector.broadcast %664 : vector<8x1xf32> to vector<8x256xf32>
    %666 = arith.addf %663, %665 : vector<8x256xf32>
    %cst_316 = arith.constant 0.000000e+00 : f32
    %667 = vector.broadcast %cst_316 : f32 to vector<8x256xf32>
    %668 = arith.maximumf %666, %667 : vector<8x256xf32>
    %c0_317 = arith.constant 0 : index
    %c24_318 = arith.constant 24 : index
    %c0_319 = arith.constant 0 : index
    %669 = vector.load %arg15[%c0_317, %c24_318, %c0_319] : memref<1x32x256xf32, #tpu.memory_space<vmem>>, vector<1x8x256xf32>
    %670 = vector.shape_cast %669 : vector<1x8x256xf32> to vector<8x256xf32>
    %671 = vector.shape_cast %668 : vector<8x256xf32> to vector<1x8x256xf32>
    tpu.vector_store %arg15[%c0_317, %c24_318, %c0_319], %671 {strides = array<i32>} : memref<1x32x256xf32, #tpu.memory_space<vmem>>, vector<1x8x256xf32>,
    return
  }
  func.func @transform_0(%arg0: i32) -> (i32, i32, i32) {
    %c0_i32 = arith.constant 0 : i32
    %c0_i32_0 = arith.constant 0 : i32
    %c0_i32_1 = arith.constant 0 : i32
    return %arg0, %c0_i32, %c0_i32_0 : i32, i32, i32
  }
  func.func @transform_1(%arg0: i32) -> (i32, i32) {
    %c0_i32 = arith.constant 0 : i32
    %c0_i32_0 = arith.constant 0 : i32
    %c0_i32_1 = arith.constant 0 : i32
    return %c0_i32, %c0_i32_0 : i32, i32
  }
  func.func @transform_2(%arg0: i32) -> (i32, i32) {
    %c0_i32 = arith.constant 0 : i32
    %c0_i32_0 = arith.constant 0 : i32
    %c0_i32_1 = arith.constant 0 : i32
    return %c0_i32, %c0_i32_0 : i32, i32
  }
  func.func @transform_3(%arg0: i32) -> (i32, i32) {
    %c0_i32 = arith.constant 0 : i32
    %c0_i32_0 = arith.constant 0 : i32
    %c0_i32_1 = arith.constant 0 : i32
    return %c0_i32, %c0_i32_0 : i32, i32
  }
  func.func @transform_4(%arg0: i32) -> (i32, i32) {
    %c0_i32 = arith.constant 0 : i32
    %c0_i32_0 = arith.constant 0 : i32
    %c0_i32_1 = arith.constant 0 : i32
    return %c0_i32, %c0_i32_0 : i32, i32
  }
  func.func @transform_5(%arg0: i32) -> (i32, i32, i32) {
    %c0_i32 = arith.constant 0 : i32
    %c0_i32_0 = arith.constant 0 : i32
    %c0_i32_1 = arith.constant 0 : i32
    %c0_i32_2 = arith.constant 0 : i32
    return %c0_i32, %c0_i32_0, %c0_i32_1 : i32, i32, i32
  }
  func.func @transform_6(%arg0: i32) -> (i32, i32) {
    %c0_i32 = arith.constant 0 : i32
    %c0_i32_0 = arith.constant 0 : i32
    %c0_i32_1 = arith.constant 0 : i32
    return %c0_i32, %c0_i32_0 : i32, i32
  }
  func.func @transform_7(%arg0: i32) -> (i32, i32) {
    %c0_i32 = arith.constant 0 : i32
    %c0_i32_0 = arith.constant 0 : i32
    %c0_i32_1 = arith.constant 0 : i32
    return %c0_i32, %c0_i32_0 : i32, i32
  }
  func.func @transform_8(%arg0: i32) -> (i32, i32) {
    %c0_i32 = arith.constant 0 : i32
    %c0_i32_0 = arith.constant 0 : i32
    %c0_i32_1 = arith.constant 0 : i32
    return %c0_i32, %c0_i32_0 : i32, i32
  }
  func.func @transform_9(%arg0: i32) -> (i32, i32, i32) {
    %c0_i32 = arith.constant 0 : i32
    %c0_i32_0 = arith.constant 0 : i32
    %c0_i32_1 = arith.constant 0 : i32
    %c0_i32_2 = arith.constant 0 : i32
    return %c0_i32, %c0_i32_0, %c0_i32_1 : i32, i32, i32
  }
  func.func @transform_10(%arg0: i32) -> (i32, i32) {
    %c0_i32 = arith.constant 0 : i32
    %c0_i32_0 = arith.constant 0 : i32
    %c0_i32_1 = arith.constant 0 : i32
    return %c0_i32, %c0_i32_0 : i32, i32
  }
  func.func @transform_11(%arg0: i32) -> (i32, i32) {
    %c0_i32 = arith.constant 0 : i32
    %c0_i32_0 = arith.constant 0 : i32
    %c0_i32_1 = arith.constant 0 : i32
    return %c0_i32, %c0_i32_0 : i32, i32
  }
  func.func @transform_12(%arg0: i32) -> (i32, i32) {
    %c0_i32 = arith.constant 0 : i32
    %c0_i32_0 = arith.constant 0 : i32
    %c0_i32_1 = arith.constant 0 : i32
    return %c0_i32, %c0_i32_0 : i32, i32
  }
  func.func @transform_13(%arg0: i32) -> (i32, i32) {
    %c0_i32 = arith.constant 0 : i32
    %c0_i32_0 = arith.constant 0 : i32
    %c0_i32_1 = arith.constant 0 : i32
    return %c0_i32, %c0_i32_0 : i32, i32
  }
  func.func @transform_14(%arg0: i32) -> (i32, i32, i32) {
    %c0_i32 = arith.constant 0 : i32
    %c0_i32_0 = arith.constant 0 : i32
    %c0_i32_1 = arith.constant 0 : i32
    return %arg0, %c0_i32, %c0_i32_0 : i32, i32, i32
  }
}

</mosaic_0001>

<bundles_post_ra>
// kernel: tpu_custom_call.1
= control target key start
LH: loop header
LB: loop body
LE: loop exit
PB: predicated region body
PF: predicated region fallthrough
CT: control target
= control target key end

     0   :  { %s7331_s0 = inlined_call_operand.vmem [shape: f32[2,4,256], index: 0, kind: input, shape index: {}]   ;;  %s7332_s1 = inlined_call_operand.vmem [shape: f32[8,4], index: 1, kind: input, shape index: {}]   ;;  %s7333_s2 = inlined_call_operand.vmem [shape: f32[8,1], index: 2, kind: input, shape index: {}]   ;;  %s7334_s3 = inlined_call_operand.vmem [shape: f32[6,4], index: 3, kind: input, shape index: {}]   ;;  %s7335_s4 = inlined_call_operand.vmem [shape: f32[6,1], index: 4, kind: input, shape index: {}]   ;;  %s7336_s5 = inlined_call_operand.vmem [shape: f32[9,8,6], index: 5, kind: input, shape index: {}]   ;;  %s7337_s6 = inlined_call_operand.vmem [shape: f32[8,1], index: 6, kind: input, shape index: {}]   ;;  %s7338_s7 = inlined_call_operand.vmem [shape: f32[4,4], index: 7, kind: input, shape index: {}]   ;;  %s7339_s8 = inlined_call_operand.vmem [shape: f32[4,1], index: 8, kind: input, shape index: {}]   ;;  %s7340_s9 = inlined_call_operand.vmem [shape: f32[25,8,4], index: 9, kind: input, shape index: {}]   ;;  %s7341_s10 = inlined_call_operand.vmem [shape: f32[8,1], index: 10, kind: input, shape index: {}]   ;;  %s7342_s11 = inlined_call_operand.vmem [shape: f32[8,4], index: 11, kind: input, shape index: {}]   ;;  %s7343_s12 = inlined_call_operand.vmem [shape: f32[8,1], index: 12, kind: input, shape index: {}]   ;;  %s7344_s13 = inlined_call_operand.vmem [shape: f32[25,256], index: 13, kind: input, shape index: {}]   ;;  %s7345_s14 = inlined_call_operand.hbm [shape: f32[2,32,256], index: 14, kind: output, shape index: {}]  }
   0x1   :  { %7396 = sst [smem:[#allocation30_spill]] %s7331_s0 }
   0x2   :  { %7397 = sst [smem:[#allocation31_spill]] %s7332_s1 }
   0x3   :  { %7398 = sst [smem:[#allocation32_spill]] %s7334_s3 }
   0x4   :  { %7399 = sst [smem:[#allocation33_spill]] %s7335_s4 }
   0x5   :  { %7400 = sst [smem:[#allocation34_spill]] %s7336_s5 }
   0x6   :  { %7401 = sst [smem:[#allocation35_spill]] %s7338_s7 }
   0x7   :  { %7402 = sst [smem:[#allocation36_spill]] %s7339_s8 }
   0x8   :  { %19 = vsyncpa [#allocation3], 0 }
   0x9   :  { %21 = vsyncpa [#allocation3 + $0x1], 0  ;;  %s5587_s29 = smov 0   ;;  %s5589_s30 = smov 0  }
   0xa   :  { %s5591_s15 = smov 0   ;;  %s5593_s16 = smov 0  }
   0xb LB: > { %7403 = sst [smem:[#allocation5_spill]] %s5470_s29  ;;  %s5608_s17 = sadd.s32 4294967295, %s5482_s16   ;;  %s5482_s16 = sphi %s5593_s16, %s7529_s16   ;;  %s5478_s15 = sphi %s5591_s15, %s7531_s15   ;;  %s5474_s30 = sphi %s5589_s30, %s7533_s30   ;;  %s5470_s29 = sphi %s5587_s29, %s7532_s29  }
   0xc   : > { %7404 = sst [smem:[#allocation6_spill]] %s5478_s15  ;;  %s5070_s18 = sadd.s32 4294967294, %s5482_s16  }
   0xd   : > { %s5612_s19 = sadd.s32 1, %s5482_s16   ;;  %s333_s20 = sadd.s32 1, %s5478_s15 }
   0xe   : > { %7405 = sst [smem:[#allocation7_spill]] %s5612_s19  ;;  %s330_s21 = ssub.s32 %s5482_s16, %s5612_s19 }
   0xf   : > { %p343_p0 = scmp.ne.s32.totalorder %s5478_s15, %s5474_s30  ;;  %p331_p1 = scmp.eq.s32.totalorder %s330_s21, 0 }
  0x10   : > { %p344_p2 = scmp.eq.s32.totalorder %s5608_s17, 1  ;;  %p349_p3 = scmp.ne.s32.totalorder %s5474_s30, %s5470_s29 }
  0x11   : > { %p350_p4 = scmp.eq.s32.totalorder %s5070_s18, 1  ;;  %p5073_p7 = scmp.ge.s32.totalorder %s5482_s16, 1 }
  0x12   : > { %s5623_s22 = scalar_select %p331_p1, %s5478_s15, %s333_s20  }
  0x13   : > { %p5625_p5 = por %p344_p2, %p343_p0  ;;  %p5629_p6 = por %p350_p4, %p349_p3 }
  0x14   : > { %7406 = sst [smem:[#allocation8_spill]] %s5623_s22  ;;  %p415_p8 = scmp.lt.s32.totalorder %s5482_s16, 3 }
  0x15   : > { %s7408_s24 = scalar_select %p5629_p6, 1, 0 }
  0x16   : > { %p416_p9 = pnand %p5073_p7, %p415_p8 }
  0x17   : > { %7409 = sst [smem:[#allocation9_spill]] %s7408_s24 }
  0x18   : > { %419 = sbr.rel (%p416_p9) target bundleno = 1196 (0x4ac), region = 76 }
  0x1f   : > { %p461_p10 = scmp.lt.s32.totalorder %s5608_s17, 1  ;;  %v467_v0 = vlaneseq  ;;  %v7367_v1 = vmov 0.0   ;;  %v5485_v3 = vmov 0   ;;  %s7355_s27 = smov 1   ;;  %vm488_vm0 = vcmask 1043456  }
  0x20   : > { %557 = vmatprep.mubr.f32.mxu0 %v7367_v1  ;;  %2565 = vmatprep.mubr.f32.mxu1 %v7367_v1  ;;  %s7410_s0 = sld [smem:[#allocation30_spill]]  ;;  %s7411_s4 = sld [smem:[#allocation33_spill]]  ;;  %vm484_vm1 = vcmask 31744   ;;  %v5085_v27 = vld [vmem:[%s7344_s13 + $0x7] ss:$8 sm:$0x3] }
  0x21   : > { %s462_s25 = scalar_select %p461_p10, %s5608_s17, 1  ;;  %v5640_v2 = vand.u32 127, %v467_v0  ;;  %5416 = vset.pattern.permute.xlu0 %v5485_v3  ;;  %5417 = vset.pattern.permute.xlu1 %v5485_v3  ;;  %v687_v24 = vshrl.u32 %v467_v0, 7  ;;  %vm740_vm6 = vcmask 1045504   ;;  %vm736_vm8 = vcmask 48128  }
  0x22   : > { %s7412_s1 = sld [smem:[#allocation31_spill]]  ;;  %s7413_s3 = sld [smem:[#allocation32_spill]]  ;;  %v5084_v50 = vld [vmem:[%s7344_s13 + $0x6] ss:$8 sm:$0x3] }
  0x23   : > { %s5280_s26 = sshll.u32 %s462_s25, 3  ;;  %469 = vrot.lane.b32.xlu0 %v5640_v2, %s7355_s27  ;;  %s7353_s28 = smov 16   ;;  %vm703_vm3 = vcmp.lt.s32.totalorder %v5640_v2, 16  ;;  %v5728_v28 = vsub.s32 0, %v687_v24  ;;  %vm710_vm4 = vcmp.lt.s32.totalorder %v5640_v2, 112  ;;  %v5731_v29 = vsub.s32 1, %v687_v24 }
  0x24   : > { %s7349_s18 = smov 112   ;;  %s7359_s21 = smov 17   ;;  %vm655_vm5 = vcmp.lt.s32.totalorder %v5640_v2, 17  ;;  %vm662_vm7 = vcmp.lt.s32.totalorder %v5640_v2, 111  ;;  %vm902_vm9 = vcmp.lt.s32.totalorder %v5640_v2, 15  ;;  %vm909_vm10 = vcmp.lt.s32.totalorder %v5640_v2, 113 }
  0x25   : > { %s7357_s25 = smov 111   ;;  %s7347_s15 = smov 15   ;;  %v725_v34 = vrot.slane %v5085_v27, %v5728_v28  ;;  %v729_v37 = vrot.slane %v5085_v27, %v5731_v29  ;;  %v689_v56 = vrot.slane %v5084_v50, %v5728_v28  ;;  %v693_v57 = vrot.slane %v5084_v50, %v5731_v29 }
  0x26   : > { %s5647_s20 = scalar_lea.vmem %s7410_s0, %s5280_s26  ;;  %v569_v4 = vld [vmem:[%s7411_s4] sm:$0x3f]  ;;  %s7361_s26 = smov 127   ;;  %vm1021_vm11 = vcmp.lt.s32.totalorder %v5640_v2, 1  ;;  %vm1028_vm12 = vcmp.lt.s32.totalorder %v5640_v2, 127  ;;  %vm2810_vm13 = vcmp.lt.s32.totalorder %v5640_v2, 14 }
  0x27   : > { %v5653_v5 = vld [vmem:[%s5647_s20] sm:$0xff]  ;;  %572 = vperm.xlu0 %5416, %v569_v4   ;;  %s7351_s22 = smov 113   ;;  %s7416_s8 = sld [smem:[#allocation36_spill]]  ;;  %vm2817_vm14 = vcmp.lt.s32.totalorder %v5640_v2, 114  ;;  %vm2929_vm15 = vcmp.lt.s32.totalorder %v5640_v2, 2 }
  0x28   : > { %v5657_v6 = vcombine.high %v5653_v5, %v5653_v5  ;;  %v475_v7 = vld [vmem:[%s7412_s1] sm:$0xff]  ;;  %s7417_s5 = sld [smem:[#allocation34_spill]]  ;;  %s7418_s7 = sld [smem:[#allocation35_spill]] }
  0x29   : > { %v568_v8 = vld [vmem:[%s7413_s3] sm:$0x3f]  ;;  %s5497_s0 = smov 126   ;;  %s7426_s1 = smov 1  }
  0x2a   : > { %5078 = vmatprep.subr.msk.mxu0 %vm488_vm0, %v5657_v6  ;;  %s5499_s3 = smov 95   ;;  %s5501_s4 = smov 110  }
  0x2b   : > { %5079 = vmatpush1.msk.msra.mxu0 %vm488_vm0, %v5653_v5  ;;  %s5505_s19 = smov 98   ;;  %s5506_s24 = smov 32  }
  0x2c   : > { %5080 = vmatmul.mubr.msk.f32.vlgmr.msra.gmra.mrb[0].mxu0 %vm484_vm1, %v475_v7  ;;  %5081 = vmatprep.subr.msk.mxu0 %vm488_vm0, %v5657_v6  ;;  %s5507_s29 = smov 96  }
  0x2d   : > { %5082 = vmatpush1.msk.msra.mxu0 %vm488_vm0, %v5653_v5  ;;  %642 = vmatprep.mubr.f32.mxu0 %v7367_v1  ;;  %v1668_v23 = vld [vmem:[%s7416_s8] sm:$0xf]  ;;  %s5504_s8 = smov 30  }
  0x2e   : > { %v5086_v54 = vld [vmem:[%s7417_s5 + $0x8] sm:$0xff] }
  0x30   : > { %5083 = vmatmul.mubr.msk.f32.vlgmr.msra.gmra.mrb[2].mxu0 %vm484_vm1, %v568_v8 }
  0x31   : > { %811 = vmatprep.mubr.f32.mxu0 %v7367_v1 }
  0x95   : > { %v470_v9 = vpop.permute.xlu0 %469 }
  0x96   : > { %vm471_vm2 = vcmp.eq.s32.totalorder %v470_v9, 0 }
  0x97   : > { %v5077_v10 = vsel %vm471_vm2, 1.0, %v7367_v1  ;;  %vm2936_vm2 = vcmp.lt.s32.totalorder %v5640_v2, 126 }
  0x98   : > { %666 = vrot.lane.b32.xlu1 %v5077_v10, %s7361_s26  ;;  %v474_v11 = vsub.f32 1.0, %v5077_v10  ;;  %v5093_v10 = vld [vmem:[%s7344_s13 + $0x10] ss:$8 sm:$0x3] }
  0x9c   : > { %674 = vrot.lane.b32.xlu1 %v474_v11, %s7361_s26 }
  0xa6   : > { %v573_v14 = vpop.permute.xlu0 %572 }
  0xff   : > { %v5680_v12 = vpop.f32.mrb[0].mxu0 }
 0x100   : > { %7414 = vst [vmem:[#allocation10_spill] sm:$0xff] %v5680_v12  ;;  %v5682_v13 = vpop.f32.mrb[1].mxu0  ;;  %v5200_v12 = vld [vmem:[%s7340_s9 + $0x70] sm:$0xff] }
 0x101   : > { %7415 = vst [vmem:[#allocation11_spill] sm:$0xff] %v5682_v13 }
 0x103   : > { %v644_v15 = vpop.f32.mrb[2].mxu0 }
 0x104   : > { %v645_v16 = vadd.f32 %v644_v15, %v573_v14  ;;  %v646_v17 = vpop.f32.mrb[3].mxu0 }
 0x105   : > { %v647_v18 = vadd.f32 %v646_v17, %v573_v14 }
 0x106   : > { %v5684_v19 = vmax.f32 %v645_v16, 0.0  ;;  %v698_v16 = vld [vmem:[%s7417_s5] sm:$0xff] }
 0x107   : > { %v5686_v20 = vmax.f32 %v647_v18, 0.0  ;;  %v924_v18 = vrot.slane %v5093_v10, %v5728_v28 }
 0x108   : > { %699 = vrot.lane.b32.xlu1 %v5684_v19, %s7353_s28 }
 0x109   : > { %701 = vrot.lane.b32.xlu0 %v5686_v20, %s7353_s28  ;;  %s7422_s28 = smov 16  }
 0x10a   : > { %v667_v21 = vpop.permute.xlu1 %666 }
 0x10b   : > { %5346 = vpush %v667_v21  ;;  %v928_v21 = vrot.slane %v5093_v10, %v5731_v29 }
 0x10c   : > { %706 = vrot.lane.b32.xlu1 %v5684_v19, %s7349_s18 }
 0x10d   : > { %708 = vrot.lane.b32.xlu0 %v5686_v20, %s7349_s18  ;;  %s7423_s18 = smov 112  }
 0x10e   : > { %v675_v22 = vpop.permute.xlu1 %674 }
 0x10f   : > { %5348 = vpush %v675_v22 }
 0x110   : > { %651 = vrot.lane.b32.xlu1 %v5684_v19, %s7359_s21 }
 0x111   : > { %653 = vrot.lane.b32.xlu0 %v5686_v20, %s7359_s21 }
 0x114   : > { %658 = vrot.lane.b32.xlu1 %v5684_v19, %s7357_s25 }
 0x115   : > { %660 = vrot.lane.b32.xlu0 %v5686_v20, %s7357_s25 }
 0x118   : > { %898 = vrot.lane.b32.xlu1 %v5684_v19, %s7347_s15 }
 0x119   : > { %900 = vrot.lane.b32.xlu0 %v5686_v20, %s7347_s15  ;;  %s7425_s15 = smov 113  }
 0x11c   : > { %905 = vrot.lane.b32.xlu1 %v5684_v19, %s7351_s22 }
 0x11d   : > { %907 = vrot.lane.b32.xlu0 %v5686_v20, %s7351_s22 }
 0x120   : > { %1017 = vrot.lane.b32.xlu1 %v5684_v19, %s7355_s27 }
 0x121   : > { %1019 = vrot.lane.b32.xlu0 %v5686_v20, %s7355_s27  ;;  %s7421_s27 = smov 111  }
 0x124   : > { %1024 = vrot.lane.b32.xlu1 %v5684_v19, %s7361_s26 }
 0x125   : > { %1026 = vrot.lane.b32.xlu0 %v5686_v20, %s7361_s26  ;;  %s5496_s26 = smov 2  }
 0x128   : > { %1671 = vperm.xlu1 %5417, %v1668_v23  }
 0x13c   : > { %s5347_s22 = spop %5346 }
 0x13d   : > { %v5733_v30 = vstv %s5347_s22  ;;  %s5494_s22 = smov 14  }
 0x140   : > { %s5349_s25 = spop %5348 }
 0x141   : > { %v5744_v36 = vstv %s5349_s25  ;;  %s7424_s25 = smov 15  }
 0x17a   : > { %v700_v25 = vpop.permute.xlu1 %699 }
 0x17b   : > { %v702_v26 = vpop.permute.xlu0 %701 }
 0x17c   : > { %v5737_v31 = vsel %vm703_vm3, %v700_v25, %v702_v26  ;;  %v5741_v32 = vsel %vm703_vm3, %v702_v26, %v700_v25 }
 0x17d   : > { %v713_v40 = vmul.f32 %v5741_v32, %v5733_v30  ;;  %v714_v41 = vmul.f32 %v5737_v31, %v5733_v30 }
 0x17e   : > { %v707_v33 = vpop.permute.xlu1 %706 }
 0x17f   : > { %v709_v35 = vpop.permute.xlu0 %708 }
 0x180   : > { %v5749_v38 = vsel %vm710_vm4, %v707_v33, %v709_v35  ;;  %v5753_v39 = vsel %vm710_vm4, %v709_v35, %v707_v33 }
 0x181   : > { %v715_v42 = vmul.f32 %v5749_v38, %v5744_v36  ;;  %v716_v43 = vmul.f32 %v5753_v39, %v5744_v36 }
 0x182   : > { %v652_v44 = vpop.permute.xlu1 %651 }
 0x183   : > { %v717_v45 = vadd.f32 %v715_v42, %v713_v40  ;;  %v718_v46 = vadd.f32 %v716_v43, %v714_v41  ;;  %v654_v47 = vpop.permute.xlu0 %653  ;;  %v5098_v40 = vld [vmem:[%s7344_s13 + $0x13] ss:$8 sm:$0x3] }
 0x184   : > { %v5770_v51 = vsel %vm655_vm5, %v652_v44, %v654_v47  ;;  %v5774_v52 = vsel %vm655_vm5, %v654_v47, %v652_v44  ;;  %v1043_v47 = vrot.slane %v5098_v40, %v5728_v28  ;;  %v1047_v50 = vrot.slane %v5098_v40, %v5731_v29 }
 0x185   : > { %v732_v48 = vmul.f32 %v725_v34, %v717_v45  ;;  %v733_v49 = vmul.f32 %v729_v37, %v718_v46  ;;  %v671_v60 = vmul.f32 %v5733_v30, %v5774_v52  ;;  %v672_v61 = vmul.f32 %v5733_v30, %v5770_v51  ;;  %v5094_v46 = vld [vmem:[%s7417_s5 + $0x10] sm:$0xff] }
 0x186   : > { %v659_v53 = vpop.permute.xlu1 %658 }
 0x187   : > { %v661_v55 = vpop.permute.xlu0 %660  ;;  %5087 = vmatprep.subr.msk.mxu0 %vm740_vm6, %v733_v49 }
 0x188   : > { %v5784_v58 = vsel %vm662_vm7, %v659_v53, %v661_v55  ;;  %v5788_v59 = vsel %vm662_vm7, %v661_v55, %v659_v53  ;;  %5088 = vmatpush1.msk.msra.mxu0 %vm740_vm6, %v732_v48  ;;  %v5103_v55 = vld [vmem:[%s7344_s13 + $0x14] ss:$8 sm:$0x3] }
 0x189   : > { %v679_v62 = vmul.f32 %v5744_v36, %v5784_v58  ;;  %v680_v63 = vmul.f32 %v5744_v36, %v5788_v59  ;;  %5089 = vmatmul.mubr.msk.f32.vlgmr.msra.gmra.mrb[4].mxu0 %vm736_vm8, %v5086_v54 }
 0x18a   : > { %v899_v0 = vpop.permute.xlu1 %898  ;;  %891 = vmatprep.mubr.f32.mxu0 %v7367_v1 }
 0x18b   : > { %v681_v3 = vadd.f32 %v679_v62, %v671_v60  ;;  %v682_v4 = vadd.f32 %v680_v63, %v672_v61  ;;  %v901_v7 = vpop.permute.xlu0 %900  ;;  %v5108_v62 = vld [vmem:[%s7344_s13 + $0x15] ss:$8 sm:$0x3] }
 0x18c   : > { %v5808_v11 = vsel %vm902_vm9, %v899_v0, %v901_v7  ;;  %v5812_v14 = vsel %vm902_vm9, %v901_v7, %v899_v0  ;;  %v1142_v7 = vrot.slane %v5103_v55, %v5728_v28 }
 0x18d   : > { %v696_v8 = vmul.f32 %v689_v56, %v681_v3  ;;  %v697_v9 = vmul.f32 %v693_v57, %v682_v4  ;;  %v912_v24 = vmul.f32 %v5812_v14, %v5733_v30  ;;  %v913_v25 = vmul.f32 %v5808_v11, %v5733_v30 }
 0x18e   : > { %v906_v15 = vpop.permute.xlu1 %905  ;;  %v1146_v4 = vrot.slane %v5103_v55, %v5731_v29 }
 0x18f   : > { %v908_v17 = vpop.permute.xlu0 %907  ;;  %5090 = vmatprep.subr.msk.mxu0 %vm740_vm6, %v697_v9 }
 0x190   : > { %v5822_v22 = vsel %vm909_vm10, %v906_v15, %v908_v17  ;;  %v911_v23 = vsel %vm909_vm10, %v908_v17, %v906_v15  ;;  %5091 = vmatpush1.msk.msra.mxu0 %vm740_vm6, %v696_v8  ;;  %v1251_v8 = vrot.slane %v5108_v62, %v5731_v29  ;;  %v1150_v17 = vmul.f32 %v1146_v4, %v5686_v20 }
 0x191   : > { %v914_v26 = vmul.f32 %v5822_v22, %v5744_v36  ;;  %v915_v27 = vmul.f32 %v911_v23, %v5744_v36  ;;  %5092 = vmatmul.mubr.msk.f32.vlgmr.msra.gmra.mrb[4].mxu0 %vm736_vm8, %v698_v16  ;;  %v5099_v16 = vld [vmem:[%s7417_s5 + $0x18] sm:$0xff]  ;;  %v1247_v20 = vrot.slane %v5108_v62, %v5728_v28 }
 0x192   : > { %v1018_v33 = vpop.permute.xlu1 %1017  ;;  %1008 = vmatprep.mubr.f32.mxu0 %v7367_v1 }
 0x193   : > { %v916_v34 = vadd.f32 %v914_v26, %v912_v24  ;;  %v917_v35 = vadd.f32 %v915_v27, %v913_v25  ;;  %v1020_v37 = vpop.permute.xlu0 %1019  ;;  %v1341_v24 = vmul.f32 %v911_v23, %v5733_v30  ;;  %v5113_v26 = vld [vmem:[%s7344_s13 + $0x20] ss:$8 sm:$0x3] }
 0x194   : > { %v1023_v43 = vsel %vm1021_vm11, %v1020_v37, %v1018_v33  ;;  %v1022_v44 = vsel %vm1021_vm11, %v1018_v33, %v1020_v37  ;;  %v1356_v33 = vrot.slane %v5113_v26, %v5731_v29  ;;  %v1340_v37 = vmul.f32 %v5822_v22, %v5733_v30 }
 0x195   : > { %v931_v41 = vmul.f32 %v924_v18, %v916_v34  ;;  %v932_v42 = vmul.f32 %v928_v21, %v917_v35  ;;  %v1031_v49 = vmul.f32 %v1023_v43, %v5733_v30  ;;  %v1032_v56 = vmul.f32 %v1022_v44, %v5733_v30  ;;  %v5104_v35 = vld [vmem:[%s7417_s5 + $0x20] sm:$0xff] }
 0x196   : > { %v1025_v45 = vpop.permute.xlu1 %1024  ;;  %v1238_v63 = vmul.f32 %v1022_v44, %v5744_v36  ;;  %v1149_v21 = vmul.f32 %v1142_v7, %v5684_v19  ;;  %v1237_v27 = vmul.f32 %v1023_v43, %v5744_v36  ;;  %v1343_v19 = vmul.f32 %v5808_v11, %v5744_v36 }
 0x197   : > { %v1027_v48 = vpop.permute.xlu0 %1026  ;;  %5095 = vmatprep.subr.msk.mxu0 %vm740_vm6, %v932_v42  ;;  %v5118_v42 = vld [vmem:[%s7344_s13 + $0x21] ss:$8 sm:$0x3]  ;;  %v1342_v43 = vmul.f32 %v5812_v14, %v5744_v36  ;;  %v1448_v22 = vmul.f32 %v5737_v31, %v5744_v36  ;;  %v1445_v14 = vmul.f32 %v5749_v38, %v5733_v30  ;;  %v1551_v31 = vmul.f32 %v5733_v30, %v5788_v59 }
 0x198   : > { %v1029_v53 = vsel %vm1028_vm12, %v1025_v45, %v1027_v48  ;;  %v1030_v54 = vsel %vm1028_vm12, %v1027_v48, %v1025_v45  ;;  %5096 = vmatpush1.msk.msra.mxu0 %vm740_vm6, %v931_v41  ;;  %v1345_v34 = vadd.f32 %v1343_v19, %v1341_v24  ;;  %v1446_v41 = vmul.f32 %v5753_v39, %v5733_v30 }
 0x199   : > { %v1033_v57 = vmul.f32 %v1029_v53, %v5744_v36  ;;  %v1034_v60 = vmul.f32 %v1030_v54, %v5744_v36  ;;  %v1236_v61 = vmul.f32 %v1030_v54, %v5733_v30  ;;  %5097 = vmatmul.mubr.msk.f32.vlgmr.msra.gmra.mrb[4].mxu0 %vm736_vm8, %v5094_v46  ;;  %v1235_v18 = vmul.f32 %v1029_v53, %v5733_v30  ;;  %v5123_v53 = vld [vmem:[%s7344_s13 + $0x22] ss:$8 sm:$0x3] }
 0x19a   : > { %1127 = vmatprep.mubr.f32.mxu0 %v7367_v1  ;;  %v1360_v11 = vmul.f32 %v1356_v33, %v1345_v34  ;;  %v1352_v39 = vrot.slane %v5113_v26, %v5728_v28  ;;  %v1344_v44 = vadd.f32 %v1342_v43, %v1340_v37  ;;  %v1461_v45 = vrot.slane %v5118_v42, %v5731_v29  ;;  %v5159_v33 = vld [vmem:[%s7344_s13 + $0x6] ss:$8 sm:$0x3] }
 0x19b   : > { %v1035_v0 = vadd.f32 %v1033_v57, %v1031_v49  ;;  %v1036_v3 = vadd.f32 %v1034_v60, %v1032_v56  ;;  %v1240_v15 = vadd.f32 %v1238_v63, %v1236_v61  ;;  %v1239_v23 = vadd.f32 %v1237_v27, %v1235_v18 }
 0x19c   : > { %v1450_v46 = vadd.f32 %v1448_v22, %v1446_v41  ;;  %v1359_v48 = vmul.f32 %v1352_v39, %v1344_v44  ;;  %v1553_v38 = vmul.f32 %v5744_v36, %v5770_v51  ;;  %v1457_v59 = vrot.slane %v5118_v42, %v5728_v28 }
 0x19d   : > { %v1050_v9 = vmul.f32 %v1043_v47, %v1035_v0  ;;  %v1051_v10 = vmul.f32 %v1047_v50, %v1036_v3  ;;  %v1255_v25 = vmul.f32 %v1251_v8, %v1240_v15  ;;  %v1254_v40 = vmul.f32 %v1247_v20, %v1239_v23  ;;  %v5109_v47 = vld [vmem:[%s7417_s5 + $0x28] sm:$0xff]  ;;  %v5119_v0 = vld [vmem:[%s7417_s5 + $0x38] sm:$0xff]  ;;  %v1667_v3 = vld [vmem:[%s7418_s7] sm:$0xf]  ;;  %s5503_s7 = smov 94  }
 0x19e   : > { %v1465_v49 = vmul.f32 %v1461_v45, %v1450_v46  ;;  %v1447_v50 = vmul.f32 %v5741_v32, %v5744_v36  ;;  %v1566_v55 = vrot.slane %v5123_v53, %v5731_v29  ;;  %v1555_v56 = vadd.f32 %v1553_v38, %v1551_v31  ;;  %v5114_v32 = vld [vmem:[%s7417_s5 + $0x30] sm:$0xff] }
 0x19f   : > { %5100 = vmatprep.subr.msk.mxu0 %vm740_vm6, %v1051_v10  ;;  %v1550_v60 = vmul.f32 %v5733_v30, %v5784_v58  ;;  %v1552_v51 = vmul.f32 %v5744_v36, %v5774_v52  ;;  %v1562_v62 = vrot.slane %v5123_v53, %v5728_v28  ;;  %v5124_v52 = vld [vmem:[%s7417_s5 + $0x40] sm:$0xff]  ;;  %s5502_s5 = smov 34   ;;  %v2481_v39 = vrot.slane %v5159_v33, %v5728_v28 }
 0x1a0   : > { %5101 = vmatpush1.msk.msra.mxu0 %vm740_vm6, %v1050_v9  ;;  %v1449_v54 = vadd.f32 %v1447_v50, %v1445_v14  ;;  %v1570_v61 = vmul.f32 %v1566_v55, %v1555_v56  ;;  %v2485_v44 = vrot.slane %v5159_v33, %v5731_v29  ;;  %v476_v53 = vld [vmem:[%s7333_s2] sm:$0xff] }
 0x1a1   : > { %5102 = vmatmul.mubr.msk.f32.vlgmr.msra.gmra.mrb[4].mxu0 %vm736_vm8, %v5099_v16  ;;  %5105 = vmatprep.subr.msk.mxu0 %vm740_vm6, %v1150_v17  ;;  %v1554_v63 = vadd.f32 %v1552_v51, %v1550_v60 }
 0x1a2   : > { %5106 = vmatpush1.msk.msra.mxu0 %vm740_vm6, %v1149_v21  ;;  %1226 = vmatprep.mubr.f32.mxu0 %v7367_v1  ;;  %v1464_v57 = vmul.f32 %v1457_v59, %v1449_v54 }
 0x1a3   : > { %5110 = vmatprep.subr.msk.mxu0 %vm740_vm6, %v1255_v25  ;;  %v1569_v58 = vmul.f32 %v1562_v62, %v1554_v63 }
 0x1a7   : > { %v1672_v8 = vpop.permute.xlu1 %1671 }
 0x1a9   : > { %5107 = vmatmul.mubr.msk.f32.vlgmr.msra.gmra.mrb[4].mxu0 %vm736_vm8, %v5104_v35 }
 0x1aa   : > { %5111 = vmatpush1.msk.msra.mxu0 %vm740_vm6, %v1254_v40  ;;  %1331 = vmatprep.mubr.f32.mxu0 %v7367_v1 }
 0x1ab   : > { %5115 = vmatprep.subr.msk.mxu0 %vm740_vm6, %v1360_v11 }
 0x1b1   : > { %5112 = vmatmul.mubr.msk.f32.vlgmr.msra.gmra.mrb[4].mxu0 %vm736_vm8, %v5109_v47 }
 0x1b2   : > { %5116 = vmatpush1.msk.msra.mxu0 %vm740_vm6, %v1359_v48  ;;  %1436 = vmatprep.mubr.f32.mxu0 %v7367_v1  ;;  %v5164_v48 = vld [vmem:[%s7344_s13 + $0x7] ss:$8 sm:$0x3] }
 0x1b3   : > { %5120 = vmatprep.subr.msk.mxu0 %vm740_vm6, %v1465_v49  ;;  %v2597_v59 = vrot.slane %v5164_v48, %v5728_v28 }
 0x1b9   : > { %5117 = vmatmul.mubr.msk.f32.vlgmr.msra.gmra.mrb[4].mxu0 %vm736_vm8, %v5114_v32 }
 0x1ba   : > { %5121 = vmatpush1.msk.msra.mxu0 %vm740_vm6, %v1464_v57  ;;  %1541 = vmatprep.mubr.f32.mxu0 %v7367_v1 }
 0x1bb   : > { %5125 = vmatprep.subr.msk.mxu0 %vm740_vm6, %v1570_v61  ;;  %v5160_v61 = vld [vmem:[%s7340_s9 + $0x30] sm:$0xff] }
 0x1c1   : > { %5122 = vmatmul.mubr.msk.f32.vlgmr.msra.gmra.mrb[4].mxu0 %vm736_vm8, %v5119_v0 }
 0x1c2   : > { %5126 = vmatpush1.msk.msra.mxu0 %vm740_vm6, %v1569_v58  ;;  %1646 = vmatprep.mubr.f32.mxu0 %v7367_v1  ;;  %vm1789_vm6 = vcmp.lt.s32.totalorder %v5640_v2, 33 }
 0x1c3   : > { %5128 = vmatprep.subr.msk.mxu0 %vm488_vm0, %v5657_v6 }
 0x1c9   : > { %5127 = vmatmul.mubr.msk.f32.vlgmr.msra.gmra.mrb[4].mxu0 %vm736_vm8, %v5124_v52  ;;  %vm1796_vm8 = vcmp.lt.s32.totalorder %v5640_v2, 95 }
 0x1ca   : > { %5129 = vmatpush1.msk.msra.mxu0 %vm488_vm0, %v5653_v5  ;;  %1741 = vmatprep.mubr.f32.mxu0 %v7367_v1 }
 0x1cd   : > { %5130 = vmatmul.mubr.msk.f32.vlgmr.msra.gmra.mrb[6].mxu0 %vm484_vm1, %v1667_v3 }
 0x1ce   : > { %1895 = vmatprep.mubr.f32.mxu0 %v7367_v1 }
 0x29c   : > { %v5967_v4 = vpop.f32.mrb[4].mxu0 }
 0x29d   : > { %7419 = vst [vmem:[#allocation12_spill] sm:$0xff] %v5967_v4  ;;  %v5969_v7 = vpop.f32.mrb[5].mxu0 }
 0x29e   : > { %7420 = vst [vmem:[#allocation13_spill] sm:$0xff] %v5969_v7 }
 0x2a0   : > { %v1743_v9 = vpop.f32.mrb[6].mxu0 }
 0x2a1   : > { %v1744_v10 = vadd.f32 %v1743_v9, %v1672_v8  ;;  %v1745_v15 = vpop.f32.mrb[7].mxu0 }
 0x2a2   : > { %v1746_v16 = vadd.f32 %v1745_v15, %v1672_v8  ;;  %v4514_v8 = vld [vmem:[%s7341_s10] sm:$0xff] }
 0x2a3   : > { %v5971_v17 = vmax.f32 %v1744_v10, 0.0 }
 0x2a4   : > { %v5973_v18 = vmax.f32 %v1746_v16, 0.0 }
 0x2a5   : > { %2458 = vrot.lane.b32.xlu0 %v5971_v17, %s7359_s21 }
 0x2a6   : > { %2460 = vrot.lane.b32.xlu1 %v5973_v18, %s7359_s21  ;;  %s5495_s21 = smov 114  }
 0x2a9   : > { %2464 = vrot.lane.b32.xlu0 %v5971_v17, %s7421_s27 }
 0x2aa   : > { %2466 = vrot.lane.b32.xlu1 %v5973_v18, %s7421_s27 }
 0x2ad   : > { %2574 = vrot.lane.b32.xlu0 %v5971_v17, %s7422_s28 }
 0x2ae   : > { %2576 = vrot.lane.b32.xlu1 %v5973_v18, %s7422_s28 }
 0x2b1   : > { %2580 = vrot.lane.b32.xlu0 %v5971_v17, %s7423_s18 }
 0x2b2   : > { %2582 = vrot.lane.b32.xlu1 %v5973_v18, %s7423_s18 }
 0x2b5   : > { %2690 = vrot.lane.b32.xlu0 %v5971_v17, %s7424_s25 }
 0x2b6   : > { %2692 = vrot.lane.b32.xlu1 %v5973_v18, %s7424_s25 }
 0x2b9   : > { %2696 = vrot.lane.b32.xlu0 %v5971_v17, %s7425_s15 }
 0x2ba   : > { %2698 = vrot.lane.b32.xlu1 %v5973_v18, %s7425_s15 }
 0x2bd   : > { %2806 = vrot.lane.b32.xlu0 %v5971_v17, %s5494_s22 }
 0x2be   : > { %2808 = vrot.lane.b32.xlu1 %v5973_v18, %s5494_s22  ;;  %s7427_s22 = smov 127  }
 0x2c1   : > { %2813 = vrot.lane.b32.xlu0 %v5971_v17, %s5495_s21 }
 0x2c2   : > { %2815 = vrot.lane.b32.xlu1 %v5973_v18, %s5495_s21  ;;  %s5498_s21 = smov 33  }
 0x2c5   : > { %2925 = vrot.lane.b32.xlu0 %v5971_v17, %s5496_s26 }
 0x2c6   : > { %2927 = vrot.lane.b32.xlu1 %v5973_v18, %s5496_s26  ;;  %s7428_s26 = smov 17  }
 0x2c9   : > { %2932 = vrot.lane.b32.xlu0 %v5971_v17, %s5497_s0 }
 0x2ca   : > { %2934 = vrot.lane.b32.xlu1 %v5973_v18, %s5497_s0  ;;  %s5500_s0 = smov 18  }
 0x2cd   : > { %3044 = vrot.lane.b32.xlu0 %v5971_v17, %s7426_s1 }
 0x2ce   : > { %3046 = vrot.lane.b32.xlu1 %v5973_v18, %s7426_s1 }
 0x2d1   : > { %3050 = vrot.lane.b32.xlu0 %v5971_v17, %s7427_s22 }
 0x2d2   : > { %3052 = vrot.lane.b32.xlu1 %v5973_v18, %s7427_s22 }
 0x2d5   : > { %1785 = vrot.lane.b32.xlu0 %v5971_v17, %s5498_s21 }
 0x2d6   : > { %4530 = vrot.lane.b32.xlu1 %v5657_v6, %s7428_s26 }
 0x2d9   : > { %1792 = vrot.lane.b32.xlu0 %v5971_v17, %s5499_s3 }
 0x2da   : > { %4536 = vrot.lane.b32.xlu1 %v5657_v6, %s7421_s27 }
 0x2dd   : > { %2339 = vrot.lane.b32.xlu0 %v5971_v17, %s5500_s0 }
 0x2de   : > { %4579 = vrot.lane.b32.xlu1 %v5657_v6, %s7422_s28 }
 0x2e1   : > { %2346 = vrot.lane.b32.xlu0 %v5971_v17, %s5501_s4 }
 0x2e2   : > { %4585 = vrot.lane.b32.xlu1 %v5657_v6, %s7423_s18 }
 0x2e5   : > { %1750 = vrot.lane.b32.xlu0 %v5971_v17, %s5502_s5 }
 0x2e6   : > { %4628 = vrot.lane.b32.xlu1 %v5657_v6, %s7424_s25 }
 0x2e9   : > { %1757 = vrot.lane.b32.xlu0 %v5971_v17, %s5503_s7 }
 0x2ea   : > { %1787 = vrot.lane.b32.xlu1 %v5973_v18, %s5498_s21  ;;  %s5508_s21 = smov 31  }
 0x2ed   : > { %2220 = vrot.lane.b32.xlu0 %v5971_v17, %s5504_s8 }
 0x2ee   : > { %1794 = vrot.lane.b32.xlu1 %v5973_v18, %s5499_s3  ;;  %s5509_s3 = smov 97  }
 0x2f1   : > { %2227 = vrot.lane.b32.xlu0 %v5971_v17, %s5505_s19 }
 0x2f2   : > { %2341 = vrot.lane.b32.xlu1 %v5973_v18, %s5500_s0 }
 0x2f5   : > { %1982 = vrot.lane.b32.xlu0 %v5971_v17, %s5506_s24 }
 0x2f6   : > { %2348 = vrot.lane.b32.xlu1 %v5973_v18, %s5501_s4 }
 0x2f9   : > { %1989 = vrot.lane.b32.xlu0 %v5971_v17, %s5507_s29 }
 0x2fa   : > { %1752 = vrot.lane.b32.xlu1 %v5973_v18, %s5502_s5 }
 0x2fd   : > { %2101 = vrot.lane.b32.xlu0 %v5971_v17, %s5508_s21 }
 0x2fe   : > { %1759 = vrot.lane.b32.xlu1 %v5973_v18, %s5503_s7 }
 0x301   : > { %2108 = vrot.lane.b32.xlu0 %v5971_v17, %s5509_s3 }
 0x302   : > { %2222 = vrot.lane.b32.xlu1 %v5973_v18, %s5504_s8 }
 0x305   : > { %4528 = vrot.lane.b32.xlu0 %v5653_v5, %s7428_s26  ;;  %s458_s26 = sand.u32 1, %s5474_s30  }
 0x306   : > { %2229 = vrot.lane.b32.xlu1 %v5973_v18, %s5505_s19 }
 0x309   : > { %4534 = vrot.lane.b32.xlu0 %v5653_v5, %s7421_s27 }
 0x30a   : > { %1984 = vrot.lane.b32.xlu1 %v5973_v18, %s5506_s24 }
 0x30d   : > { %4577 = vrot.lane.b32.xlu0 %v5653_v5, %s7422_s28 }
 0x30e   : > { %1991 = vrot.lane.b32.xlu1 %v5973_v18, %s5507_s29 }
 0x311   : > { %4583 = vrot.lane.b32.xlu0 %v5653_v5, %s7423_s18 }
 0x312   : > { %2103 = vrot.lane.b32.xlu1 %v5973_v18, %s5508_s21  ;;  %s7174_s21 = sshll.u32 %s458_s26, 6 }
 0x313   : > { %s7218_s5 = scalar_lea.vmem [#allocation2], %s7174_s21  ;;  %s7289_s21 = scalar_lea.sflag [#allocation3], %s458_s26 }
 0x315   : > { %4626 = vrot.lane.b32.xlu0 %v5653_v5, %s7424_s25  ;;  %s5281_s25 = sshll.u32 %s5608_s17, 10 }
 0x316   : > { %2110 = vrot.lane.b32.xlu1 %v5973_v18, %s5509_s3  ;;  %s5510_s3 = smov [#allocation2]  }
 0x317   : > { %v2459_v21 = vpop.permute.xlu0 %2458  ;;  %s5424_s4 = sshll.u32 %s5510_s3, 4  ;;  %s5425_s4 = int_to_ptr.vmem [resolvable:$false] %s5424_s4 }
 0x318   : > { %v2461_v24 = vpop.permute.xlu1 %2460  ;;  %s5426_s7 = scalar_lea.vmem %s5425_s4, 2048 }
 0x319   : > { %v2462_v25 = vsel %vm655_vm5, %v2459_v21, %v2461_v24  ;;  %v2463_v26 = vsel %vm655_vm5, %v2461_v24, %v2459_v21  ;;  %4632 = vrot.lane.b32.xlu0 %v5653_v5, %s7425_s15 }
 0x31a   : > { %4634 = vrot.lane.b32.xlu1 %v5657_v6, %s7425_s15  ;;  %v2470_v19 = vmul.f32 %v2463_v26, %v5733_v30  ;;  %v2471_v20 = vmul.f32 %v2462_v25, %v5733_v30  ;;  %v3782_v34 = vmul.f32 %v2463_v26, %v5744_v36  ;;  %v3783_v35 = vmul.f32 %v2462_v25, %v5744_v36  ;;  %v4904_v25 = vld [vmem:[%s7343_s12] sm:$0xff]  ;;  %s5008_s15 = sshll.u32 %s7218_s5, 4  ;;  %s7283_s15 = int_to_ptr.vmem [resolvable:$true] %s5008_s15 }
 0x31b   : > { %v2465_v27 = vpop.permute.xlu0 %2464  ;;  %s5420_s17 = scalar_lea.vmem %s7283_s15, 1024  ;;  %p5427_p0 = scmp.lt.s32.totalorder %s7283_s15, %s5425_s4 }
 0x31c   : > { %v2467_v23 = vpop.permute.xlu1 %2466  ;;  %p5421_p11 = scmp.ne.s32.totalorder %s7283_s15, %s5420_s17  ;;  %p5428_p1 = scmp.lt.s32.totalorder %s5426_s7, %s5420_s17 }
 0x31d   : > { %v2468_v37 = vsel %vm662_vm7, %v2465_v27, %v2467_v23  ;;  %v2469_v40 = vsel %vm662_vm7, %v2467_v23, %v2465_v27  ;;  %4675 = vrot.lane.b32.xlu0 %v5653_v5, %s7426_s1 }
 0x31e   : > { %v2472_v41 = vmul.f32 %v2468_v37, %v5744_v36  ;;  %v2473_v11 = vmul.f32 %v2469_v40, %v5744_v36  ;;  %v3780_v42 = vmul.f32 %v2468_v37, %v5733_v30  ;;  %v3781_v43 = vmul.f32 %v2469_v40, %v5733_v30  ;;  %4677 = vrot.lane.b32.xlu1 %v5657_v6, %s7426_s1  ;;  %p5422_p12 = pnand %p5421_p11, %p5625_p5  ;;  %p5429_p2 = por %p5428_p1, %p5427_p0 }
 0x31f   : > { %v2575_v22 = vpop.permute.xlu0 %2574 }
 0x320   : > { %v2474_v45 = vadd.f32 %v2472_v41, %v2470_v19  ;;  %v6088_v46 = vadd.f32 %v3782_v34, %v3780_v42  ;;  %v6090_v47 = vadd.f32 %v3783_v35, %v3781_v43  ;;  %v2577_v14 = vpop.permute.xlu1 %2576  ;;  %v2475_v49 = vadd.f32 %v2473_v11, %v2471_v20  ;;  %v5169_v19 = vld [vmem:[%s7344_s13 + $0x10] ss:$8 sm:$0x3]  ;;  %p5423_p13 = pneg %p5422_p12 }
 0x321   : > { %v2578_v31 = vsel %vm703_vm3, %v2575_v22, %v2577_v14  ;;  %v2579_v50 = vsel %vm703_vm3, %v2577_v14, %v2575_v22  ;;  %4681 = vrot.lane.b32.xlu0 %v5653_v5, %s7427_s22  ;;  %v2601_v5 = vrot.slane %v5164_v48, %v5731_v29  ;;  %v5165_v35 = vld [vmem:[%s7340_s9 + $0x38] sm:$0xff]  ;;  %v2713_v37 = vrot.slane %v5169_v19, %v5728_v28 }
 0x322   : > { %4683 = vrot.lane.b32.xlu1 %v5657_v6, %s7427_s22  ;;  %v2489_v54 = vmul.f32 %v2485_v44, %v2475_v49  ;;  %v2488_v55 = vmul.f32 %v2481_v39, %v2474_v45  ;;  %v2586_v56 = vmul.f32 %v2579_v50, %v5733_v30  ;;  %v2587_v32 = vmul.f32 %v2578_v31, %v5733_v30  ;;  %v1655_v6 = vld [vmem:[%s7337_s6] sm:$0xff]  ;;  %p5430_p3 = pnand %p5429_p2, %p5423_p13 }
 0x323   : > { %v2581_v38 = vpop.permute.xlu0 %2580  ;;  %v3678_v57 = vmul.f32 %v2579_v50, %v5744_v36  ;;  %v3679_v51 = vmul.f32 %v2578_v31, %v5744_v36  ;;  %v2717_v40 = vrot.slane %v5169_v19, %v5731_v29  ;;  %v5174_v50 = vld [vmem:[%s7344_s13 + $0x11] ss:$8 sm:$0x3] }
 0x324   : > { %v2583_v60 = vpop.permute.xlu1 %2582  ;;  %5161 = vmatprep.subr.msk.mxu1 %vm488_vm0, %v2489_v54 }
 0x325   : > { %v2584_v62 = vsel %vm710_vm4, %v2581_v38, %v2583_v60  ;;  %v2585_v63 = vsel %vm710_vm4, %v2583_v60, %v2581_v38  ;;  %479 = vperm.xlu0 %5416, %v476_v53   ;;  %5162 = vmatpush1.msk.msra.mxu1 %vm488_vm0, %v2488_v55  ;;  %v5170_v55 = vld [vmem:[%s7340_s9 + $0x40] sm:$0xff] }
 0x326   : > { %v2588_v0 = vmul.f32 %v2584_v62, %v5744_v36  ;;  %v2589_v58 = vmul.f32 %v2585_v63, %v5744_v36  ;;  %v3676_v52 = vmul.f32 %v2584_v62, %v5733_v30  ;;  %v3677_v3 = vmul.f32 %v2585_v63, %v5733_v30  ;;  %1658 = vperm.xlu1 %5417, %v1655_v6  }
 0x327   : > { %5163 = vmatmul.mubr.msk.f32.vlgmr.msra.gmra.mrb[0].mxu1 %vm484_vm1, %v5160_v61  ;;  %v2691_v9 = vpop.permute.xlu0 %2690 }
 0x328   : > { %v2590_v10 = vadd.f32 %v2588_v0, %v2586_v56  ;;  %v2591_v15 = vadd.f32 %v2589_v58, %v2587_v32  ;;  %v6132_v16 = vadd.f32 %v3678_v57, %v3676_v52  ;;  %v6134_v21 = vadd.f32 %v3679_v51, %v3677_v3  ;;  %v2693_v24 = vpop.permute.xlu1 %2692  ;;  %2681 = vmatprep.mubr.f32.mxu1 %v7367_v1 }
 0x329   : > { %4517 = vperm.xlu0 %5416, %v4514_v8   ;;  %v6145_v20 = vsel %vm902_vm9, %v2691_v9, %v2693_v24  ;;  %v6149_v23 = vsel %vm902_vm9, %v2693_v24, %v2691_v9  ;;  %v2832_v56 = vrot.slane %v5174_v50, %v5728_v28  ;;  %v2836_v32 = vrot.slane %v5174_v50, %v5731_v29  ;;  %v5179_v8 = vld [vmem:[%s7344_s13 + $0x12] ss:$8 sm:$0x3] }
 0x32a   : > { %v2604_v26 = vmul.f32 %v2597_v59, %v2590_v10  ;;  %v2605_v27 = vmul.f32 %v2601_v5, %v2591_v15  ;;  %4907 = vperm.xlu1 %5417, %v4904_v25   ;;  %v2702_v42 = vmul.f32 %v6149_v23, %v5733_v30  ;;  %v2703_v43 = vmul.f32 %v6145_v20, %v5733_v30  ;;  %v5175_v25 = vld [vmem:[%s7340_s9 + $0x48] sm:$0xff] }
 0x32b   : > { %v2697_v33 = vpop.permute.xlu0 %2696 }
 0x32c   : > { %v2699_v34 = vpop.permute.xlu1 %2698  ;;  %5166 = vmatprep.subr.msk.mxu1 %vm488_vm0, %v2605_v27  ;;  %v2955_v27 = vrot.slane %v5179_v8, %v5731_v29 }
 0x32d   : > { %v6159_v41 = vsel %vm909_vm10, %v2697_v33, %v2699_v34  ;;  %v6163_v11 = vsel %vm909_vm10, %v2699_v34, %v2697_v33  ;;  %5167 = vmatpush1.msk.msra.mxu1 %vm488_vm0, %v2604_v26  ;;  %v2951_v26 = vrot.slane %v5179_v8, %v5728_v28 }
 0x32e   : > { %v2704_v22 = vmul.f32 %v6159_v41, %v5744_v36  ;;  %v2705_v39 = vmul.f32 %v6163_v11, %v5744_v36 }
 0x32f   : > { %5168 = vmatmul.mubr.msk.f32.vlgmr.msra.gmra.mrb[0].mxu1 %vm484_vm1, %v5165_v35  ;;  %v2807_v44 = vpop.permute.xlu0 %2806 }
 0x330   : > { %v2706_v45 = vadd.f32 %v2704_v22, %v2702_v42  ;;  %v2707_v14 = vadd.f32 %v2705_v39, %v2703_v43  ;;  %v2809_v48 = vpop.permute.xlu1 %2808  ;;  %2797 = vmatprep.mubr.f32.mxu1 %v7367_v1 }
 0x331   : > { %v6181_v53 = vsel %vm2810_vm13, %v2807_v44, %v2809_v48  ;;  %v6183_v38 = vsel %vm2810_vm13, %v2809_v48, %v2807_v44  ;;  %vm1754_vm13 = vcmp.lt.s32.totalorder %v5640_v2, 34 }
 0x332   : > { %v2720_v49 = vmul.f32 %v2713_v37, %v2706_v45  ;;  %v2721_v31 = vmul.f32 %v2717_v40, %v2707_v14  ;;  %v2820_v60 = vmul.f32 %v6183_v38, %v5733_v30  ;;  %v2821_v6 = vmul.f32 %v6181_v53, %v5733_v30  ;;  %v5184_v14 = vld [vmem:[%s7344_s13 + $0x13] ss:$8 sm:$0x3] }
 0x333   : > { %v2814_v59 = vpop.permute.xlu0 %2813 }
 0x334   : > { %v2816_v54 = vpop.permute.xlu1 %2815  ;;  %5171 = vmatprep.subr.msk.mxu1 %vm488_vm0, %v2721_v31 }
 0x335   : > { %v6191_v57 = vsel %vm2817_vm14, %v2814_v59, %v2816_v54  ;;  %v6193_v5 = vsel %vm2817_vm14, %v2816_v54, %v2814_v59  ;;  %5172 = vmatpush1.msk.msra.mxu1 %vm488_vm0, %v2720_v49  ;;  %v5180_v59 = vld [vmem:[%s7340_s9 + $0x50] sm:$0xff]  ;;  %v3067_v54 = vrot.slane %v5184_v14, %v5728_v28  ;;  %vm2350_vm14 = vcmp.lt.s32.totalorder %v5640_v2, 110 }
 0x336   : > { %v2822_v61 = vmul.f32 %v6191_v57, %v5744_v36  ;;  %v2823_v51 = vmul.f32 %v6193_v5, %v5744_v36 }
 0x337   : > { %5173 = vmatmul.mubr.msk.f32.vlgmr.msra.gmra.mrb[0].mxu1 %vm484_vm1, %v5170_v55  ;;  %v2926_v62 = vpop.permute.xlu0 %2925  ;;  %v3071_v55 = vrot.slane %v5184_v14, %v5731_v29  ;;  %v6306_v14 = vld [vmem:[%s7344_s13 + $0x17] ss:$8 sm:$0x3] }
 0x338   : > { %v2824_v63 = vadd.f32 %v2822_v61, %v2820_v60  ;;  %v2825_v0 = vadd.f32 %v2823_v51, %v2821_v6  ;;  %v2928_v58 = vpop.permute.xlu1 %2927  ;;  %2916 = vmatprep.mubr.f32.mxu1 %v7367_v1  ;;  %v5189_v60 = vld [vmem:[%s7344_s13 + $0x14] ss:$8 sm:$0x3] }
 0x339   : > { %v6211_v9 = vsel %vm2929_vm15, %v2926_v62, %v2928_v58  ;;  %v6213_v10 = vsel %vm2929_vm15, %v2928_v58, %v2926_v62  ;;  %v6265_v58 = vld [vmem:[%s7344_s13 + $0x15] ss:$8 sm:$0x3]  ;;  %vm2343_vm15 = vcmp.lt.s32.totalorder %v5640_v2, 18 }
 0x33a   : > { %v2839_v52 = vmul.f32 %v2832_v56, %v2824_v63  ;;  %v2840_v3 = vmul.f32 %v2836_v32, %v2825_v0  ;;  %v2939_v34 = vmul.f32 %v6213_v10, %v5733_v30  ;;  %v2940_v35 = vmul.f32 %v6211_v9, %v5733_v30 }
 0x33b   : > { %v2933_v15 = vpop.permute.xlu0 %2932 }
 0x33c   : > { %v2935_v24 = vpop.permute.xlu1 %2934  ;;  %5176 = vmatprep.subr.msk.mxu1 %vm488_vm0, %v2840_v3 }
 0x33d   : > { %v6221_v19 = vsel %vm2936_vm2, %v2933_v15, %v2935_v24  ;;  %v2938_v33 = vsel %vm2936_vm2, %v2935_v24, %v2933_v15  ;;  %5177 = vmatpush1.msk.msra.mxu1 %vm488_vm0, %v2839_v52  ;;  %v3169_v15 = vrot.slane %v5189_v60, %v5731_v29  ;;  %vm1761_vm2 = vcmp.lt.s32.totalorder %v5640_v2, 94 }
 0x33e   : > { %v2941_v37 = vmul.f32 %v6221_v19, %v5744_v36  ;;  %v2942_v40 = vmul.f32 %v2938_v33, %v5744_v36 }
 0x33f   : > { %5178 = vmatmul.mubr.msk.f32.vlgmr.msra.gmra.mrb[0].mxu1 %vm484_vm1, %v5175_v25  ;;  %v3045_v42 = vpop.permute.xlu0 %3044 }
 0x340   : > { %v2943_v43 = vadd.f32 %v2941_v37, %v2939_v34  ;;  %v2944_v22 = vadd.f32 %v2942_v40, %v2940_v35  ;;  %v3047_v39 = vpop.permute.xlu1 %3046  ;;  %3035 = vmatprep.mubr.f32.mxu1 %v7367_v1  ;;  %v3273_v34 = vrot.slane %v6265_v58, %v5731_v29 }
 0x341   : > { %v3048_v48 = vsel %vm1021_vm11, %v3045_v42, %v3047_v39  ;;  %v3049_v49 = vsel %vm1021_vm11, %v3047_v39, %v3045_v42  ;;  %v5185_v42 = vld [vmem:[%s7340_s9 + $0x58] sm:$0xff]  ;;  %v6293_v39 = vld [vmem:[%s7344_s13 + $0x21] ss:$8 sm:$0x3] }
 0x342   : > { %v2958_v44 = vmul.f32 %v2951_v26, %v2943_v43  ;;  %v2959_v45 = vmul.f32 %v2955_v27, %v2944_v22  ;;  %v3056_v6 = vmul.f32 %v3049_v49, %v5733_v30  ;;  %v3057_v61 = vmul.f32 %v3048_v48, %v5733_v30  ;;  %v6287_v22 = vld [vmem:[%s7344_s13 + $0x22] ss:$8 sm:$0x3] }
 0x343   : > { %v3051_v31 = vpop.permute.xlu0 %3050  ;;  %v3261_v24 = vmul.f32 %v3048_v48, %v5744_v36  ;;  %v3165_v27 = vrot.slane %v5189_v60, %v5728_v28  ;;  %v3173_v43 = vmul.f32 %v3169_v15, %v5973_v18  ;;  %v3363_v48 = vmul.f32 %v2938_v33, %v5733_v30  ;;  %v6364_v15 = vld [vmem:[%s7344_s13 + $0x5] ss:$8 sm:$0x3] }
 0x344   : > { %v3053_v50 = vpop.permute.xlu1 %3052  ;;  %5181 = vmatprep.subr.msk.mxu1 %vm488_vm0, %v2959_v45 }
 0x345   : > { %v3054_v56 = vsel %vm1028_vm12, %v3051_v31, %v3053_v50  ;;  %v3055_v32 = vsel %vm1028_vm12, %v3053_v50, %v3051_v31  ;;  %5182 = vmatpush1.msk.msra.mxu1 %vm488_vm0, %v2958_v44  ;;  %v6298_v44 = vld [vmem:[%s7344_s13 + $0x20] ss:$8 sm:$0x3]  ;;  %v3172_v18 = vmul.f32 %v3165_v27, %v5971_v17  ;;  %v6319_v17 = vld [vmem:[%s7344_s13 + $0x16] ss:$8 sm:$0x3] }
 0x346   : > { %v3058_v51 = vmul.f32 %v3054_v56, %v5744_v36  ;;  %v3059_v62 = vmul.f32 %v3055_v32, %v5744_v36  ;;  %v3259_v63 = vmul.f32 %v3055_v32, %v5733_v30  ;;  %v3258_v45 = vmul.f32 %v3054_v56, %v5733_v30  ;;  %v6329_v56 = vld [vmem:[%s7344_s13 + $0x1] ss:$8 sm:$0x3]  ;;  %v6417_v32 = vld [vmem:[%s7344_s13 + $0x4] ss:$8 sm:$0x3] }
 0x347   : > { %5183 = vmatmul.mubr.msk.f32.vlgmr.msra.gmra.mrb[0].mxu1 %vm484_vm1, %v5180_v59  ;;  %v6260_v0 = vpop.permute.xlu0 %1785  ;;  %v5195_v59 = vld [vmem:[%s7340_s9 + $0x68] sm:$0xff] }
 0x348   : > { %v3060_v52 = vadd.f32 %v3058_v51, %v3056_v6  ;;  %v3061_v3 = vadd.f32 %v3059_v62, %v3057_v61  ;;  %v6267_v8 = vpop.permute.xlu1 %4530  ;;  %3151 = vmatprep.mubr.f32.mxu1 %v7367_v1  ;;  %v3263_v35 = vadd.f32 %v3261_v24, %v3259_v63  ;;  %v3365_v6 = vmul.f32 %v6211_v9, %v5744_v36  ;;  %v6343_v61 = vld [vmem:[%s7344_s13 + $0x6] ss:$8 sm:$0x3]  ;;  %v6348_v51 = vld [vmem:[%s7344_s13 + $0x22] ss:$8 sm:$0x3] }
 0x349   : > { %7429 = vst [vmem:[#allocation14_spill] sm:$0xff] %v6348_v51  ;;  %v3269_v9 = vrot.slane %v6265_v58, %v5728_v28  ;;  %v3483_v24 = vrot.slane %v6306_v14, %v5731_v29  ;;  %v3378_v58 = vrot.slane %v6319_v17, %v5731_v29  ;;  %v3364_v62 = vmul.f32 %v6213_v10, %v5744_v36  ;;  %v6468_v10 = vld [vmem:[%s7344_s13 + $0x26] ss:$8 sm:$0x3] }
 0x34a   : > { %v3074_v25 = vmul.f32 %v3067_v54, %v3060_v52  ;;  %v3075_v26 = vmul.f32 %v3071_v55, %v3061_v3  ;;  %v3277_v31 = vmul.f32 %v3273_v34, %v3263_v35  ;;  %v3260_v55 = vmul.f32 %v3049_v49, %v5744_v36  ;;  %v6359_v3 = vld [vmem:[%s7344_s13 + $0x27] ss:$8 sm:$0x3]  ;;  %v6380_v35 = vld [vmem:[%s7344_s13 + $0x23] ss:$8 sm:$0x3] }
 0x34b   : > { %v6275_v37 = vpop.permute.xlu0 %1792  ;;  %7430 = vst [vmem:[#allocation15_spill] sm:$0xff] %v6359_v3  ;;  %v5190_v34 = vld [vmem:[%s7340_s9 + $0x60] sm:$0xff]  ;;  %v3362_v54 = vmul.f32 %v6221_v19, %v5733_v30  ;;  %v3468_v19 = vmul.f32 %v6193_v5, %v5733_v30  ;;  %7433 = vst [vmem:[#allocation18_spill] sm:$0xff] %v6468_v10 }
 0x34c   : > { %v6277_v40 = vpop.permute.xlu1 %4536  ;;  %5186 = vmatprep.subr.msk.mxu1 %vm488_vm0, %v3075_v26  ;;  %v3262_v52 = vadd.f32 %v3260_v55, %v3258_v45  ;;  %v3367_v26 = vadd.f32 %v3365_v6, %v3363_v48  ;;  %v6390_v45 = vld [vmem:[%s7344_s13] ss:$8 sm:$0x3]  ;;  %v5271_v48 = vadd.f32 -1.0, %v6348_v51  ;;  %v3470_v6 = vmul.f32 %v6181_v53, %v5744_v36 }
 0x34d   : > { %5187 = vmatpush1.msk.msra.mxu1 %vm488_vm0, %v3074_v25  ;;  %v3374_v25 = vrot.slane %v6319_v17, %v5728_v28  ;;  %v6412_v55 = vld [vmem:[%s7344_s13 + $0x30] ss:$8 sm:$0x3]  ;;  %v6431_v49 = vld [vmem:[%s7344_s13 + $0x24] ss:$8 sm:$0x3]  ;;  %v3467_v53 = vmul.f32 %v6191_v57, %v5733_v30 }
 0x34e   : > { %5191 = vmatprep.subr.msk.mxu1 %vm488_vm0, %v3173_v43  ;;  %v3276_v60 = vmul.f32 %v3269_v9, %v3262_v52  ;;  %7431 = vst [vmem:[#allocation16_spill] sm:$0xff] %v6412_v55  ;;  %v3382_v9 = vmul.f32 %v3378_v58, %v3367_v26  ;;  %v3575_v43 = vmul.f32 %v6145_v20, %v5744_v36  ;;  %v6561_v55 = vld [vmem:[%s7344_s13 + $0x20] ss:$8 sm:$0x3] }
 0x34f   : > { %5188 = vmatmul.mubr.msk.f32.vlgmr.msra.gmra.mrb[0].mxu1 %vm484_vm1, %v5185_v42  ;;  %v6310_v50 = vpop.permute.xlu0 %2339  ;;  %7437 = vst [vmem:[#allocation21_spill] sm:$0xff] %v6561_v55 }
 0x350   : > { %5192 = vmatpush1.msk.msra.mxu1 %vm488_vm0, %v3172_v18  ;;  %v6323_v33 = vpop.permute.xlu1 %4579  ;;  %3249 = vmatprep.mubr.f32.mxu1 %v7367_v1  ;;  %v5255_v18 = vadd.f32 -1.0, %v6343_v61 }
 0x351   : > { %5196 = vmatprep.subr.msk.mxu1 %vm488_vm0, %v3277_v31  ;;  %v3366_v31 = vadd.f32 %v3364_v62, %v3362_v54  ;;  %v3472_v54 = vadd.f32 %v3470_v6, %v3468_v19  ;;  %v3573_v19 = vmul.f32 %v6163_v11, %v5733_v30  ;;  %v7435_v11 = vmov 0.0  }
 0x352   : > { %v6441_v26 = vmul.f32 1e+30, %v5255_v18  ;;  %v6492_v18 = vld [vmem:[%s7344_s13 + $0x7] ss:$8 sm:$0x3] }
 0x353   : > { %v6372_v27 = vpop.permute.xlu0 %2346  ;;  %v3381_v63 = vmul.f32 %v3374_v25, %v3366_v31  ;;  %v5257_v25 = vadd.f32 -1.0, %v6492_v18 }
 0x354   : > { %v6382_v42 = vpop.permute.xlu1 %4585 }
 0x355   : > { %v6567_v7 = vmul.f32 1e+30, %v5257_v25 }
 0x357   : > { %5193 = vmatmul.mubr.msk.f32.vlgmr.msra.gmra.mrb[0].mxu1 %vm484_vm1, %v5190_v34  ;;  %v6422_v52 = vpop.permute.xlu0 %1750  ;;  %v6443_v34 = vmul.f32 1e+30, %v5271_v48  ;;  %v6497_v48 = vld [vmem:[%s7344_s13 + $0x21] ss:$8 sm:$0x3] }
 0x358   : > { %5197 = vmatpush1.msk.msra.mxu1 %vm488_vm0, %v3276_v60  ;;  %v6436_v5 = vpop.permute.xlu1 %4628  ;;  %3353 = vmatprep.mubr.f32.mxu1 %v7367_v1  ;;  %7434 = vst [vmem:[#allocation19_spill] sm:$0xff] %v6497_v48  ;;  %v3469_v60 = vmul.f32 %v6183_v38, %v5744_v36  ;;  %v3487_v38 = vmul.f32 %v3483_v24, %v3472_v54  ;;  %v5269_v31 = vadd.f32 -1.0, %v6497_v48 }
 0x359   : > { %7432 = vst [vmem:[#allocation17_spill] sm:$0xff] %v6443_v34  ;;  %5201 = vmatprep.subr.msk.mxu1 %vm488_vm0, %v3382_v9  ;;  %v6463_v9 = vld [vmem:[%s7344_s13 + $0x2] ss:$8 sm:$0x3] }
 0x35a   : > { %v3471_v1 = vadd.f32 %v3469_v60, %v3467_v53  ;;  %v6551_v60 = vld [vmem:[%s7344_s13 + $0x10] ss:$8 sm:$0x3] }
 0x35b   : > { %v6470_v62 = vpop.permute.xlu0 %1757  ;;  %7436 = vst [vmem:[#allocation20_spill] sm:$0xff] %v6551_v60 }
 0x35c   : > { %v1788_v58 = vpop.permute.xlu1 %1787 }
 0x35d   : > { %v6515_v57 = vsel %vm1789_vm6, %v6260_v0, %v1788_v58  ;;  %v1791_v6 = vsel %vm1789_vm6, %v1788_v58, %v6260_v0  ;;  %vm2231_vm6 = vcmp.lt.s32.totalorder %v5640_v2, 98 }
 0x35e   : > { %v1800_v58 = vmul.f32 %v6515_v57, %v5733_v30  ;;  %v4306_v53 = vmul.f32 %v1791_v6, %v5744_v36 }
 0x35f   : > { %5198 = vmatmul.mubr.msk.f32.vlgmr.msra.gmra.mrb[0].mxu1 %vm484_vm1, %v5195_v59  ;;  %v6526_v17 = vpop.permute.xlu0 %2220  ;;  %v1799_v59 = vmul.f32 %v1791_v6, %v5733_v30  ;;  %v6569_v6 = vmul.f32 1e+30, %v5269_v31  ;;  %v7442_v31 = vrot.slane %v6329_v56, %v5731_v29 }
 0x360   : > { %5202 = vmatpush1.msk.msra.mxu1 %vm488_vm0, %v3381_v63  ;;  %v1795_v0 = vpop.permute.xlu1 %1794  ;;  %3458 = vmatprep.mubr.f32.mxu1 %v7435_v11 }
 0x361   : > { %5206 = vmatprep.subr.msk.mxu1 %vm488_vm0, %v3487_v38  ;;  %v1797_v20 = vsel %vm1796_vm8, %v6275_v37, %v1795_v0  ;;  %v6546_v63 = vsel %vm1796_vm8, %v1795_v0, %v6275_v37  ;;  %v3577_v37 = vadd.f32 %v3575_v43, %v3573_v19  ;;  %7438 = vst [vmem:[#allocation22_spill] sm:$0xff] %v6569_v6  ;;  %v5259_v43 = vadd.f32 -1.0, %v6551_v60 }
 0x362   : > { %v1801_v54 = vmul.f32 %v1797_v20, %v5744_v36  ;;  %v1802_v38 = vmul.f32 %v6546_v63, %v5744_v36  ;;  %v4304_v24 = vmul.f32 %v1797_v20, %v5733_v30  ;;  %v7449_v6 = vrot.slane %v6293_v39, %v5731_v29 }
 0x363   : > { %v6563_v0 = vpop.permute.xlu0 %2227  ;;  %vm2224_vm8 = vcmp.lt.s32.totalorder %v5640_v2, 30 }
 0x364   : > { %v1803_v51 = vadd.f32 %v1801_v54, %v1799_v59  ;;  %v1804_v4 = vadd.f32 %v1802_v38, %v1800_v58  ;;  %v6571_v13 = vadd.f32 %v4306_v53, %v4304_v24  ;;  %v6573_v20 = vpop.permute.xlu1 %2341  ;;  %v5267_v24 = vadd.f32 -1.0, %v6561_v55  ;;  %v5262_v59 = vld [vmem:[%s7344_s13 + $0x14] ss:$8 sm:$0x3] }
 0x365   : > { %v3572_v58 = vmul.f32 %v6159_v41, %v5733_v30  ;;  %v7440_v53 = vrot.slane %v6306_v14, %v5728_v28  ;;  %v7441_v38 = vrot.slane %v6329_v56, %v5728_v28  ;;  %v6607_v41 = vld [vmem:[%s7344_s13 + $0x3] ss:$8 sm:$0x3]  ;;  %v7443_v14 = vrot.slane %v6298_v44, %v5731_v29 }
 0x366   : > { %7439 = vst [vmem:[#allocation23_spill] sm:$0xff] %v6571_v13  ;;  %v1819_v19 = vmul.f32 %v7442_v31, %v1804_v4  ;;  %v6642_v31 = vmul.f32 1e+30, %v5259_v43  ;;  %v5263_v56 = vadd.f32 -1.0, %v5262_v59  ;;  %v6652_v34 = vmul.f32 1e+30, %v5267_v24 }
 0x367   : > { %v3486_v54 = vmul.f32 %v7440_v53, %v3471_v1  ;;  %v1818_v25 = vmul.f32 %v7441_v38, %v1803_v51  ;;  %v6612_v1 = vld [vmem:[%s7344_s13 + $0x25] ss:$8 sm:$0x3]  ;;  %v3591_v51 = vmul.f32 %v7443_v14, %v3577_v37  ;;  %5203 = vmatmul.mubr.msk.f32.vlgmr.msra.gmra.mrb[0].mxu1 %vm484_vm1, %v5200_v12  ;;  %v6618_v4 = vpop.permute.xlu0 %1982  ;;  %v6629_v38 = vld [vmem:[%s7344_s13 + $0x13] ss:$8 sm:$0x3]  ;;  %v3574_v37 = vmul.f32 %v6149_v23, %v5744_v36 }
 0x368   : > { %7444 = vst [vmem:[#allocation24_spill] sm:$0xff] %v6629_v38  ;;  %v6634_v12 = vpop.permute.xlu1 %2348  ;;  %5133 = vmatprep.subr.msk.mxu0 %vm488_vm0, %v1819_v19  ;;  %v5132_v14 = vld [vmem:[%s7340_s9 + $0x8] sm:$0xff]  ;;  %7445 = vst [vmem:[#allocation25_spill] sm:$0xff] %v6642_v31  ;;  %3563 = vmatprep.mubr.f32.mxu1 %v7435_v11  ;;  %v5261_v43 = vadd.f32 -1.0, %v6629_v38  ;;  %v7448_v55 = vrot.slane %v6298_v44, %v5728_v28  ;;  %v5210_v31 = vld [vmem:[%s7340_s9 + $0x80] sm:$0xff] }
 0x369   : > { %5207 = vmatpush1.msk.msra.mxu1 %vm488_vm0, %v3486_v54  ;;  %5134 = vmatpush1.msk.msra.mxu0 %vm488_vm0, %v1818_v25  ;;  %7446 = vst [vmem:[#allocation26_spill] sm:$0xff] %v6652_v34  ;;  %v3576_v13 = vadd.f32 %v3574_v37, %v3572_v58  ;;  %v4732_v25 = vrot.slane %v5262_v59, %v5731_v29  ;;  %v4737_v58 = vmul.f32 1e+30, %v5263_v56  ;;  %v6682_v37 = vld [vmem:[%s7344_s13 + $0x15] ss:$8 sm:$0x3] }
 0x36a   : > { %5211 = vmatprep.subr.msk.mxu1 %vm488_vm0, %v3591_v51  ;;  %v4728_v51 = vrot.slane %v5262_v59, %v5728_v28  ;;  %5135 = vmatmul.mubr.msk.f32.vlgmr.msra.gmra.mrb[8].mxu0 %vm484_vm1, %v5132_v14  ;;  %v5205_v59 = vld [vmem:[%s7340_s9 + $0x78] sm:$0xff]  ;;  %v7447_v56 = vrot.slane %v6287_v22, %v5728_v28  ;;  %v6701_v23 = vmul.f32 1e+30, %v5261_v43  ;;  %v3695_v14 = vmul.f32 %v7449_v6, %v6134_v21 }
 0x36b   : > { %v6658_v53 = vpop.permute.xlu0 %1989  ;;  %1975 = vmatprep.mubr.f32.mxu0 %v7435_v11  ;;  %v3590_v48 = vmul.f32 %v7448_v55, %v3576_v13  ;;  %v5265_v44 = vadd.f32 -1.0, %v6682_v37  ;;  %v2352_v21 = vsel %vm2350_vm14, %v6634_v12, %v6372_v27  ;;  %v4746_v6 = vrot.slane %v4737_v58, %v5731_v29 }
 0x36c   : > { %v1753_v54 = vpop.permute.xlu1 %1752  ;;  %v6696_v24 = vmul.f32 %v7447_v56, %v6088_v46  ;;  %v4733_v3 = vcombine.low %v4728_v51, %v4732_v25 }
 0x36d   : > { %v6710_v19 = vsel %vm1754_vm13, %v6422_v52, %v1753_v54  ;;  %v6715_v46 = vsel %vm1754_vm13, %v1753_v54, %v6422_v52  ;;  %v4742_v52 = vrot.slane %v4737_v58, %v5728_v28  ;;  %v7452_v54 = vrot.slane %v6287_v22, %v5731_v29 }
 0x36e   : > { %7450 = vst [vmem:[#allocation27_spill] sm:$0xff] %v6710_v19  ;;  %7451 = vst [vmem:[#allocation28_spill] sm:$0xff] %v6715_v46  ;;  %v1765_v22 = vmul.f32 %v6710_v19, %v5733_v30  ;;  %v6763_v34 = vmul.f32 1e+30, %v5265_v44  ;;  %vm1986_vm13 = vcmp.lt.s32.totalorder %v5640_v2, 32 }
 0x36f   : > { %5208 = vmatmul.mubr.msk.f32.vlgmr.msra.gmra.mrb[0].mxu1 %vm484_vm1, %v5205_v59  ;;  %v6718_v13 = vpop.permute.xlu0 %2101  ;;  %v3799_v43 = vmul.f32 %v7452_v54, %v6090_v47  ;;  %v1764_v47 = vmul.f32 %v6715_v46, %v5733_v30  ;;  %v2351_v46 = vsel %vm2350_vm14, %v6372_v27, %v6634_v12  ;;  %v4747_v10 = vcombine.low %v4742_v52, %v4746_v6 }
 0x370   : > { %5212 = vmatpush1.msk.msra.mxu1 %vm488_vm0, %v3590_v48  ;;  %v1760_v55 = vpop.permute.xlu1 %1759  ;;  %3667 = vmatprep.mubr.f32.mxu1 %v7435_v11  ;;  %v2344_v48 = vsel %vm2343_vm15, %v6310_v50, %v6573_v20  ;;  %v7454_v27 = vrot.slane %v6293_v39, %v5728_v28  ;;  %v2345_v52 = vsel %vm2343_vm15, %v6573_v20, %v6310_v50  ;;  %vm2112_vm14 = vcmp.lt.s32.totalorder %v5640_v2, 97 }
 0x371   : > { %5216 = vmatprep.subr.msk.mxu1 %vm488_vm0, %v3695_v14  ;;  %v6742_v51 = vsel %vm1761_vm2, %v6470_v62, %v1760_v55  ;;  %v6747_v25 = vsel %vm1761_vm2, %v1760_v55, %v6470_v62  ;;  %v3885_v14 = vmul.f32 %v2352_v21, %v5733_v30  ;;  %v5419_v55 = vld [vmem:[%s5647_s20] sm:$0xff]  ;;  %v3887_v60 = vmul.f32 %v2344_v48, %v5744_v36  ;;  %s7281_s20 = scalar_lea.hbm %s7345_s14, %s5281_s25 }
 0x372   : > { %7453 = vst [vmem:[#allocation29_spill] sm:$0xff] %v6742_v51  ;;  %v1766_v58 = vmul.f32 %v6742_v51, %v5744_v36  ;;  %v1767_v59 = vmul.f32 %v6747_v25, %v5744_v36  ;;  %v4735_v54 = vmul.f32 %v5419_v55, %v4733_v3  ;;  %v3694_v12 = vmul.f32 %v7454_v27, %v6132_v16 }
 0x373   : > { %v6758_v56 = vpop.permute.xlu0 %2108  ;;  %v7455_v6 = vrot.slane %v6390_v45, %v5728_v28  ;;  %v3884_v3 = vmul.f32 %v2351_v46, %v5733_v30  ;;  %v3889_v55 = vadd.f32 %v3887_v60, %v3885_v14  ;;  %v4307_v50 = vmul.f32 %v6515_v57, %v5744_v36  ;;  %v1784_v60 = vld [vmem:[%s7340_s9] sm:$0xff] }
 0x374   : > { %v1768_v51 = vadd.f32 %v1766_v58, %v1764_v47  ;;  %v1769_v19 = vadd.f32 %v1767_v59, %v1765_v22  ;;  %v2223_v38 = vpop.permute.xlu1 %2222  ;;  %v7456_v22 = vrot.slane %v6390_v45, %v5731_v29  ;;  %v2356_v59 = vmul.f32 %v2352_v21, %v5744_v36 }
 0x375   : > { %v4305_v20 = vmul.f32 %v6546_v63, %v5733_v30  ;;  %v2354_v57 = vmul.f32 %v2344_v48, %v5733_v30  ;;  %v3886_v21 = vmul.f32 %v2345_v52, %v5744_v36 }
 0x376   : > { %v1782_v47 = vmul.f32 %v7455_v6, %v1768_v51  ;;  %v1783_v58 = vmul.f32 %v7456_v22, %v1769_v19  ;;  %v2353_v19 = vmul.f32 %v2345_v52, %v5733_v30  ;;  %v2355_v51 = vmul.f32 %v2351_v46, %v5744_v36 }
 0x377   : > { %5213 = vmatmul.mubr.msk.f32.vlgmr.msra.gmra.mrb[0].mxu1 %vm484_vm1, %v5210_v31  ;;  %v4529_v16 = vpop.permute.xlu0 %4528  ;;  %v6808_v31 = vadd.f32 %v4747_v10, %v4735_v54  ;;  %v2358_v48 = vadd.f32 %v2356_v59, %v2354_v57  ;;  %v3888_v54 = vadd.f32 %v3886_v21, %v3884_v3  ;;  %v2226_v57 = vsel %vm2224_vm8, %v2223_v38, %v6526_v17 }
 0x378   : > { %5217 = vmatpush1.msk.msra.mxu1 %vm488_vm0, %v3694_v12  ;;  %v2230_v45 = vpop.permute.xlu1 %2229  ;;  %5136 = vmatprep.subr.msk.mxu0 %vm488_vm0, %v1783_v58  ;;  %v4533_v63 = vsel %vm655_vm5, %v6267_v8, %v4529_v16  ;;  %v4532_v14 = vsel %vm655_vm5, %v4529_v16, %v6267_v8  ;;  %v2225_v8 = vsel %vm2224_vm8, %v6526_v17, %v2223_v38  ;;  %vm1993_vm5 = vcmp.lt.s32.totalorder %v5640_v2, 96 }
 0x379   : > { %5221 = vmatprep.subr.msk.mxu1 %vm488_vm0, %v3799_v43  ;;  %v2233_v10 = vsel %vm2231_vm6, %v2230_v45, %v6563_v0  ;;  %5137 = vmatpush1.msk.msra.mxu0 %vm488_vm0, %v1782_v47  ;;  %v7457_v43 = vrot.slane %v6380_v35, %v5731_v29  ;;  %v4540_v12 = vmul.f32 %v4533_v63, %v5733_v30  ;;  %v5215_v47 = vld [vmem:[%s7340_s9 + $0x88] sm:$0xff] }
 0x37a   : > { %3771 = vmatprep.mubr.f32.mxu1 %v7435_v11  ;;  %5138 = vmatmul.mubr.msk.f32.vlgmr.msra.gmra.mrb[8].mxu0 %vm484_vm1, %v1784_v60  ;;  %v2232_v52 = vsel %vm2231_vm6, %v6563_v0, %v2230_v45  ;;  %v4541_v22 = vmul.f32 %v4532_v14, %v5733_v30  ;;  %v4869_v58 = vmul.f32 %v4533_v63, %v5744_v36 }
 0x37b   : > { %v3904_v46 = vmul.f32 %v7457_v43, %v3889_v55  ;;  %v4535_v27 = vpop.permute.xlu0 %4534  ;;  %2092 = vmatprep.mubr.f32.mxu0 %v7435_v11  ;;  %v4870_v0 = vmul.f32 %v4532_v14, %v5744_v36  ;;  %v3990_v59 = vmul.f32 %v2233_v10, %v5733_v30  ;;  %v3992_v21 = vmul.f32 %v2225_v8, %v5744_v36 }
 0x37c   : > { %v4538_v3 = vsel %vm662_vm7, %v4535_v27, %v6277_v40  ;;  %v4539_v55 = vsel %vm662_vm7, %v6277_v40, %v4535_v27  ;;  %v1985_v6 = vpop.permute.xlu1 %1984  ;;  %v2236_v63 = vmul.f32 %v2232_v52, %v5744_v36  ;;  %v2237_v14 = vmul.f32 %v2233_v10, %v5744_v36 }
 0x37d   : > { %v4542_v16 = vmul.f32 %v4538_v3, %v5744_v36  ;;  %v4543_v45 = vmul.f32 %v4539_v55, %v5744_v36  ;;  %v4867_v40 = vmul.f32 %v4538_v3, %v5733_v30  ;;  %v4868_v60 = vmul.f32 %v4539_v55, %v5733_v30 }
 0x37e   : > { %v6870_v17 = vadd.f32 %v4307_v50, %v4305_v20  ;;  %v6872_v38 = vadd.f32 %v2355_v51, %v2353_v19  ;;  %v3989_v62 = vmul.f32 %v2232_v52, %v5733_v30  ;;  %v3994_v10 = vadd.f32 %v3992_v21, %v3990_v59 }
 0x37f   : > { %5218 = vmatmul.mubr.msk.f32.vlgmr.msra.gmra.mrb[0].mxu1 %vm484_vm1, %v5215_v47  ;;  %v4578_v43 = vpop.permute.xlu0 %4577  ;;  %v4544_v27 = vadd.f32 %v4542_v16, %v4540_v12  ;;  %v4545_v39 = vadd.f32 %v4543_v45, %v4541_v22  ;;  %v6864_v44 = vadd.f32 %v4869_v58, %v4867_v40  ;;  %v6866_v3 = vadd.f32 %v4870_v0, %v4868_v60  ;;  %v5220_v45 = vld [vmem:[%s7340_s9 + $0x90] sm:$0xff] }
 0x380   : > { %5222 = vmatpush1.msk.msra.mxu1 %vm488_vm0, %v6696_v24  ;;  %v1992_v55 = vpop.permute.xlu1 %1991  ;;  %v7458_v12 = vrot.slane %v6364_v15, %v5731_v29  ;;  %v2234_v22 = vmul.f32 %v2226_v57, %v5733_v30  ;;  %v2235_v58 = vmul.f32 %v2225_v8, %v5733_v30  ;;  %v3991_v24 = vmul.f32 %v2226_v57, %v5744_v36 }
 0x381   : > { %5226 = vmatprep.subr.msk.mxu1 %vm488_vm0, %v3904_v46  ;;  %vm2105_vm7 = vcmp.lt.s32.totalorder %v5640_v2, 31  ;;  %3875 = vmatprep.mubr.f32.mxu1 %v7435_v11  ;;  %v7459_v50 = vrot.slane %v6343_v61, %v5728_v28  ;;  %v7460_v19 = vrot.slane %v6343_v61, %v5731_v29  ;;  %v6898_v46 = vsel %vm1986_vm13, %v1985_v6, %v6618_v4 }
 0x382   : > { %v6879_v47 = vmul.f32 %v7458_v12, %v2358_v48  ;;  %v1987_v48 = vsel %vm1986_vm13, %v6618_v4, %v1985_v6  ;;  %v7461_v52 = vrot.slane %v6380_v35, %v5728_v28  ;;  %v6905_v59 = vmul.f32 %v6747_v25, %v5733_v30 }
 0x383   : > { %v4557_v20 = vmul.f32 %v7459_v50, %v4544_v27  ;;  %v4558_v51 = vmul.f32 %v7460_v19, %v4545_v39  ;;  %v4584_v8 = vpop.permute.xlu0 %4583  ;;  %v6907_v61 = vadd.f32 %v2236_v63, %v2234_v22  ;;  %v6909_v39 = vadd.f32 %v2237_v14, %v2235_v58 }
 0x384   : > { %v3903_v0 = vmul.f32 %v7461_v52, %v3888_v54  ;;  %v2104_v16 = vpop.permute.xlu1 %2103  ;;  %v3993_v4 = vadd.f32 %v3991_v24, %v3989_v62  ;;  %v7462_v35 = vrot.slane %v6431_v49, %v5731_v29  ;;  %v4581_v25 = vsel %vm703_vm3, %v4578_v43, %v6323_v33 }
 0x385   : > { %v4582_v6 = vsel %vm703_vm3, %v6323_v33, %v4578_v43  ;;  %v1996_v40 = vmul.f32 %v6898_v46, %v5733_v30  ;;  %v1997_v60 = vmul.f32 %v1987_v48, %v5733_v30  ;;  %v1994_v62 = vsel %vm1993_vm5, %v6658_v53, %v1992_v55 }
 0x386   : > { %v4009_v54 = vmul.f32 %v7462_v35, %v3994_v10  ;;  %v1995_v57 = vsel %vm1993_vm5, %v1992_v55, %v6658_v53  ;;  %v7463_v21 = vrot.slane %v6441_v26, %v5728_v28  ;;  %v7464_v33 = vrot.slane %v6441_v26, %v5731_v29 }
 0x387   : > { %v1998_v43 = vmul.f32 %v1994_v62, %v5744_v36  ;;  %v1999_v27 = vmul.f32 %v1995_v57, %v5744_v36  ;;  %5223 = vmatmul.mubr.msk.f32.vlgmr.msra.gmra.mrb[0].mxu1 %vm484_vm1, %v5220_v45  ;;  %v4627_v10 = vpop.permute.xlu0 %4626  ;;  %v4589_v12 = vmul.f32 %v4582_v6, %v5733_v30  ;;  %v4590_v22 = vmul.f32 %v4581_v25, %v5733_v30 }
 0x388   : > { %v4572_v63 = vadd.f32 %v7463_v21, %v4557_v20  ;;  %v4573_v14 = vadd.f32 %v7464_v33, %v4558_v51  ;;  %v4587_v53 = vsel %vm710_vm4, %v4584_v8, %v6382_v42  ;;  %v4588_v26 = vsel %vm710_vm4, %v6382_v42, %v4584_v8  ;;  %5227 = vmatpush1.msk.msra.mxu1 %vm488_vm0, %v3903_v0  ;;  %v2111_v55 = vpop.permute.xlu1 %2110 }
 0x389   : > { %v4832_v58 = vmul.f32 %v4582_v6, %v5744_v36  ;;  %v4833_v24 = vmul.f32 %v4581_v25, %v5744_v36  ;;  %v2000_v50 = vadd.f32 %v1998_v43, %v1996_v40  ;;  %v2001_v20 = vadd.f32 %v1999_v27, %v1997_v60  ;;  %5231 = vmatprep.subr.msk.mxu1 %vm488_vm0, %v4009_v54 }
 0x38a   : > { %v4591_v19 = vmul.f32 %v4587_v53, %v5744_v36  ;;  %v4592_v51 = vmul.f32 %v4588_v26, %v5744_v36  ;;  %v4830_v52 = vmul.f32 %v4587_v53, %v5733_v30  ;;  %v4831_v45 = vmul.f32 %v4588_v26, %v5733_v30  ;;  %3980 = vmatprep.mubr.f32.mxu1 %v7435_v11 }
 0x38b   : > { %v7465_v42 = vrot.slane %v6431_v49, %v5728_v28  ;;  %v4202_v0 = vmul.f32 %v1987_v48, %v5744_v36  ;;  %v7466_v35 = vrot.slane %v6463_v9, %v5728_v28  ;;  %v7467_v25 = vrot.slane %v6463_v9, %v5731_v29  ;;  %v5140_v49 = vld [vmem:[%s7340_s9 + $0x10] sm:$0xff]  ;;  %v4633_v48 = vpop.permute.xlu0 %4632 }
 0x38c   : > { %v4593_v40 = vadd.f32 %v4591_v19, %v4589_v12  ;;  %v4594_v60 = vadd.f32 %v4592_v51, %v4590_v22  ;;  %v6969_v21 = vadd.f32 %v4832_v58, %v4830_v52  ;;  %v6971_v33 = vadd.f32 %v4833_v24, %v4831_v45  ;;  %v5225_v12 = vld [vmem:[%s7340_s9 + $0x98] sm:$0xff] }
 0x38d   : > { %v4008_v8 = vmul.f32 %v7465_v42, %v3993_v4  ;;  %v2015_v54 = vmul.f32 %v7466_v35, %v2000_v50  ;;  %v2016_v6 = vmul.f32 %v7467_v25, %v2001_v20  ;;  %v4635_v4 = vpop.permute.xlu1 %4634  ;;  %v4574_v43 = vmax.f32 %v4572_v63, -1e+30 }
 0x38e   : > { %v4575_v27 = vmax.f32 %v4573_v14, -1e+30  ;;  %v2106_v53 = vsel %vm2105_vm7, %v6718_v13, %v2104_v16  ;;  %v2107_v9 = vsel %vm2105_vm7, %v2104_v16, %v6718_v13  ;;  %v4199_v22 = vmul.f32 %v1994_v62, %v5733_v30 }
 0x38f   : > { %5141 = vmatprep.subr.msk.mxu0 %vm488_vm0, %v2016_v6  ;;  %v4200_v26 = vmul.f32 %v1995_v57, %v5733_v30  ;;  %v7468_v63 = vrot.slane %v6492_v18, %v5728_v28  ;;  %v7469_v58 = vrot.slane %v6492_v18, %v5731_v29  ;;  %v6998_v13 = vsel %vm902_vm9, %v4627_v10, %v6436_v5  ;;  %v4676_v25 = vpop.permute.xlu0 %4675 }
 0x390   : > { %5142 = vmatpush1.msk.msra.mxu0 %vm488_vm0, %v2015_v54  ;;  %v7003_v16 = vsel %vm902_vm9, %v6436_v5, %v4627_v10  ;;  %v2113_v62 = vsel %vm2112_vm14, %v6758_v56, %v2111_v55  ;;  %v2114_v18 = vsel %vm2112_vm14, %v2111_v55, %v6758_v56  ;;  %v7470_v57 = vrot.slane %v6567_v7, %v5728_v28 }
 0x391   : > { %v4606_v14 = vmul.f32 %v7468_v63, %v4593_v40  ;;  %v4607_v24 = vmul.f32 %v7469_v58, %v4594_v60  ;;  %5143 = vmatmul.mubr.msk.f32.vlgmr.msra.gmra.mrb[8].mxu0 %vm484_vm1, %v5140_v49  ;;  %v7471_v20 = vrot.slane %v6567_v7, %v5731_v29  ;;  %v2115_v5 = vmul.f32 %v2107_v9, %v5733_v30  ;;  %v4678_v54 = vpop.permute.xlu1 %4677 }
 0x392   : > { %v2116_v10 = vmul.f32 %v2106_v53, %v5733_v30  ;;  %5228 = vmatmul.mubr.msk.f32.vlgmr.msra.gmra.mrb[0].mxu1 %vm484_vm1, %v5225_v12  ;;  %v4096_v51 = vmul.f32 %v2107_v9, %v5744_v36  ;;  %v4097_v56 = vmul.f32 %v2106_v53, %v5744_v36  ;;  %v4638_v55 = vmul.f32 %v7003_v16, %v5733_v30 }
 0x393   : > { %v4621_v50 = vadd.f32 %v7470_v57, %v4606_v14  ;;  %v4622_v19 = vadd.f32 %v7471_v20, %v4607_v24  ;;  %v4639_v52 = vmul.f32 %v6998_v13, %v5733_v30  ;;  %5232 = vmatpush1.msk.msra.mxu1 %vm488_vm0, %v4008_v8  ;;  %v2117_v42 = vmul.f32 %v2113_v62, %v5744_v36 }
 0x394   : > { %v2118_v35 = vmul.f32 %v2114_v18, %v5744_v36  ;;  %2211 = vmatprep.mubr.f32.mxu0 %v7435_v11  ;;  %v4094_v6 = vmul.f32 %v2113_v62, %v5733_v30  ;;  %v4095_v40 = vmul.f32 %v2114_v18, %v5733_v30  ;;  %v4636_v60 = vsel %vm909_vm10, %v4633_v48, %v4635_v4 }
 0x395   : > { %v7028_v7 = vmax.f32 %v4574_v43, %v4621_v50  ;;  %v7030_v45 = vmax.f32 %v4575_v27, %v4622_v19  ;;  %v4637_v8 = vsel %vm909_vm10, %v4635_v4, %v4633_v48  ;;  %4085 = vmatprep.mubr.f32.mxu1 %v7435_v11  ;;  %v2119_v49 = vadd.f32 %v2117_v42, %v2115_v5  ;;  %v7477_v5 = vld [vmem:[#allocation20_spill] sm:$0xff] }
 0x396   : > { %v2120_v43 = vadd.f32 %v2118_v35, %v2116_v10  ;;  %v4640_v27 = vmul.f32 %v4636_v60, %v5744_v36  ;;  %v4641_v53 = vmul.f32 %v4637_v8, %v5744_v36  ;;  %v4201_v9 = vmul.f32 %v6898_v46, %v5744_v36 }
 0x397   : > { %v4204_v12 = vadd.f32 %v4202_v0, %v4200_v26  ;;  %v4098_v63 = vadd.f32 %v4096_v51, %v4094_v6  ;;  %v4099_v14 = vadd.f32 %v4097_v56, %v4095_v40  ;;  %v7472_v58 = vrot.slane %v6607_v41, %v5728_v28 }
 0x398   : > { %v7473_v4 = vrot.slane %v6607_v41, %v5731_v29  ;;  %v4642_v62 = vadd.f32 %v4640_v27, %v4638_v55  ;;  %v4643_v18 = vadd.f32 %v4641_v53, %v4639_v52  ;;  %v7474_v57 = vrot.slane %v6417_v32, %v5728_v28  ;;  %v4682_v55 = vpop.permute.xlu0 %4681  ;;  %v7480_v52 = vld [vmem:[#allocation18_spill] sm:$0xff] }
 0x399   : > { %v2134_v24 = vmul.f32 %v7472_v58, %v2119_v49  ;;  %v7475_v46 = vrot.slane %v6417_v32, %v5731_v29  ;;  %v4203_v26 = vadd.f32 %v4201_v9, %v4199_v22  ;;  %v7476_v20 = vrot.slane %v6612_v1, %v5731_v29  ;;  %v4684_v22 = vpop.permute.xlu1 %4683 }
 0x39a   : > { %v2135_v48 = vmul.f32 %v7473_v4, %v2120_v43  ;;  %v2253_v50 = vmul.f32 %v7474_v57, %v6907_v61  ;;  %v7478_v41 = vrot.slane %v7477_v5, %v5728_v28  ;;  %v7479_v51 = vrot.slane %v7477_v5, %v5731_v29 }
 0x39b   : > { %v2254_v0 = vmul.f32 %v7475_v46, %v6909_v39  ;;  %v4114_v19 = vmul.f32 %v7476_v20, %v4099_v14  ;;  %v4679_v61 = vsel %vm1021_vm11, %v4676_v25, %v4678_v54  ;;  %v4680_v32 = vsel %vm1021_vm11, %v4678_v54, %v4676_v25  ;;  %v5145_v39 = vld [vmem:[%s7340_s9 + $0x18] sm:$0xff] }
 0x39c   : > { %v4655_v10 = vmul.f32 %v7478_v41, %v4642_v62  ;;  %v4656_v56 = vmul.f32 %v7479_v51, %v4643_v18  ;;  %5146 = vmatprep.subr.msk.mxu0 %vm488_vm0, %v2135_v48  ;;  %v7481_v42 = vrot.slane %v7480_v52, %v5731_v29  ;;  %v7482_v6 = vrot.slane %v6612_v1, %v5728_v28  ;;  %v7483_v54 = vld [vmem:[#allocation25_spill] sm:$0xff]  ;;  %v5230_v1 = vld [vmem:[%s7340_s9 + $0xa0] sm:$0xff] }
 0x39d   : > { %v4793_v49 = vmul.f32 %v4636_v60, %v5733_v30  ;;  %v4794_v43 = vmul.f32 %v4637_v8, %v5733_v30  ;;  %5236 = vmatprep.subr.msk.mxu1 %vm488_vm0, %v4114_v19  ;;  %v7484_v25 = vrot.slane %v7483_v54, %v5728_v28  ;;  %v7485_v53 = vrot.slane %v7483_v54, %v5731_v29  ;;  %v5150_v41 = vld [vmem:[%s7340_s9 + $0x20] sm:$0xff] }
 0x39e   : > { %v4219_v35 = vmul.f32 %v7481_v42, %v4204_v12  ;;  %v4113_v40 = vmul.f32 %v7482_v6, %v4098_v63  ;;  %v4687_v12 = vmul.f32 %v4680_v32, %v5733_v30  ;;  %v4688_v14 = vmul.f32 %v4679_v61, %v5733_v30  ;;  %5147 = vmatpush1.msk.msra.mxu0 %vm488_vm0, %v2134_v24 }
 0x39f   : > { %v4670_v27 = vadd.f32 %v7484_v25, %v4655_v10  ;;  %v4671_v9 = vadd.f32 %v7485_v53, %v4656_v56  ;;  %v4758_v60 = vmul.f32 %v4680_v32, %v5744_v36  ;;  %v4759_v8 = vmul.f32 %v4679_v61, %v5744_v36  ;;  %5148 = vmatmul.mubr.msk.f32.vlgmr.msra.gmra.mrb[8].mxu0 %vm484_vm1, %v5145_v39  ;;  %v7488_v10 = vld [vmem:[#allocation15_spill] sm:$0xff] }
 0x3a0   : > { %5151 = vmatprep.subr.msk.mxu0 %vm488_vm0, %v2254_v0  ;;  %v4685_v63 = vsel %vm1028_vm12, %v4682_v55, %v4684_v22  ;;  %v4686_v24 = vsel %vm1028_vm12, %v4684_v22, %v4682_v55  ;;  %5233 = vmatmul.mubr.msk.f32.vlgmr.msra.gmra.mrb[0].mxu1 %vm484_vm1, %v5230_v1  ;;  %v4796_v2 = vmul.f32 %v6998_v13, %v5744_v36  ;;  %v7486_v13 = vld [vmem:[#allocation24_spill] sm:$0xff]  ;;  %v7490_v61 = vld [vmem:[#allocation27_spill] sm:$0xff] }
 0x3a1   : > { %v4672_v58 = vmax.f32 %v7028_v7, %v4670_v27  ;;  %v4673_v4 = vmax.f32 %v7030_v45, %v4671_v9  ;;  %5152 = vmatpush1.msk.msra.mxu0 %vm488_vm0, %v2253_v50  ;;  %v4689_v48 = vmul.f32 %v4685_v63, %v5744_v36  ;;  %v4690_v62 = vmul.f32 %v4686_v24, %v5744_v36  ;;  %v5235_v25 = vld [vmem:[%s7340_s9 + $0xa8] sm:$0xff] }
 0x3a2   : > { %5156 = vmatprep.subr.msk.mxu0 %vm488_vm0, %v6879_v47  ;;  %v4756_v18 = vmul.f32 %v4685_v63, %v5733_v30  ;;  %v4757_v57 = vmul.f32 %v4686_v24, %v5733_v30  ;;  %v4795_v7 = vmul.f32 %v7003_v16, %v5744_v36  ;;  %5237 = vmatpush1.msk.msra.mxu1 %vm488_vm0, %v4113_v40  ;;  %v7497_v53 = vld [vmem:[#allocation19_spill] sm:$0xff] }
 0x3a3   : > { %v4691_v45 = vadd.f32 %v4689_v48, %v4687_v12  ;;  %2330 = vmatprep.mubr.f32.mxu0 %v7435_v11  ;;  %v4692_v47 = vadd.f32 %v4690_v62, %v4688_v14  ;;  %5241 = vmatprep.subr.msk.mxu1 %vm488_vm0, %v4219_v35  ;;  %v4751_v20 = vcombine.high %v6808_v31, %v6808_v31  ;;  %v7504_v48 = vld [vmem:[#allocation10_spill] sm:$0xff] }
 0x3a4   : > { %v4760_v50 = vadd.f32 %v4758_v60, %v4756_v18  ;;  %v4761_v46 = vadd.f32 %v4759_v8, %v4757_v57  ;;  %4190 = vmatprep.mubr.f32.mxu1 %v7435_v11  ;;  %v4797_v0 = vadd.f32 %v4795_v7, %v4793_v49  ;;  %v4785_v16 = vrot.slane %v6763_v34, %v5731_v29 }
 0x3a5   : > { %v7487_v19 = vrot.slane %v7486_v13, %v5728_v28  ;;  %v7489_v51 = vrot.slane %v7488_v10, %v5731_v29  ;;  %v4412_v32 = vmul.f32 %v7490_v61, %v5744_v36  ;;  %v4798_v39 = vadd.f32 %v4796_v2, %v4794_v43 }
 0x3a6   : > { %v7491_v22 = vrot.slane %v7486_v13, %v5731_v29  ;;  %v7492_v42 = vrot.slane %v6364_v15, %v5728_v28  ;;  %v7493_v6 = vrot.slane %v6701_v23, %v5728_v28  ;;  %v7495_v43 = vrot.slane %v6682_v37, %v5731_v29 }
 0x3a7   : > { %v4704_v5 = vmul.f32 %v7487_v19, %v4691_v45  ;;  %v4324_v56 = vmul.f32 %v7489_v51, %v6870_v17  ;;  %v7494_v17 = vrot.slane %v6682_v37, %v5728_v28  ;;  %v4414_v27 = vadd.f32 %v4412_v32, %v6905_v59  ;;  %5153 = vmatmul.mubr.msk.f32.vlgmr.msra.gmra.mrb[8].mxu0 %vm484_vm1, %v5150_v41  ;;  %v1659_v45 = vpop.permute.xlu1 %1658  ;;  %v7510_v19 = vld [vmem:[#allocation26_spill] sm:$0xff]  ;;  %v7512_v51 = vld [vmem:[#allocation13_spill] sm:$0xff] }
 0x3a8   : > { %v4705_v55 = vmul.f32 %v7491_v22, %v4692_v47  ;;  %v2372_v35 = vmul.f32 %v7492_v42, %v6872_v38  ;;  %v4774_v54 = vmul.f32 %v7495_v43, %v4761_v46  ;;  %v7496_v15 = vrot.slane %v7480_v52, %v5728_v28  ;;  %2449 = vmatprep.mubr.f32.mxu0 %v7435_v11  ;;  %v7507_v46 = vld [vmem:[#allocation12_spill] sm:$0xff]  ;;  %v7515_v42 = vld [vmem:[#allocation22_spill] sm:$0xff] }
 0x3a9   : > { %v4719_v40 = vadd.f32 %v7493_v6, %v4704_v5  ;;  %v4773_v49 = vmul.f32 %v7494_v17, %v4760_v50  ;;  %v7498_v9 = vrot.slane %v7497_v53, %v5728_v28  ;;  %v7499_v14 = vrot.slane %v6701_v23, %v5731_v29  ;;  %v480_v23 = vpop.permute.xlu0 %479  ;;  %5238 = vmatmul.mubr.msk.f32.vlgmr.msra.gmra.mrb[0].mxu1 %vm484_vm1, %v5235_v25  ;;  %v5240_v17 = vld [vmem:[%s7340_s9 + $0xb0] sm:$0xff]  ;;  %v7518_v25 = vld [vmem:[#allocation23_spill] sm:$0xff] }
 0x3aa   : > { %v4218_v38 = vmul.f32 %v7496_v15, %v4203_v26  ;;  %v7500_v59 = vrot.slane %v7497_v53, %v5731_v29  ;;  %v7501_v26 = vld [vmem:[#allocation21_spill] sm:$0xff]  ;;  %5157 = vmatpush1.msk.msra.mxu0 %vm488_vm0, %v2372_v35  ;;  %v560_v62 = vadd.f32 %v7504_v48, %v480_v23  ;;  %v4789_v2 = vadd.f32 %v4785_v16, %v4774_v54 }
 0x3ab   : > { %v4847_v12 = vmul.f32 %v7498_v9, %v6969_v21  ;;  %v4720_v37 = vadd.f32 %v7499_v14, %v4705_v55  ;;  %v7502_v1 = vrot.slane %v7501_v26, %v5728_v28  ;;  %v4721_v8 = vmax.f32 %v4672_v58, %v4719_v40  ;;  %4295 = vmatprep.mubr.f32.mxu1 %v7435_v11  ;;  %v7520_v53 = vld [vmem:[#allocation29_spill] sm:$0xff] }
 0x3ac   : > { %v4848_v52 = vmul.f32 %v7500_v59, %v6971_v33  ;;  %v7503_v21 = vrot.slane %v7501_v26, %v5731_v29  ;;  %v7505_v33 = vld [vmem:[#allocation11_spill] sm:$0xff]  ;;  %v7506_v58 = vrot.slane %v6763_v34, %v5728_v28  ;;  %5242 = vmatpush1.msk.msra.mxu1 %vm488_vm0, %v4218_v38  ;;  %v564_v47 = vmax.f32 %v560_v62, 0.0 }
 0x3ad   : > { %v4810_v60 = vmul.f32 %v7502_v1, %v4797_v0  ;;  %v4722_v24 = vmax.f32 %v4673_v4, %v4720_v37  ;;  %v562_v18 = vadd.f32 %v7505_v33, %v480_v23  ;;  %v4753_v57 = vmax.f32 %v4721_v8, %v6808_v31  ;;  %5246 = vmatprep.subr.msk.mxu1 %vm488_vm0, %v4324_v56  ;;  %v7508_v31 = vld [vmem:[#allocation14_spill] sm:$0xff] }
 0x3ae   : > { %v4811_v63 = vmul.f32 %v7503_v21, %v4798_v39  ;;  %v4788_v7 = vadd.f32 %v7506_v58, %v4773_v49  ;;  %v1661_v0 = vadd.f32 %v1659_v45, %v7507_v46  ;;  %v7509_v13 = vrot.slane %v7508_v31, %v5728_v28  ;;  %566 = vst [vmem:[%s7218_s5] sm:$0xff] %v564_v47  ;;  %v4518_v46 = vpop.permute.xlu0 %4517 }
 0x3af   : > { %v4754_v4 = vmax.f32 %v4722_v24, %v4751_v20  ;;  %v565_v50 = vmax.f32 %v562_v18, 0.0  ;;  %v7511_v16 = vrot.slane %v7510_v19, %v5728_v28  ;;  %v5155_v20 = vld [vmem:[%s7340_s9 + $0x28] sm:$0xff]  ;;  %v1662_v56 = vadd.f32 %v1659_v45, %v7512_v51  ;;  %v4908_v18 = vpop.permute.xlu1 %4907 }
 0x3b0   : > { %v4884_v34 = vmul.f32 %v7509_v13, %v6864_v44  ;;  %v4790_v41 = vmax.f32 %v4753_v57, %v4788_v7  ;;  %v7513_v61 = vrot.slane %v7508_v31, %v5731_v29  ;;  %v7514_v39 = vrot.slane %v7510_v19, %v5731_v29  ;;  %5158 = vmatmul.mubr.msk.f32.vlgmr.msra.gmra.mrb[8].mxu0 %vm484_vm1, %v5155_v20 }
 0x3b1   : > { %v4825_v5 = vadd.f32 %v7511_v16, %v4810_v60  ;;  %v4791_v22 = vmax.f32 %v4754_v4, %v4789_v2  ;;  %567 = vst [vmem:[%s7218_s5 + $0x8] sm:$0xff] %v565_v50  ;;  %v1663_v55 = vmax.f32 %v1661_v0, 0.0  ;;  %v7516_v35 = vrot.slane %v7515_v42, %v5728_v28  ;;  %4983 = vmatprep.mubr.f32.mxu0 %v7435_v11 }
 0x3b2   : > { %v4885_v32 = vmul.f32 %v7513_v61, %v6866_v3  ;;  %v4826_v44 = vadd.f32 %v7514_v39, %v4811_v63  ;;  %v1664_v3 = vmax.f32 %v1662_v56, 0.0  ;;  %v7517_v49 = vrot.slane %v7515_v42, %v5731_v29  ;;  %5243 = vmatmul.mubr.msk.f32.vlgmr.msra.gmra.mrb[0].mxu1 %vm484_vm1, %v5240_v17 }
 0x3b3   : > { %v4862_v6 = vadd.f32 %v7516_v35, %v4847_v12  ;;  %v4827_v40 = vmax.f32 %v4790_v41, %v4825_v5  ;;  %1665 = vst [vmem:[%s7218_s5 + $0x10] sm:$0xff] %v1663_v55  ;;  %v7519_v15 = vrot.slane %v7488_v10, %v5728_v28  ;;  %v4409_v9 = vmul.f32 %v7520_v53, %v5733_v30  ;;  %v7521_v12 = vld [vmem:[#allocation17_spill] sm:$0xff]  ;;  %v7526_v30 = vld [vmem:[#allocation28_spill] sm:$0xff] }
 0x3b4   : > { %v4863_v43 = vadd.f32 %v7517_v49, %v4848_v52  ;;  %v4828_v54 = vmax.f32 %v4791_v22, %v4826_v44  ;;  %v7522_v14 = vrot.slane %v7521_v12, %v5728_v28  ;;  %1666 = vst [vmem:[%s7218_s5 + $0x18] sm:$0xff] %v1664_v3  ;;  %v7523_v52 = vld [vmem:[#allocation16_spill] sm:$0xff]  ;;  %v7525_v60 = vrot.slane %v7521_v12, %v5731_v29 }
 0x3b5   : > { %v4323_v38 = vmul.f32 %v7519_v15, %v7518_v25  ;;  %v4864_v59 = vmax.f32 %v4827_v40, %v4862_v6  ;;  %v7524_v26 = vrot.slane %v7523_v52, %v5731_v29  ;;  %v4411_v23 = vmul.f32 %v7526_v30, %v5744_v36  ;;  %4400 = vmatprep.mubr.f32.mxu1 %v7435_v11  ;;  %v4903_v29 = vld [vmem:[%s7342_s11] sm:$0xff]  ;;  %v5245_v36 = vld [vmem:[%s7340_s9 + $0xb8] sm:$0xff] }
 0x3b6   : > { %v4899_v37 = vadd.f32 %v7522_v14, %v4884_v34  ;;  %v4900_v10 = vadd.f32 %v7525_v60, %v4885_v32  ;;  %v4865_v8 = vmax.f32 %v4828_v54, %v4863_v43 }
 0x3b7   : > { %v4429_v1 = vmul.f32 %v7524_v26, %v4414_v27  ;;  %5247 = vmatpush1.msk.msra.mxu1 %vm488_vm0, %v4323_v38  ;;  %v4421_v27 = vrot.slane %v7523_v52, %v5728_v28  ;;  %v4413_v24 = vadd.f32 %v4411_v23, %v4409_v9  ;;  %v5250_v28 = vld [vmem:[%s7340_s9 + $0xc0] sm:$0xff] }
 0x3b8   : > { %v4901_v21 = vmax.f32 %v4864_v59, %v4899_v37  ;;  %v4902_v63 = vmax.f32 %v4865_v8, %v4900_v10 }
 0x3b9   : > { %5251 = vmatprep.subr.msk.mxu1 %vm488_vm0, %v4429_v1  ;;  %v4428_v48 = vmul.f32 %v4421_v27, %v4413_v24 }
 0x3ba   : > { %5272 = vmatprep.subr.msk.mxu0 %vm488_vm0, %v4902_v63  ;;  %5248 = vmatmul.mubr.msk.f32.vlgmr.msra.gmra.mrb[0].mxu1 %vm484_vm1, %v5245_v36 }
 0x3bb   : > { %5273 = vmatpush1.msk.msra.mxu0 %vm488_vm0, %v4901_v21  ;;  %5252 = vmatpush1.msk.msra.mxu1 %vm488_vm0, %v4428_v48 }
 0x3bc   : > { %5274 = vmatmul.mubr.msk.f32.vlgmr.msra.gmra.mrb[10].mxu0 %vm484_vm1, %v4903_v29  ;;  %4505 = vmatprep.mubr.f32.mxu1 %v7435_v11 }
 0x3c2   : > { %5253 = vmatmul.mubr.msk.f32.vlgmr.msra.gmra.mrb[0].mxu1 %vm484_vm1, %v5250_v28 }
 0x483   : > { %v2451_v62 = vpop.f32.mrb[8].mxu0 }
 0x484   : > { %v2453_v33 = vpop.f32.mrb[9].mxu0 }
 0x48f   : > { %v4985_v57 = vpop.f32.mrb[10].mxu0 }
 0x490   : > { %v4986_v58 = vadd.f32 %v4985_v57, %v4908_v18  ;;  %v4987_v7 = vpop.f32.mrb[11].mxu0 }
 0x491   : > { %v4988_v2 = vadd.f32 %v4987_v7, %v4908_v18 }
 0x492   : > { %v4990_v45 = vmax.f32 %v4986_v58, 0.0 }
 0x493   : > { %v4991_v4 = vmax.f32 %v4988_v2, 0.0 }
 0x494   : > { %4992 = vst [vmem:[%s7218_s5 + $0x30] sm:$0xff] %v4990_v45 }
 0x495   : > { %4993 = vst [vmem:[%s7218_s5 + $0x38] sm:$0xff] %v4991_v4  ;;  %v4507_v11 = vpop.f32.mrb[0].mxu1 }
 0x496   : > { %v5282_v47 = vadd.f32 %v4507_v11, %v2451_v62  ;;  %v4509_v50 = vpop.f32.mrb[1].mxu1 }
 0x497   : > { %v5283_v0 = vadd.f32 %v4509_v50, %v2453_v33 }
 0x498   : > { %v4520_v31 = vadd.f32 %v5282_v47, %v4518_v46 }
 0x499   : > { %v4521_v13 = vadd.f32 %v5283_v0, %v4518_v46 }
 0x49a   : > { %v4522_v34 = vmax.f32 %v4520_v31, 0.0 }
 0x49b   : > { %v4523_v19 = vmax.f32 %v4521_v13, 0.0 }
 0x49c   : > { %4524 = vst [vmem:[%s7218_s5 + $0x20] sm:$0xff] %v4522_v34 }
 0x49d   : > { %4525 = vst [vmem:[%s7218_s5 + $0x28] sm:$0xff] %v4523_v19 }
 0x49e   : > { %5433 = shalt.err (!%p5430_p3)
}
 0x49f   : > { %s5434_s26 = scalar_lea.hbm %s7281_s20, 1024  ;;  %s5438_s1 = scalar_lea.hbm %s7345_s14, 2048 }
 0x4a0   : > { %p5435_p4 = scmp.ne.s32.totalorder %s7281_s20, %s5434_s26  ;;  %p5439_p9 = scmp.lt.u32.totalorder %s7281_s20, %s7345_s14 }
 0x4a1   : > { %p5440_p10 = scmp.lt.u32.totalorder %s5438_s1, %s5434_s26  ;;  %p5442_p12 = scmp.lt.u32.totalorder %s5434_s26, %s7281_s20 }
 0x4a2   : > { %p5436_p7 = pnand %p5435_p4, %p5625_p5 }
 0x4a3   : > { %p5441_p11 = por %p5440_p10, %p5439_p9 }
 0x4a4   : > { %p5437_p8 = pneg %p5436_p7 }
 0x4a5   : > { %p5443_p13 = por %p5442_p12, %p5441_p11 }
 0x4a7   : > { %p5444_p0 = pnand %p5443_p13, %p5437_p8 }
 0x4a9   : > { %5447 = shalt.err (!%p5444_p0)
}
 0x4aa   : > { %s5511_s24 = smov 256  }
 0x4ab   : > { %5350 = dma.vmem_to_hbm [thread:$0]  (%p5625_p5), %s7283_s15, 1024, %s7281_s20, %s7289_s21, %s5511_s24, %s5511_s24, %s7422_s28  }
 0x4ac PF: > { %s7527_s27 = sld [smem:[#allocation5_spill]]  ;;  %p5356_p1 = scmp.ge.s32.totalorder %s5482_s16, 2 }
 0x4ae   : > { %p5353_p2 = pnand %p5356_p1, %p5629_p6 }
 0x4b2   : > { %s5023_s25 = sand.u32 1, %s7527_s27  }
 0x4b3   : > { %s5024_s22 = scalar_lea.sflag [#allocation3], %s5023_s25 }
 0x4b4   : > { %5465 = dma.done.wait (!%p5353_p2), %s5024_s22, 1024  }
 0x4b5   : > { %5467 = vsyncadd (!%p5353_p2), %s5024_s22, 4294966272  ;;  %s7529_s16 = sld [smem:[#allocation7_spill]]  ;;  %s7530_s0 = sld [smem:[#allocation6_spill]] }
 0x4b6   : > { %s7531_s15 = sld [smem:[#allocation8_spill]]  ;;  %s7532_s29 = smov %s5474_s30 }
 0x4bb   : > { %p24_p3 = scmp.ge.s32.totalorder %s7529_s16, 4   ;;  %s7533_s30 = smov %s7530_s0 }
 0x4bd   :  { %26 = sbr.rel (!%p24_p3) target bundleno = 11 (0xb), region = 167 }
 0x4c4   :  { %5029 = vsyncpa [#allocation3], 1 }
 0x4c5   :  { %5031 = vsyncpa [#allocation3 + $0x1], 1 }

</bundles_post_ra>
